<compile_context>
chip_gen: v6e
topology: v6e:2x2x1
jax: 0.10.0
libtpu: 0.0.40
codegen_flags: <defaults>
</compile_context>

<pallas_src>
import functools

import jax
import jax.numpy as jnp
import numpy as np
from jax.experimental import pallas as pl
from jax.experimental.pallas import tpu as pltpu


def _round_up(x, m):
    return (x + m - 1) // m * m


_BM_MAX = 256  # M tile: 256 feeds the 2x256x256 MXU (v6e/v7x) full-width.


def _m_tiling(M):
    """(padded M, M tile, #tiles).  Small M -> one small block; large M -> 256 tiles."""
    if M <= _BM_MAX:
        Mp = _round_up(M, 16)
        return Mp, Mp, 1
    Mp = _round_up(M, _BM_MAX)
    return Mp, _BM_MAX, Mp // _BM_MAX


def _pad2(x, Rp, Cp):
    R, C = x.shape
    return jnp.pad(x, ((0, Rp - R), (0, Cp - C)))


# --------------------------------------------------------------------------
# Pallas kernels
# --------------------------------------------------------------------------
def _gemm_bias_act_kernel(x_ref, w_ref, b_ref, o_ref, *, relu):
    acc = jnp.dot(x_ref[...], w_ref[...], preferred_element_type=jnp.float32)
    acc = acc + b_ref[...]
    if relu:
        acc = jnp.maximum(acc, 0.0)
    o_ref[...] = acc.astype(o_ref.dtype)


def _gemm4_maxpool_kernel(p0_ref, p1_ref, p2_ref, p3_ref, w_ref, b_ref, o_ref):
    # Four pooling phases of the im2col patch matrix -> four partial GEMMs;
    # bias/ReLU run once after the max (ReLU is monotone, bias is per-channel).
    w = w_ref[...]
    a0 = jnp.dot(p0_ref[...], w, preferred_element_type=jnp.float32)
    a1 = jnp.dot(p1_ref[...], w, preferred_element_type=jnp.float32)
    a2 = jnp.dot(p2_ref[...], w, preferred_element_type=jnp.float32)
    a3 = jnp.dot(p3_ref[...], w, preferred_element_type=jnp.float32)
    acc = jnp.maximum(jnp.maximum(a0, a1), jnp.maximum(a2, a3))
    o_ref[...] = jnp.maximum(acc + b_ref[...], 0.0).astype(o_ref.dtype)


def _fc_stack_kernel(x_ref, w1_ref, b1_ref, w2_ref, b2_ref, w3_ref, b3_ref,
                     o_ref):
    h = jnp.dot(x_ref[...], w1_ref[...], preferred_element_type=jnp.float32)
    h = jnp.maximum(h + b1_ref[...], 0.0)
    h = jnp.dot(h.astype(jnp.bfloat16), w2_ref[...],
                preferred_element_type=jnp.float32)
    h = jnp.maximum(h + b2_ref[...], 0.0)
    h = jnp.dot(h.astype(jnp.bfloat16), w3_ref[...],
                preferred_element_type=jnp.float32)
    o_ref[...] = (h + b3_ref[...]).astype(o_ref.dtype)


# --------------------------------------------------------------------------
# GEMM wrappers
# --------------------------------------------------------------------------
def gemm_bias_act_pallas(x, w, b, *, relu, out_dtype):
    """relu?(x @ w + b); x (M,K) bf16, w (K,N) bf16, b (N,) f32."""
    M, K = x.shape
    N = w.shape[1]
    Kp, Np = _round_up(K, 128), _round_up(N, 128)
    Mp, bm, gm = _m_tiling(M)
    xp = _pad2(x, Mp, Kp)
    wp = _pad2(w, Kp, Np)
    bp = jnp.pad(b.astype(jnp.float32), (0, Np - N)).reshape(1, Np)
    out = pl.pallas_call(
        functools.partial(_gemm_bias_act_kernel, relu=relu),
        out_shape=jax.ShapeDtypeStruct((Mp, Np), out_dtype),
        grid=(gm,),
        in_specs=[
            pl.BlockSpec((bm, Kp), lambda i: (i, 0)),
            pl.BlockSpec((Kp, Np), lambda i: (0, 0)),
            pl.BlockSpec((1, Np), lambda i: (0, 0)),
        ],
        out_specs=pl.BlockSpec((bm, Np), lambda i: (i, 0)),
        compiler_params=pltpu.CompilerParams(
            dimension_semantics=("parallel",)),
    )(xp, wp, bp)
    return out[:M, :N]


def gemm4_maxpool_pallas(phases, w, b, *, out_dtype):
    """relu(max_over_4_phases(phase @ w) + b); fused conv+bias+relu+pool GEMM."""
    M, K = phases[0].shape
    N = w.shape[1]
    Kp, Np = _round_up(K, 128), _round_up(N, 128)
    Mp, bm, gm = _m_tiling(M)
    pads = [_pad2(p, Mp, Kp) for p in phases]
    wp = _pad2(w, Kp, Np)
    bp = jnp.pad(b.astype(jnp.float32), (0, Np - N)).reshape(1, Np)
    out = pl.pallas_call(
        _gemm4_maxpool_kernel,
        out_shape=jax.ShapeDtypeStruct((Mp, Np), out_dtype),
        grid=(gm,),
        in_specs=[pl.BlockSpec((bm, Kp), lambda i: (i, 0)) for _ in range(4)]
        + [pl.BlockSpec((Kp, Np), lambda i: (0, 0)),
           pl.BlockSpec((1, Np), lambda i: (0, 0))],
        out_specs=pl.BlockSpec((bm, Np), lambda i: (i, 0)),
        compiler_params=pltpu.CompilerParams(
            dimension_semantics=("parallel",)),
    )(*pads, wp, bp)
    return out[:M, :N]


def fc_stack_pallas(x, w1, b1, w2, b2, w3, b3):
    """logits = fc3(relu(fc2(relu(fc1(x))))) in a single pallas_call."""
    M, K0 = x.shape
    N1, N2, N3 = w1.shape[1], w2.shape[1], w3.shape[1]
    K0p = _round_up(K0, 128)
    N1p, N2p, N3p = (_round_up(n, 128) for n in (N1, N2, N3))
    Mp, bm, gm = _m_tiling(M)
    xp = _pad2(x, Mp, K0p)
    w1p, w2p, w3p = _pad2(w1, K0p, N1p), _pad2(w2, N1p, N2p), _pad2(w3, N2p, N3p)
    b1p = jnp.pad(b1.astype(jnp.float32), (0, N1p - N1)).reshape(1, N1p)
    b2p = jnp.pad(b2.astype(jnp.float32), (0, N2p - N2)).reshape(1, N2p)
    b3p = jnp.pad(b3.astype(jnp.float32), (0, N3p - N3)).reshape(1, N3p)
    out = pl.pallas_call(
        _fc_stack_kernel,
        out_shape=jax.ShapeDtypeStruct((Mp, N3p), jnp.float32),
        grid=(gm,),
        in_specs=[
            pl.BlockSpec((bm, K0p), lambda i: (i, 0)),
            pl.BlockSpec((K0p, N1p), lambda i: (0, 0)),
            pl.BlockSpec((1, N1p), lambda i: (0, 0)),
            pl.BlockSpec((N1p, N2p), lambda i: (0, 0)),
            pl.BlockSpec((1, N2p), lambda i: (0, 0)),
            pl.BlockSpec((N2p, N3p), lambda i: (0, 0)),
            pl.BlockSpec((1, N3p), lambda i: (0, 0)),
        ],
        out_specs=pl.BlockSpec((bm, N3p), lambda i: (i, 0)),
        compiler_params=pltpu.CompilerParams(
            dimension_semantics=("parallel",)),
    )(xp, w1p, b1p, w2p, b2p, w3p, b3p)
    return out[:M, :N3]


# --------------------------------------------------------------------------
# Conv layers (im2col GEMM, NHWC activations)
# --------------------------------------------------------------------------
def _im2col_nhwc(x, KH, KW, stride, padding):
    """(B,H,W,C) -> (B,OH,OW,KH*KW*C) patch tensor, feature order (kh, kw, c)."""
    B, H, W, C = x.shape
    OH = (H + 2 * padding - KH) // stride + 1
    OW = (W + 2 * padding - KW) // stride + 1
    xp = jnp.pad(x, ((0, 0), (padding, padding), (padding, padding), (0, 0)))
    cols = [xp[:, kh:kh + stride * OH:stride, kw:kw + stride * OW:stride, :]
            for kh in range(KH) for kw in range(KW)]
    return jnp.concatenate(cols, axis=-1), OH, OW


# TODO(synk): im2col patch extraction is still XLA-side strided slicing; moving
# the strided (stride=4/2) gather into the kernel would need manual DMA.
def conv_relu_pallas(x, w_mat, b, *, KH, KW, stride, padding):
    """PyTorch-semantics Conv2d + bias + ReLU on NHWC activations."""
    B = x.shape[0]
    p, OH, OW = _im2col_nhwc(x, KH, KW, stride, padding)
    K = p.shape[-1]
    y = gemm_bias_act_pallas(p.reshape(B * OH * OW, K), w_mat, b,
                             relu=True, out_dtype=jnp.bfloat16)
    return y.reshape(B, OH, OW, w_mat.shape[1])


def conv_relu_pool_pallas(x, w_mat, b, *, KH, KW, stride, padding):
    """Conv2d + bias + ReLU + MaxPool2d(2,2), pool fused into the GEMM epilogue."""
    B = x.shape[0]
    p, OH, OW = _im2col_nhwc(x, KH, KW, stride, padding)
    H2, W2 = OH // 2, OW // 2
    p = p[:, :2 * H2, :2 * W2, :]          # floor, like PyTorch MaxPool2d
    K = p.shape[-1]
    phases = [p[:, i::2, j::2, :].reshape(B * H2 * W2, K)
              for i in (0, 1) for j in (0, 1)]
    y = gemm4_maxpool_pallas(phases, w_mat, b, out_dtype=jnp.bfloat16)
    return y.reshape(B, H2, W2, w_mat.shape[1])


# --------------------------------------------------------------------------
# Parameter init (orthogonal, gain sqrt(2); zero bias) + kernel-layout prep
# --------------------------------------------------------------------------
def _orthogonal(key, rows, cols, gain):
    n = max(rows, cols)
    a = jax.random.normal(key, (n, n), dtype=jnp.float32)
    q, r = jnp.linalg.qr(a)
    q = q * jnp.sign(jnp.diagonal(r))
    return (gain * q[:rows, :cols]).astype(jnp.float32)


def _conv_out_hw(H, W):
    h = (H + 2 * 2 - 8) // 4 + 1; w = (W + 2 * 2 - 8) // 4 + 1
    h, w = h // 2, w // 2
    h = (h + 2 * 1 - 4) // 2 + 1; w = (w + 2 * 1 - 4) // 2 + 1
    h, w = h // 2, w // 2
    h = (h + 2 * 1 - 3) // 1 + 1; w = (w + 2 * 1 - 3) // 1 + 1
    return h, w


def init_pg_net_params(key, input_shape, num_actions):
    num_frames, H, W = input_shape
    gain = float(np.sqrt(2.0))
    ks = jax.random.split(key, 6)
    h, w = _conv_out_hw(H, W)
    conv_out = 64 * h * w
    return {
        "conv1_w": _orthogonal(ks[0], 32, num_frames * 8 * 8, gain).reshape(32, num_frames, 8, 8),
        "conv1_b": jnp.zeros((32,), jnp.float32),
        "conv2_w": _orthogonal(ks[1], 64, 32 * 4 * 4, gain).reshape(64, 32, 4, 4),
        "conv2_b": jnp.zeros((64,), jnp.float32),
        "conv3_w": _orthogonal(ks[2], 64, 64 * 3 * 3, gain).reshape(64, 64, 3, 3),
        "conv3_b": jnp.zeros((64,), jnp.float32),
        "fc1_w": _orthogonal(ks[3], 1024, conv_out, gain),
        "fc1_b": jnp.zeros((1024,), jnp.float32),
        "fc2_w": _orthogonal(ks[4], 256, 1024, gain),
        "fc2_b": jnp.zeros((256,), jnp.float32),
        "fc3_w": _orthogonal(ks[5], num_actions, 256, gain),
        "fc3_b": jnp.zeros((num_actions,), jnp.float32),
    }


def prepare_params(params, input_shape):
    """Torch-layout params -> kernel layout: bf16 GEMM matrices, NHWC ordering."""
    _, H, W = input_shape
    h3, w3 = _conv_out_hw(H, W)
    C3 = 64

    def conv_w(w):  # (OC, C, KH, KW) -> (KH*KW*C, OC), matching im2col ordering
        OC, C, KH, KW = w.shape
        return w.transpose(2, 3, 1, 0).reshape(KH * KW * C, OC).astype(jnp.bfloat16)

    # Permute fc1 columns once: NCHW flatten order (PyTorch) -> NHWC flatten order.
    perm = (np.arange(C3)[None, None, :] * (h3 * w3)
            + np.arange(h3)[:, None, None] * w3
            + np.arange(w3)[None, :, None]).reshape(-1)
    fc1_w = params["fc1_w"][:, perm].T.astype(jnp.bfloat16)   # (conv_out, 1024)

    return {
        "conv1_w": conv_w(params["conv1_w"]), "conv1_b": params["conv1_b"],
        "conv2_w": conv_w(params["conv2_w"]), "conv2_b": params["conv2_b"],
        "conv3_w": conv_w(params["conv3_w"]), "conv3_b": params["conv3_b"],
        "fc1_w": fc1_w, "fc1_b": params["fc1_b"],
        "fc2_w": params["fc2_w"].T.astype(jnp.bfloat16), "fc2_b": params["fc2_b"],
        "fc3_w": params["fc3_w"].T.astype(jnp.bfloat16), "fc3_b": params["fc3_b"],
    }


# --------------------------------------------------------------------------
# Forward pass (mirrors PG_Net.forward)
# --------------------------------------------------------------------------
def pg_net_forward(prep, x):
    """x: (B, num_frames, H, W) NCHW float in [0, 1] (PyTorch convention)."""
    x = jnp.transpose(x, (0, 2, 3, 1)).astype(jnp.bfloat16)   # single NCHW->NHWC hop
    x = conv_relu_pool_pallas(x, prep["conv1_w"], prep["conv1_b"],
                              KH=8, KW=8, stride=4, padding=2)
    x = conv_relu_pool_pallas(x, prep["conv2_w"], prep["conv2_b"],
                              KH=4, KW=4, stride=2, padding=1)
    x = conv_relu_pallas(x, prep["conv3_w"], prep["conv3_b"],
                         KH=3, KW=3, stride=1, padding=1)
    x = x.reshape(x.shape[0], -1)     # NHWC flatten (fc1 columns pre-permuted)
    return fc_stack_pallas(x, prep["fc1_w"], prep["fc1_b"],
                           prep["fc2_w"], prep["fc2_b"],
                           prep["fc3_w"], prep["fc3_b"])


# Pure-JAX f32 reference on the original torch-layout params (sanity check).
def reference_forward(params, x):
    def conv(x, w, b, stride, padding):
        y = jax.lax.conv_general_dilated(
            x, w, window_strides=(stride, stride),
            padding=[(padding, padding), (padding, padding)],
            dimension_numbers=("NCHW", "OIHW", "NCHW"),
            precision=jax.lax.Precision.HIGHEST)
        return y + b[None, :, None, None]

    def pool(x):
        return jax.lax.reduce_window(x, -jnp.inf, jax.lax.max,
                                     (1, 1, 2, 2), (1, 1, 2, 2), "VALID")

    x = pool(jax.nn.relu(conv(x, params["conv1_w"], params["conv1_b"], 4, 2)))
    x = pool(jax.nn.relu(conv(x, params["conv2_w"], params["conv2_b"], 2, 1)))
    x = jax.nn.relu(conv(x, params["conv3_w"], params["conv3_b"], 1, 1))
    x = x.reshape(x.shape[0], -1)
    x = jax.nn.relu(x @ params["fc1_w"].T + params["fc1_b"])
    x = jax.nn.relu(x @ params["fc2_w"].T + params["fc2_b"])
    return x @ params["fc3_w"].T + params["fc3_b"]


if __name__ == "__main__":
    # Small shapes consistent with the module: stacked frames (4, 64, 64), batch 2.
    input_shape = (4, 64, 64)
    num_actions = 4
    batch = 2

    key = jax.random.PRNGKey(0)
    kp, kx = jax.random.split(key)
    params = init_pg_net_params(kp, input_shape, num_actions)
    prep = prepare_params(params, input_shape)
    x = jax.random.uniform(kx, (batch,) + input_shape, dtype=jnp.float32)  # in [0, 1)

    logits = jax.block_until_ready(jax.jit(pg_net_forward)(prep, x))
    assert logits.shape == (batch, num_actions), logits.shape

    ref = jax.block_until_ready(jax.jit(reference_forward)(params, x))
    np.testing.assert_allclose(np.asarray(logits), np.asarray(ref),
                               rtol=5e-2, atol=5e-2)

    print("KERNEL_OK")
</pallas_src>

<mosaic_0001>
module attributes {stable_mosaic.version = 11 : i64} {
  func.func @_gemm4_maxpool_kernel(%arg0: i32, %arg1: memref<128x256xbf16, #tpu.memory_space<vmem>>, %arg2: memref<128x256xbf16, #tpu.memory_space<vmem>>, %arg3: memref<128x256xbf16, #tpu.memory_space<vmem>>, %arg4: memref<128x256xbf16, #tpu.memory_space<vmem>>, %arg5: memref<256x128xbf16, #tpu.memory_space<vmem>>, %arg6: memref<1x128xf32, #tpu.memory_space<vmem>>, %arg7: memref<128x128xbf16, #tpu.memory_space<vmem>>) attributes {dimension_semantics = [#tpu.dimension_semantics<parallel>], iteration_bounds = array<i64: 1>, scalar_prefetch = 0 : i64, scratch_operands = 0 : i64, tpu.core_type = #tpu.core_type<tc>, window_params = [{transform_indices = @transform_0, window_bounds = array<i64: 128, 256>}, {transform_indices = @transform_1, window_bounds = array<i64: 128, 256>}, {transform_indices = @transform_2, window_bounds = array<i64: 128, 256>}, {transform_indices = @transform_3, window_bounds = array<i64: 128, 256>}, {pipeline_mode = #tpu.pipeline_mode<synchronous>, transform_indices = @transform_4, window_bounds = array<i64: 256, 128>}, {pipeline_mode = #tpu.pipeline_mode<synchronous>, transform_indices = @transform_5, window_bounds = array<i64: 1, 128>}, {transform_indices = @transform_6, window_bounds = array<i64: 128, 128>}]} {
    %c0 = arith.constant 0 : index
    %c0_0 = arith.constant 0 : index
    %0 = vector.load %arg5[%c0, %c0_0] : memref<256x128xbf16, #tpu.memory_space<vmem>>, vector<256x128xbf16>
    %c0_1 = arith.constant 0 : index
    %c0_2 = arith.constant 0 : index
    %1 = vector.load %arg1[%c0_1, %c0_2] : memref<128x256xbf16, #tpu.memory_space<vmem>>, vector<128x256xbf16>
    %cst = arith.constant dense<0.000000e+00> : vector<128x128xf32>
    %2 = tpu.matmul %1, %0, %cst {dimension_numbers = #tpu.dot_dimension_numbers<[1], [0], [0], [1], [0, 0, 1, 1], [], []>} : vector<128x256xbf16>, vector<256x128xbf16>, vector<128x128xf32> -> vector<128x128xf32>
    %c0_3 = arith.constant 0 : index
    %c0_4 = arith.constant 0 : index
    %3 = vector.load %arg2[%c0_3, %c0_4] : memref<128x256xbf16, #tpu.memory_space<vmem>>, vector<128x256xbf16>
    %cst_5 = arith.constant dense<0.000000e+00> : vector<128x128xf32>
    %4 = tpu.matmul %3, %0, %cst_5 {dimension_numbers = #tpu.dot_dimension_numbers<[1], [0], [0], [1], [0, 0, 1, 1], [], []>} : vector<128x256xbf16>, vector<256x128xbf16>, vector<128x128xf32> -> vector<128x128xf32>
    %c0_6 = arith.constant 0 : index
    %c0_7 = arith.constant 0 : index
    %5 = vector.load %arg3[%c0_6, %c0_7] : memref<128x256xbf16, #tpu.memory_space<vmem>>, vector<128x256xbf16>
    %cst_8 = arith.constant dense<0.000000e+00> : vector<128x128xf32>
    %6 = tpu.matmul %5, %0, %cst_8 {dimension_numbers = #tpu.dot_dimension_numbers<[1], [0], [0], [1], [0, 0, 1, 1], [], []>} : vector<128x256xbf16>, vector<256x128xbf16>, vector<128x128xf32> -> vector<128x128xf32>
    %c0_9 = arith.constant 0 : index
    %c0_10 = arith.constant 0 : index
    %7 = vector.load %arg4[%c0_9, %c0_10] : memref<128x256xbf16, #tpu.memory_space<vmem>>, vector<128x256xbf16>
    %cst_11 = arith.constant dense<0.000000e+00> : vector<128x128xf32>
    %8 = tpu.matmul %7, %0, %cst_11 {dimension_numbers = #tpu.dot_dimension_numbers<[1], [0], [0], [1], [0, 0, 1, 1], [], []>} : vector<128x256xbf16>, vector<256x128xbf16>, vector<128x128xf32> -> vector<128x128xf32>
    %9 = arith.maximumf %2, %4 : vector<128x128xf32>
    %10 = arith.maximumf %6, %8 : vector<128x128xf32>
    %11 = arith.maximumf %9, %10 : vector<128x128xf32>
    %c0_12 = arith.constant 0 : index
    %c0_13 = arith.constant 0 : index
    %12 = vector.load %arg6[%c0_12, %c0_13] : memref<1x128xf32, #tpu.memory_space<vmem>>, vector<1x128xf32>
    %13 = vector.broadcast %12 : vector<1x128xf32> to vector<128x128xf32>
    %14 = arith.addf %11, %13 : vector<128x128xf32>
    %cst_14 = arith.constant 0.000000e+00 : f32
    %15 = vector.broadcast %cst_14 : f32 to vector<128x128xf32>
    %16 = arith.maximumf %14, %15 : vector<128x128xf32>
    %17 = arith.truncf %16 : vector<128x128xf32> to vector<128x128xbf16>
    %c0_15 = arith.constant 0 : index
    %c0_16 = arith.constant 0 : index
    %18 = vector.load %arg7[%c0_15, %c0_16] : memref<128x128xbf16, #tpu.memory_space<vmem>>, vector<128x128xbf16>
    tpu.vector_store %arg7[%c0_15, %c0_16], %17 {strides = array<i32>} : memref<128x128xbf16, #tpu.memory_space<vmem>>, vector<128x128xbf16>,
    return
  }
  func.func @transform_0(%arg0: i32) -> (i32, i32) {
    %c0_i32 = arith.constant 0 : i32
    %c0_i32_0 = arith.constant 0 : i32
    return %arg0, %c0_i32 : i32, i32
  }
  func.func @transform_1(%arg0: i32) -> (i32, i32) {
    %c0_i32 = arith.constant 0 : i32
    %c0_i32_0 = arith.constant 0 : i32
    return %arg0, %c0_i32 : i32, i32
  }
  func.func @transform_2(%arg0: i32) -> (i32, i32) {
    %c0_i32 = arith.constant 0 : i32
    %c0_i32_0 = arith.constant 0 : i32
    return %arg0, %c0_i32 : i32, i32
  }
  func.func @transform_3(%arg0: i32) -> (i32, i32) {
    %c0_i32 = arith.constant 0 : i32
    %c0_i32_0 = arith.constant 0 : i32
    return %arg0, %c0_i32 : i32, i32
  }
  func.func @transform_4(%arg0: i32) -> (i32, i32) {
    %c0_i32 = arith.constant 0 : i32
    %c0_i32_0 = arith.constant 0 : i32
    %c0_i32_1 = arith.constant 0 : i32
    return %c0_i32, %c0_i32_0 : i32, i32
  }
  func.func @transform_5(%arg0: i32) -> (i32, i32) {
    %c0_i32 = arith.constant 0 : i32
    %c0_i32_0 = arith.constant 0 : i32
    %c0_i32_1 = arith.constant 0 : i32
    return %c0_i32, %c0_i32_0 : i32, i32
  }
  func.func @transform_6(%arg0: i32) -> (i32, i32) {
    %c0_i32 = arith.constant 0 : i32
    %c0_i32_0 = arith.constant 0 : i32
    return %arg0, %c0_i32 : i32, i32
  }
}

module attributes {stable_mosaic.version = 11 : i64} {
  func.func @_gemm4_maxpool_kernel(%arg0: i32, %arg1: memref<16x512xbf16, #tpu.memory_space<vmem>>, %arg2: memref<16x512xbf16, #tpu.memory_space<vmem>>, %arg3: memref<16x512xbf16, #tpu.memory_space<vmem>>, %arg4: memref<16x512xbf16, #tpu.memory_space<vmem>>, %arg5: memref<512x128xbf16, #tpu.memory_space<vmem>>, %arg6: memref<1x128xf32, #tpu.memory_space<vmem>>, %arg7: memref<16x128xbf16, #tpu.memory_space<vmem>>) attributes {dimension_semantics = [#tpu.dimension_semantics<parallel>], iteration_bounds = array<i64: 1>, scalar_prefetch = 0 : i64, scratch_operands = 0 : i64, tpu.core_type = #tpu.core_type<tc>, window_params = [{transform_indices = @transform_0, window_bounds = array<i64: 16, 512>}, {transform_indices = @transform_1, window_bounds = array<i64: 16, 512>}, {transform_indices = @transform_2, window_bounds = array<i64: 16, 512>}, {transform_indices = @transform_3, window_bounds = array<i64: 16, 512>}, {pipeline_mode = #tpu.pipeline_mode<synchronous>, transform_indices = @transform_4, window_bounds = array<i64: 512, 128>}, {pipeline_mode = #tpu.pipeline_mode<synchronous>, transform_indices = @transform_5, window_bounds = array<i64: 1, 128>}, {transform_indices = @transform_6, window_bounds = array<i64: 16, 128>}]} {
    %c0 = arith.constant 0 : index
    %c0_0 = arith.constant 0 : index
    %0 = vector.load %arg5[%c0, %c0_0] : memref<512x128xbf16, #tpu.memory_space<vmem>>, vector<512x128xbf16>
    %c0_1 = arith.constant 0 : index
    %c0_2 = arith.constant 0 : index
    %1 = vector.load %arg1[%c0_1, %c0_2] : memref<16x512xbf16, #tpu.memory_space<vmem>>, vector<16x512xbf16>
    %cst = arith.constant dense<0.000000e+00> : vector<16x128xf32>
    %2 = tpu.matmul %1, %0, %cst {dimension_numbers = #tpu.dot_dimension_numbers<[1], [0], [0], [1], [0, 0, 1, 1], [], []>} : vector<16x512xbf16>, vector<512x128xbf16>, vector<16x128xf32> -> vector<16x128xf32>
    %c0_3 = arith.constant 0 : index
    %c0_4 = arith.constant 0 : index
    %3 = vector.load %arg2[%c0_3, %c0_4] : memref<16x512xbf16, #tpu.memory_space<vmem>>, vector<16x512xbf16>
    %cst_5 = arith.constant dense<0.000000e+00> : vector<16x128xf32>
    %4 = tpu.matmul %3, %0, %cst_5 {dimension_numbers = #tpu.dot_dimension_numbers<[1], [0], [0], [1], [0, 0, 1, 1], [], []>} : vector<16x512xbf16>, vector<512x128xbf16>, vector<16x128xf32> -> vector<16x128xf32>
    %c0_6 = arith.constant 0 : index
    %c0_7 = arith.constant 0 : index
    %5 = vector.load %arg3[%c0_6, %c0_7] : memref<16x512xbf16, #tpu.memory_space<vmem>>, vector<16x512xbf16>
    %cst_8 = arith.constant dense<0.000000e+00> : vector<16x128xf32>
    %6 = tpu.matmul %5, %0, %cst_8 {dimension_numbers = #tpu.dot_dimension_numbers<[1], [0], [0], [1], [0, 0, 1, 1], [], []>} : vector<16x512xbf16>, vector<512x128xbf16>, vector<16x128xf32> -> vector<16x128xf32>
    %c0_9 = arith.constant 0 : index
    %c0_10 = arith.constant 0 : index
    %7 = vector.load %arg4[%c0_9, %c0_10] : memref<16x512xbf16, #tpu.memory_space<vmem>>, vector<16x512xbf16>
    %cst_11 = arith.constant dense<0.000000e+00> : vector<16x128xf32>
    %8 = tpu.matmul %7, %0, %cst_11 {dimension_numbers = #tpu.dot_dimension_numbers<[1], [0], [0], [1], [0, 0, 1, 1], [], []>} : vector<16x512xbf16>, vector<512x128xbf16>, vector<16x128xf32> -> vector<16x128xf32>
    %9 = arith.maximumf %2, %4 : vector<16x128xf32>
    %10 = arith.maximumf %6, %8 : vector<16x128xf32>
    %11 = arith.maximumf %9, %10 : vector<16x128xf32>
    %c0_12 = arith.constant 0 : index
    %c0_13 = arith.constant 0 : index
    %12 = vector.load %arg6[%c0_12, %c0_13] : memref<1x128xf32, #tpu.memory_space<vmem>>, vector<1x128xf32>
    %13 = vector.broadcast %12 : vector<1x128xf32> to vector<16x128xf32>
    %14 = arith.addf %11, %13 : vector<16x128xf32>
    %cst_14 = arith.constant 0.000000e+00 : f32
    %15 = vector.broadcast %cst_14 : f32 to vector<16x128xf32>
    %16 = arith.maximumf %14, %15 : vector<16x128xf32>
    %17 = arith.truncf %16 : vector<16x128xf32> to vector<16x128xbf16>
    %c0_15 = arith.constant 0 : index
    %c0_16 = arith.constant 0 : index
    %18 = vector.load %arg7[%c0_15, %c0_16] : memref<16x128xbf16, #tpu.memory_space<vmem>>, vector<16x128xbf16>
    tpu.vector_store %arg7[%c0_15, %c0_16], %17 {strides = array<i32>} : memref<16x128xbf16, #tpu.memory_space<vmem>>, vector<16x128xbf16>,
    return
  }
  func.func @transform_0(%arg0: i32) -> (i32, i32) {
    %c0_i32 = arith.constant 0 : i32
    %c0_i32_0 = arith.constant 0 : i32
    return %arg0, %c0_i32 : i32, i32
  }
  func.func @transform_1(%arg0: i32) -> (i32, i32) {
    %c0_i32 = arith.constant 0 : i32
    %c0_i32_0 = arith.constant 0 : i32
    return %arg0, %c0_i32 : i32, i32
  }
  func.func @transform_2(%arg0: i32) -> (i32, i32) {
    %c0_i32 = arith.constant 0 : i32
    %c0_i32_0 = arith.constant 0 : i32
    return %arg0, %c0_i32 : i32, i32
  }
  func.func @transform_3(%arg0: i32) -> (i32, i32) {
    %c0_i32 = arith.constant 0 : i32
    %c0_i32_0 = arith.constant 0 : i32
    return %arg0, %c0_i32 : i32, i32
  }
  func.func @transform_4(%arg0: i32) -> (i32, i32) {
    %c0_i32 = arith.constant 0 : i32
    %c0_i32_0 = arith.constant 0 : i32
    %c0_i32_1 = arith.constant 0 : i32
    return %c0_i32, %c0_i32_0 : i32, i32
  }
  func.func @transform_5(%arg0: i32) -> (i32, i32) {
    %c0_i32 = arith.constant 0 : i32
    %c0_i32_0 = arith.constant 0 : i32
    %c0_i32_1 = arith.constant 0 : i32
    return %c0_i32, %c0_i32_0 : i32, i32
  }
  func.func @transform_6(%arg0: i32) -> (i32, i32) {
    %c0_i32 = arith.constant 0 : i32
    %c0_i32_0 = arith.constant 0 : i32
    return %arg0, %c0_i32 : i32, i32
  }
}

module attributes {stable_mosaic.version = 11 : i64} {
  func.func @_gemm_bias_act_kernel(%arg0: i32, %arg1: memref<16x640xbf16, #tpu.memory_space<vmem>>, %arg2: memref<640x128xbf16, #tpu.memory_space<vmem>>, %arg3: memref<1x128xf32, #tpu.memory_space<vmem>>, %arg4: memref<16x128xbf16, #tpu.memory_space<vmem>>) attributes {dimension_semantics = [#tpu.dimension_semantics<parallel>], iteration_bounds = array<i64: 1>, scalar_prefetch = 0 : i64, scratch_operands = 0 : i64, tpu.core_type = #tpu.core_type<tc>, window_params = [{transform_indices = @transform_0, window_bounds = array<i64: 16, 640>}, {pipeline_mode = #tpu.pipeline_mode<synchronous>, transform_indices = @transform_1, window_bounds = array<i64: 640, 128>}, {pipeline_mode = #tpu.pipeline_mode<synchronous>, transform_indices = @transform_2, window_bounds = array<i64: 1, 128>}, {transform_indices = @transform_3, window_bounds = array<i64: 16, 128>}]} {
    %c0 = arith.constant 0 : index
    %c0_0 = arith.constant 0 : index
    %0 = vector.load %arg1[%c0, %c0_0] : memref<16x640xbf16, #tpu.memory_space<vmem>>, vector<16x640xbf16>
    %c0_1 = arith.constant 0 : index
    %c0_2 = arith.constant 0 : index
    %1 = vector.load %arg2[%c0_1, %c0_2] : memref<640x128xbf16, #tpu.memory_space<vmem>>, vector<640x128xbf16>
    %cst = arith.constant dense<0.000000e+00> : vector<16x128xf32>
    %2 = tpu.matmul %0, %1, %cst {dimension_numbers = #tpu.dot_dimension_numbers<[1], [0], [0], [1], [0, 0, 1, 1], [], []>} : vector<16x640xbf16>, vector<640x128xbf16>, vector<16x128xf32> -> vector<16x128xf32>
    %c0_3 = arith.constant 0 : index
    %c0_4 = arith.constant 0 : index
    %3 = vector.load %arg3[%c0_3, %c0_4] : memref<1x128xf32, #tpu.memory_space<vmem>>, vector<1x128xf32>
    %4 = vector.broadcast %3 : vector<1x128xf32> to vector<16x128xf32>
    %5 = arith.addf %2, %4 : vector<16x128xf32>
    %cst_5 = arith.constant 0.000000e+00 : f32
    %6 = vector.broadcast %cst_5 : f32 to vector<16x128xf32>
    %7 = arith.maximumf %5, %6 : vector<16x128xf32>
    %8 = arith.truncf %7 : vector<16x128xf32> to vector<16x128xbf16>
    %c0_6 = arith.constant 0 : index
    %c0_7 = arith.constant 0 : index
    %9 = vector.load %arg4[%c0_6, %c0_7] : memref<16x128xbf16, #tpu.memory_space<vmem>>, vector<16x128xbf16>
    tpu.vector_store %arg4[%c0_6, %c0_7], %8 {strides = array<i32>} : memref<16x128xbf16, #tpu.memory_space<vmem>>, vector<16x128xbf16>,
    return
  }
  func.func @transform_0(%arg0: i32) -> (i32, i32) {
    %c0_i32 = arith.constant 0 : i32
    %c0_i32_0 = arith.constant 0 : i32
    return %arg0, %c0_i32 : i32, i32
  }
  func.func @transform_1(%arg0: i32) -> (i32, i32) {
    %c0_i32 = arith.constant 0 : i32
    %c0_i32_0 = arith.constant 0 : i32
    %c0_i32_1 = arith.constant 0 : i32
    return %c0_i32, %c0_i32_0 : i32, i32
  }
  func.func @transform_2(%arg0: i32) -> (i32, i32) {
    %c0_i32 = arith.constant 0 : i32
    %c0_i32_0 = arith.constant 0 : i32
    %c0_i32_1 = arith.constant 0 : i32
    return %c0_i32, %c0_i32_0 : i32, i32
  }
  func.func @transform_3(%arg0: i32) -> (i32, i32) {
    %c0_i32 = arith.constant 0 : i32
    %c0_i32_0 = arith.constant 0 : i32
    return %arg0, %c0_i32 : i32, i32
  }
}

module attributes {stable_mosaic.version = 11 : i64} {
  func.func @_fc_stack_kernel(%arg0: i32, %arg1: memref<16x256xbf16, #tpu.memory_space<vmem>>, %arg2: memref<256x1024xbf16, #tpu.memory_space<vmem>>, %arg3: memref<1x1024xf32, #tpu.memory_space<vmem>>, %arg4: memref<1024x256xbf16, #tpu.memory_space<vmem>>, %arg5: memref<1x256xf32, #tpu.memory_space<vmem>>, %arg6: memref<256x128xbf16, #tpu.memory_space<vmem>>, %arg7: memref<1x128xf32, #tpu.memory_space<vmem>>, %arg8: memref<16x128xf32, #tpu.memory_space<vmem>>) attributes {dimension_semantics = [#tpu.dimension_semantics<parallel>], iteration_bounds = array<i64: 1>, scalar_prefetch = 0 : i64, scratch_operands = 0 : i64, tpu.core_type = #tpu.core_type<tc>, window_params = [{transform_indices = @transform_0, window_bounds = array<i64: 16, 256>}, {pipeline_mode = #tpu.pipeline_mode<synchronous>, transform_indices = @transform_1, window_bounds = array<i64: 256, 1024>}, {pipeline_mode = #tpu.pipeline_mode<synchronous>, transform_indices = @transform_2, window_bounds = array<i64: 1, 1024>}, {pipeline_mode = #tpu.pipeline_mode<synchronous>, transform_indices = @transform_3, window_bounds = array<i64: 1024, 256>}, {pipeline_mode = #tpu.pipeline_mode<synchronous>, transform_indices = @transform_4, window_bounds = array<i64: 1, 256>}, {pipeline_mode = #tpu.pipeline_mode<synchronous>, transform_indices = @transform_5, window_bounds = array<i64: 256, 128>}, {pipeline_mode = #tpu.pipeline_mode<synchronous>, transform_indices = @transform_6, window_bounds = array<i64: 1, 128>}, {transform_indices = @transform_7, window_bounds = array<i64: 16, 128>}]} {
    %c0 = arith.constant 0 : index
    %c0_0 = arith.constant 0 : index
    %0 = vector.load %arg1[%c0, %c0_0] : memref<16x256xbf16, #tpu.memory_space<vmem>>, vector<16x256xbf16>
    %c0_1 = arith.constant 0 : index
    %c0_2 = arith.constant 0 : index
    %1 = vector.load %arg2[%c0_1, %c0_2] : memref<256x1024xbf16, #tpu.memory_space<vmem>>, vector<256x1024xbf16>
    %cst = arith.constant dense<0.000000e+00> : vector<16x1024xf32>
    %2 = tpu.matmul %0, %1, %cst {dimension_numbers = #tpu.dot_dimension_numbers<[1], [0], [0], [1], [0, 0, 1, 1], [], []>} : vector<16x256xbf16>, vector<256x1024xbf16>, vector<16x1024xf32> -> vector<16x1024xf32>
    %c0_3 = arith.constant 0 : index
    %c0_4 = arith.constant 0 : index
    %3 = vector.load %arg3[%c0_3, %c0_4] : memref<1x1024xf32, #tpu.memory_space<vmem>>, vector<1x1024xf32>
    %4 = vector.broadcast %3 : vector<1x1024xf32> to vector<16x1024xf32>
    %5 = arith.addf %2, %4 : vector<16x1024xf32>
    %cst_5 = arith.constant 0.000000e+00 : f32
    %6 = vector.broadcast %cst_5 : f32 to vector<16x1024xf32>
    %7 = arith.maximumf %5, %6 : vector<16x1024xf32>
    %8 = arith.truncf %7 : vector<16x1024xf32> to vector<16x1024xbf16>
    %c0_6 = arith.constant 0 : index
    %c0_7 = arith.constant 0 : index
    %9 = vector.load %arg4[%c0_6, %c0_7] : memref<1024x256xbf16, #tpu.memory_space<vmem>>, vector<1024x256xbf16>
    %cst_8 = arith.constant dense<0.000000e+00> : vector<16x256xf32>
    %10 = tpu.matmul %8, %9, %cst_8 {dimension_numbers = #tpu.dot_dimension_numbers<[1], [0], [0], [1], [0, 0, 1, 1], [], []>} : vector<16x1024xbf16>, vector<1024x256xbf16>, vector<16x256xf32> -> vector<16x256xf32>
    %c0_9 = arith.constant 0 : index
    %c0_10 = arith.constant 0 : index
    %11 = vector.load %arg5[%c0_9, %c0_10] : memref<1x256xf32, #tpu.memory_space<vmem>>, vector<1x256xf32>
    %12 = vector.broadcast %11 : vector<1x256xf32> to vector<16x256xf32>
    %13 = arith.addf %10, %12 : vector<16x256xf32>
    %cst_11 = arith.constant 0.000000e+00 : f32
    %14 = vector.broadcast %cst_11 : f32 to vector<16x256xf32>
    %15 = arith.maximumf %13, %14 : vector<16x256xf32>
    %16 = arith.truncf %15 : vector<16x256xf32> to vector<16x256xbf16>
    %c0_12 = arith.constant 0 : index
    %c0_13 = arith.constant 0 : index
    %17 = vector.load %arg6[%c0_12, %c0_13] : memref<256x128xbf16, #tpu.memory_space<vmem>>, vector<256x128xbf16>
    %cst_14 = arith.constant dense<0.000000e+00> : vector<16x128xf32>
    %18 = tpu.matmul %16, %17, %cst_14 {dimension_numbers = #tpu.dot_dimension_numbers<[1], [0], [0], [1], [0, 0, 1, 1], [], []>} : vector<16x256xbf16>, vector<256x128xbf16>, vector<16x128xf32> -> vector<16x128xf32>
    %c0_15 = arith.constant 0 : index
    %c0_16 = arith.constant 0 : index
    %19 = vector.load %arg7[%c0_15, %c0_16] : memref<1x128xf32, #tpu.memory_space<vmem>>, vector<1x128xf32>
    %20 = vector.broadcast %19 : vector<1x128xf32> to vector<16x128xf32>
    %21 = arith.addf %18, %20 : vector<16x128xf32>
    %c0_17 = arith.constant 0 : index
    %c0_18 = arith.constant 0 : index
    %22 = vector.load %arg8[%c0_17, %c0_18] : memref<16x128xf32, #tpu.memory_space<vmem>>, vector<16x128xf32>
    tpu.vector_store %arg8[%c0_17, %c0_18], %21 {strides = array<i32>} : memref<16x128xf32, #tpu.memory_space<vmem>>, vector<16x128xf32>,
    return
  }
  func.func @transform_0(%arg0: i32) -> (i32, i32) {
    %c0_i32 = arith.constant 0 : i32
    %c0_i32_0 = arith.constant 0 : i32
    return %arg0, %c0_i32 : i32, i32
  }
  func.func @transform_1(%arg0: i32) -> (i32, i32) {
    %c0_i32 = arith.constant 0 : i32
    %c0_i32_0 = arith.constant 0 : i32
    %c0_i32_1 = arith.constant 0 : i32
    return %c0_i32, %c0_i32_0 : i32, i32
  }
  func.func @transform_2(%arg0: i32) -> (i32, i32) {
    %c0_i32 = arith.constant 0 : i32
    %c0_i32_0 = arith.constant 0 : i32
    %c0_i32_1 = arith.constant 0 : i32
    return %c0_i32, %c0_i32_0 : i32, i32
  }
  func.func @transform_3(%arg0: i32) -> (i32, i32) {
    %c0_i32 = arith.constant 0 : i32
    %c0_i32_0 = arith.constant 0 : i32
    %c0_i32_1 = arith.constant 0 : i32
    return %c0_i32, %c0_i32_0 : i32, i32
  }
  func.func @transform_4(%arg0: i32) -> (i32, i32) {
    %c0_i32 = arith.constant 0 : i32
    %c0_i32_0 = arith.constant 0 : i32
    %c0_i32_1 = arith.constant 0 : i32
    return %c0_i32, %c0_i32_0 : i32, i32
  }
  func.func @transform_5(%arg0: i32) -> (i32, i32) {
    %c0_i32 = arith.constant 0 : i32
    %c0_i32_0 = arith.constant 0 : i32
    %c0_i32_1 = arith.constant 0 : i32
    return %c0_i32, %c0_i32_0 : i32, i32
  }
  func.func @transform_6(%arg0: i32) -> (i32, i32) {
    %c0_i32 = arith.constant 0 : i32
    %c0_i32_0 = arith.constant 0 : i32
    %c0_i32_1 = arith.constant 0 : i32
    return %c0_i32, %c0_i32_0 : i32, i32
  }
  func.func @transform_7(%arg0: i32) -> (i32, i32) {
    %c0_i32 = arith.constant 0 : i32
    %c0_i32_0 = arith.constant 0 : i32
    return %arg0, %c0_i32 : i32, i32
  }
}

</mosaic_0001>

<bundles_post_ra>
// kernel: pg_net_forward.4
= control target key start
LH: loop header
LB: loop body
LE: loop exit
PB: predicated region body
PF: predicated region fallthrough
CT: control target
= control target key end

     0   :  { %s2171_s4 = inlined_call_operand.vmem [shape: bf16[256,128], index: 4, kind: input, shape index: {}]   ;;  %s2172_s0 = inlined_call_operand.vmem [shape: bf16[128,256], index: 0, kind: input, shape index: {}]   ;;  %s2173_s1 = inlined_call_operand.vmem [shape: bf16[128,256], index: 1, kind: input, shape index: {}]   ;;  %s2174_s2 = inlined_call_operand.vmem [shape: bf16[128,256], index: 2, kind: input, shape index: {}]   ;;  %s2175_s3 = inlined_call_operand.vmem [shape: bf16[128,256], index: 3, kind: input, shape index: {}]   ;;  %s2176_s5 = inlined_call_operand.vmem [shape: f32[1,128], index: 5, kind: input, shape index: {}]   ;;  %s2177_s6 = inlined_call_operand.vmem [shape: bf16[128,128], index: 6, kind: output, shape index: {}]  }
   0x1   :  { %v1511_v0 = vld [vmem:[%s2171_s4 + $0x78] sm:$0xff]   ;;  %v1667_v2 = vld [vmem:[%s2171_s4 + $0x70] sm:$0xff]   ;;  %v1679_v4 = vld [vmem:[%s2171_s4 + $0x68] sm:$0xff]  }
   0x2   :  { %v1512_v1 = vld [vmem:[%s2171_s4 + $0x38] sm:$0xff]   ;;  %1255 = vmatprep.subr.bf16.mxu0 %v1511_v0  ;;  %1319 = vmatprep.subr.bf16.mxu1 %v1511_v0  ;;  %v1672_v3 = vld [vmem:[%s2171_s4 + $0x30] sm:$0xff]   ;;  %v1686_v5 = vld [vmem:[%s2171_s4 + $0x28] sm:$0xff]  }
   0x3   :  { %1256 = vmatpush3.bf16.msra.mxu0 %v1512_v1  ;;  %1320 = vmatpush3.bf16.msra.mxu1 %v1512_v1  ;;  %v1693_v6 = vld [vmem:[%s2171_s4 + $0x60] sm:$0xff]   ;;  %v1707_v8 = vld [vmem:[%s2171_s4 + $0x58] sm:$0xff]   ;;  %v1721_v10 = vld [vmem:[%s2171_s4 + $0x50] sm:$0xff]  }
   0x4   :  { %1257 = vmatprep.subr.bf16.mxu0 %v1667_v2  ;;  %1321 = vmatprep.subr.bf16.mxu1 %v1667_v2  ;;  %v1700_v7 = vld [vmem:[%s2171_s4 + $0x20] sm:$0xff]   ;;  %v1714_v9 = vld [vmem:[%s2171_s4 + $0x18] sm:$0xff]   ;;  %v1734_v13 = vld [vmem:[%s2171_s4 + $0x10] sm:$0xff]  }
   0x5   :  { %v1529_v11 = vld [vmem:[%s2172_s0 + $0x4] ss:$8 sps:$4 sm:$0xff]   ;;  %v1527_v18 = vld [vmem:[%s2172_s0] ss:$8 sps:$4 sm:$0xff]   ;;  %v1533_v20 = vld [vmem:[%s2172_s0 + $0x14] ss:$8 sps:$4 sm:$0xff]  }
   0x6   :  { %v1532_v12 = vld [vmem:[%s2173_s1 + $0x4] ss:$8 sps:$4 sm:$0xff]   ;;  %280 = vmatprep.mubr.bf16.mxu0 %v1529_v11  ;;  %v1530_v19 = vld [vmem:[%s2173_s1] ss:$8 sps:$4 sm:$0xff]   ;;  %v1535_v21 = vld [vmem:[%s2173_s1 + $0x14] ss:$8 sps:$4 sm:$0xff]  }
   0x7   :  { %1258 = vmatpush3.bf16.msra.mxu0 %v1672_v3  ;;  %1322 = vmatpush3.bf16.msra.mxu1 %v1672_v3  ;;  %v1741_v14 = vld [vmem:[%s2171_s4 + $0x48] sm:$0xff]   ;;  %v1755_v16 = vld [vmem:[%s2171_s4 + $0x40] sm:$0xff]   ;;  %v1537_v22 = vld [vmem:[%s2172_s0 + $0x10] ss:$8 sps:$4 sm:$0xff]  }
   0x8   :  { %1259 = vmatprep.subr.bf16.mxu0 %v1679_v4  ;;  %1323 = vmatprep.subr.bf16.mxu1 %v1679_v4  ;;  %v1748_v15 = vld [vmem:[%s2171_s4 + $0x8] sm:$0xff]   ;;  %v1762_v17 = vld [vmem:[%s2171_s4] sm:$0xff]   ;;  %v1538_v23 = vld [vmem:[%s2173_s1 + $0x10] ss:$8 sps:$4 sm:$0xff]  }
   0x9   :  { %473 = vmatprep.mubr.bf16.mxu1 %v1532_v12  ;;  %v1539_v24 = vld [vmem:[%s2172_s0 + $0x24] ss:$8 sps:$4 sm:$0xff]   ;;  %v1543_v26 = vld [vmem:[%s2172_s0 + $0x20] ss:$8 sps:$4 sm:$0xff]   ;;  %v1545_v28 = vld [vmem:[%s2172_s0 + $0x34] ss:$8 sps:$4 sm:$0xff]  }
   0xa   :  { %v1541_v25 = vld [vmem:[%s2173_s1 + $0x24] ss:$8 sps:$4 sm:$0xff]   ;;  %v1544_v27 = vld [vmem:[%s2173_s1 + $0x20] ss:$8 sps:$4 sm:$0xff]   ;;  %v1547_v29 = vld [vmem:[%s2173_s1 + $0x34] ss:$8 sps:$4 sm:$0xff]  }
   0xb   :  { %1260 = vmatpush3.bf16.msra.mxu0 %v1686_v5  ;;  %1324 = vmatpush3.bf16.msra.mxu1 %v1686_v5  ;;  %v1549_v30 = vld [vmem:[%s2172_s0 + $0x30] ss:$8 sps:$4 sm:$0xff]   ;;  %v1551_v32 = vld [vmem:[%s2172_s0 + $0x44] ss:$8 sps:$4 sm:$0xff]   ;;  %v1555_v34 = vld [vmem:[%s2172_s0 + $0x40] ss:$8 sps:$4 sm:$0xff]  }
   0xc   :  { %1261 = vmatprep.subr.bf16.mxu0 %v1693_v6  ;;  %1325 = vmatprep.subr.bf16.mxu1 %v1693_v6  ;;  %v1550_v31 = vld [vmem:[%s2173_s1 + $0x30] ss:$8 sps:$4 sm:$0xff]   ;;  %v1553_v33 = vld [vmem:[%s2173_s1 + $0x44] ss:$8 sps:$4 sm:$0xff]   ;;  %v1556_v35 = vld [vmem:[%s2173_s1 + $0x40] ss:$8 sps:$4 sm:$0xff]  }
   0xd   :  { %v1557_v36 = vld [vmem:[%s2172_s0 + $0x54] ss:$8 sps:$4 sm:$0xff]   ;;  %v1561_v38 = vld [vmem:[%s2172_s0 + $0x50] ss:$8 sps:$4 sm:$0xff]   ;;  %v1563_v40 = vld [vmem:[%s2172_s0 + $0x64] ss:$8 sps:$4 sm:$0xff]  }
   0xe   :  { %v1559_v37 = vld [vmem:[%s2173_s1 + $0x54] ss:$8 sps:$4 sm:$0xff]   ;;  %v1562_v39 = vld [vmem:[%s2173_s1 + $0x50] ss:$8 sps:$4 sm:$0xff]   ;;  %v1565_v41 = vld [vmem:[%s2173_s1 + $0x64] ss:$8 sps:$4 sm:$0xff]  }
   0xf   :  { %1262 = vmatpush3.bf16.msra.mxu0 %v1700_v7  ;;  %1326 = vmatpush3.bf16.msra.mxu1 %v1700_v7  ;;  %v1567_v42 = vld [vmem:[%s2172_s0 + $0x60] ss:$8 sps:$4 sm:$0xff]   ;;  %v1569_v44 = vld [vmem:[%s2172_s0 + $0x74] ss:$8 sps:$4 sm:$0xff]   ;;  %v1573_v46 = vld [vmem:[%s2172_s0 + $0x70] ss:$8 sps:$4 sm:$0xff]  }
  0x10   :  { %1263 = vmatprep.subr.bf16.mxu0 %v1707_v8  ;;  %1327 = vmatprep.subr.bf16.mxu1 %v1707_v8  ;;  %v1568_v43 = vld [vmem:[%s2173_s1 + $0x60] ss:$8 sps:$4 sm:$0xff]   ;;  %v1571_v45 = vld [vmem:[%s2173_s1 + $0x74] ss:$8 sps:$4 sm:$0xff]   ;;  %v1574_v47 = vld [vmem:[%s2173_s1 + $0x70] ss:$8 sps:$4 sm:$0xff]  }
  0x11   :  { %v1577_v48 = vld [vmem:[%s2174_s2 + $0x4] ss:$8 sps:$4 sm:$0xff]   ;;  %v1575_v50 = vld [vmem:[%s2174_s2] ss:$8 sps:$4 sm:$0xff]   ;;  %v1581_v52 = vld [vmem:[%s2174_s2 + $0x14] ss:$8 sps:$4 sm:$0xff]  }
  0x12   :  { %v1580_v49 = vld [vmem:[%s2175_s3 + $0x4] ss:$8 sps:$4 sm:$0xff]   ;;  %v1578_v51 = vld [vmem:[%s2175_s3] ss:$8 sps:$4 sm:$0xff]   ;;  %v1583_v53 = vld [vmem:[%s2175_s3 + $0x14] ss:$8 sps:$4 sm:$0xff]  }
  0x13   :  { %1264 = vmatpush3.bf16.msra.mxu0 %v1714_v9  ;;  %1328 = vmatpush3.bf16.msra.mxu1 %v1714_v9  ;;  %v1585_v54 = vld [vmem:[%s2174_s2 + $0x10] ss:$8 sps:$4 sm:$0xff]   ;;  %v1587_v56 = vld [vmem:[%s2174_s2 + $0x24] ss:$8 sps:$4 sm:$0xff]   ;;  %v1591_v58 = vld [vmem:[%s2174_s2 + $0x20] ss:$8 sps:$4 sm:$0xff]  }
  0x14   :  { %1265 = vmatprep.subr.bf16.mxu0 %v1721_v10  ;;  %1329 = vmatprep.subr.bf16.mxu1 %v1721_v10  ;;  %v1586_v55 = vld [vmem:[%s2175_s3 + $0x10] ss:$8 sps:$4 sm:$0xff]   ;;  %v1589_v57 = vld [vmem:[%s2175_s3 + $0x24] ss:$8 sps:$4 sm:$0xff]   ;;  %v1592_v59 = vld [vmem:[%s2175_s3 + $0x20] ss:$8 sps:$4 sm:$0xff]  }
  0x15   :  { %v1593_v60 = vld [vmem:[%s2174_s2 + $0x34] ss:$8 sps:$4 sm:$0xff]   ;;  %v1597_v62 = vld [vmem:[%s2174_s2 + $0x30] ss:$8 sps:$4 sm:$0xff]   ;;  %v1616_v11 = vld [vmem:[%s2175_s3 + $0x60] ss:$8 sps:$4 sm:$0xff]  }
  0x16   :  { %v1595_v61 = vld [vmem:[%s2175_s3 + $0x34] ss:$8 sps:$4 sm:$0xff]   ;;  %v1598_v63 = vld [vmem:[%s2175_s3 + $0x30] ss:$8 sps:$4 sm:$0xff]  }
  0x17   :  { %1266 = vmatpush3.bf16.msra.mxu0 %v1734_v13  ;;  %1330 = vmatpush3.bf16.msra.mxu1 %v1734_v13  ;;  %v1617_v12 = vld [vmem:[%s2174_s2 + $0x74] ss:$8 sps:$4 sm:$0xff]  }
  0x18   :  { %1267 = vmatprep.subr.bf16.mxu0 %v1741_v14  ;;  %1331 = vmatprep.subr.bf16.mxu1 %v1741_v14 }
  0x1b   :  { %1268 = vmatpush3.bf16.msra.mxu0 %v1748_v15  ;;  %1332 = vmatpush3.bf16.msra.mxu1 %v1748_v15 }
  0x1c   :  { %1269 = vmatprep.subr.bf16.mxu0 %v1755_v16  ;;  %1333 = vmatprep.subr.bf16.mxu1 %v1755_v16 }
  0x1f   :  { %1270 = vmatpush3.bf16.msra.mxu0 %v1762_v17  ;;  %1334 = vmatpush3.bf16.msra.mxu1 %v1762_v17 }
  0x20   :  { %1383 = vmatprep.subr.bf16.mxu0 %v1511_v0  ;;  %1447 = vmatprep.subr.bf16.mxu1 %v1511_v0  ;;  %v1599_v0 = vld [vmem:[%s2174_s2 + $0x44] ss:$8 sps:$4 sm:$0xff]  }
  0x22   :  { %281 = vmatmul.mubr.bf16.vlgmr.msra.gmra.mxu0 %v1527_v18  ;;  %474 = vmatmul.mubr.bf16.vlgmr.msra.gmra.mxu1 %v1530_v19 }
  0x23   :  { %1384 = vmatpush3.bf16.msra.mxu0 %v1512_v1  ;;  %1448 = vmatpush3.bf16.msra.mxu1 %v1512_v1  ;;  %v1601_v1 = vld [vmem:[%s2175_s3 + $0x44] ss:$8 sps:$4 sm:$0xff]  }
  0x24   :  { %288 = vmatprep.mubr.bf16.mxu0 %v1533_v20  ;;  %481 = vmatprep.mubr.bf16.mxu1 %v1535_v21 }
  0x25   :  { %1385 = vmatprep.subr.bf16.mxu0 %v1667_v2  ;;  %1449 = vmatprep.subr.bf16.mxu1 %v1667_v2  ;;  %v1603_v2 = vld [vmem:[%s2174_s2 + $0x40] ss:$8 sps:$4 sm:$0xff]  }
  0x27   :  { %1386 = vmatpush3.bf16.msra.mxu0 %v1672_v3  ;;  %1450 = vmatpush3.bf16.msra.mxu1 %v1672_v3  ;;  %v1604_v3 = vld [vmem:[%s2175_s3 + $0x40] ss:$8 sps:$4 sm:$0xff]  }
  0x28   :  { %1387 = vmatprep.subr.bf16.mxu0 %v1679_v4  ;;  %1451 = vmatprep.subr.bf16.mxu1 %v1679_v4  ;;  %v1605_v4 = vld [vmem:[%s2174_s2 + $0x54] ss:$8 sps:$4 sm:$0xff]  }
  0x2a   :  { %289 = vmatmul.mubr.bf16.gmra.mxu0 %v1537_v22  ;;  %482 = vmatmul.mubr.bf16.gmra.mxu1 %v1538_v23 }
  0x2b   :  { %296 = vmatprep.mubr.bf16.mxu0 %v1539_v24  ;;  %489 = vmatprep.mubr.bf16.mxu1 %v1541_v25 }
  0x2c   :  { %1388 = vmatpush3.bf16.msra.mxu0 %v1686_v5  ;;  %1452 = vmatpush3.bf16.msra.mxu1 %v1686_v5  ;;  %v1607_v5 = vld [vmem:[%s2175_s3 + $0x54] ss:$8 sps:$4 sm:$0xff]  }
  0x2d   :  { %1389 = vmatprep.subr.bf16.mxu0 %v1693_v6  ;;  %1453 = vmatprep.subr.bf16.mxu1 %v1693_v6  ;;  %v1609_v6 = vld [vmem:[%s2174_s2 + $0x50] ss:$8 sps:$4 sm:$0xff]  }
  0x30   :  { %1390 = vmatpush3.bf16.msra.mxu0 %v1700_v7  ;;  %1454 = vmatpush3.bf16.msra.mxu1 %v1700_v7  ;;  %v1610_v7 = vld [vmem:[%s2175_s3 + $0x50] ss:$8 sps:$4 sm:$0xff]  }
  0x31   :  { %1391 = vmatprep.subr.bf16.mxu0 %v1707_v8  ;;  %1455 = vmatprep.subr.bf16.mxu1 %v1707_v8  ;;  %v1611_v8 = vld [vmem:[%s2174_s2 + $0x64] ss:$8 sps:$4 sm:$0xff]  }
  0x32   :  { %297 = vmatmul.mubr.bf16.gmra.mxu0 %v1543_v26  ;;  %490 = vmatmul.mubr.bf16.gmra.mxu1 %v1544_v27 }
  0x33   :  { %304 = vmatprep.mubr.bf16.mxu0 %v1545_v28  ;;  %497 = vmatprep.mubr.bf16.mxu1 %v1547_v29 }
  0x34   :  { %1392 = vmatpush3.bf16.msra.mxu0 %v1714_v9  ;;  %1456 = vmatpush3.bf16.msra.mxu1 %v1714_v9  ;;  %v1613_v9 = vld [vmem:[%s2175_s3 + $0x64] ss:$8 sps:$4 sm:$0xff]  }
  0x35   :  { %1393 = vmatprep.subr.bf16.mxu0 %v1721_v10  ;;  %1457 = vmatprep.subr.bf16.mxu1 %v1721_v10  ;;  %v1615_v10 = vld [vmem:[%s2174_s2 + $0x60] ss:$8 sps:$4 sm:$0xff]  }
  0x38   :  { %1394 = vmatpush3.bf16.msra.mxu0 %v1734_v13  ;;  %1458 = vmatpush3.bf16.msra.mxu1 %v1734_v13  ;;  %v1619_v13 = vld [vmem:[%s2175_s3 + $0x74] ss:$8 sps:$4 sm:$0xff]  }
  0x39   :  { %1395 = vmatprep.subr.bf16.mxu0 %v1741_v14  ;;  %1459 = vmatprep.subr.bf16.mxu1 %v1741_v14  ;;  %v1621_v14 = vld [vmem:[%s2174_s2 + $0x70] ss:$8 sps:$4 sm:$0xff]  }
  0x3a   :  { %305 = vmatmul.mubr.bf16.gmra.mxu0 %v1549_v30  ;;  %498 = vmatmul.mubr.bf16.gmra.mxu1 %v1550_v31 }
  0x3b   :  { %312 = vmatprep.mubr.bf16.mxu0 %v1551_v32  ;;  %505 = vmatprep.mubr.bf16.mxu1 %v1553_v33 }
  0x3c   :  { %1396 = vmatpush3.bf16.msra.mxu0 %v1748_v15  ;;  %1460 = vmatpush3.bf16.msra.mxu1 %v1748_v15  ;;  %v1622_v15 = vld [vmem:[%s2175_s3 + $0x70] ss:$8 sps:$4 sm:$0xff]  }
  0x3d   :  { %1397 = vmatprep.subr.bf16.mxu0 %v1755_v16  ;;  %1461 = vmatprep.subr.bf16.mxu1 %v1755_v16 }
  0x40   :  { %1398 = vmatpush3.bf16.msra.mxu0 %v1762_v17  ;;  %1462 = vmatpush3.bf16.msra.mxu1 %v1762_v17 }
  0x42   :  { %313 = vmatmul.mubr.bf16.gmra.mxu0 %v1555_v34  ;;  %506 = vmatmul.mubr.bf16.gmra.mxu1 %v1556_v35 }
  0x43   :  { %320 = vmatprep.mubr.bf16.mxu0 %v1557_v36  ;;  %513 = vmatprep.mubr.bf16.mxu1 %v1559_v37 }
  0x4a   :  { %321 = vmatmul.mubr.bf16.gmra.mxu0 %v1561_v38  ;;  %514 = vmatmul.mubr.bf16.gmra.mxu1 %v1562_v39 }
  0x4b   :  { %328 = vmatprep.mubr.bf16.mxu0 %v1563_v40  ;;  %521 = vmatprep.mubr.bf16.mxu1 %v1565_v41 }
  0x52   :  { %329 = vmatmul.mubr.bf16.gmra.mxu0 %v1567_v42  ;;  %522 = vmatmul.mubr.bf16.gmra.mxu1 %v1568_v43 }
  0x53   :  { %336 = vmatprep.mubr.bf16.mxu0 %v1569_v44  ;;  %529 = vmatprep.mubr.bf16.mxu1 %v1571_v45 }
  0x5a   :  { %337 = vmatmul.mubr.bf16.gmra.mxu0 %v1573_v46  ;;  %530 = vmatmul.mubr.bf16.gmra.mxu1 %v1574_v47 }
  0x5b   :  { %666 = vmatprep.mubr.bf16.mxu0 %v1577_v48  ;;  %859 = vmatprep.mubr.bf16.mxu1 %v1580_v49 }
  0x62   :  { %667 = vmatmul.mubr.bf16.vlgmr.msra.gmra.mxu0 %v1575_v50  ;;  %860 = vmatmul.mubr.bf16.vlgmr.msra.gmra.mxu1 %v1578_v51 }
  0x63   :  { %674 = vmatprep.mubr.bf16.mxu0 %v1581_v52  ;;  %867 = vmatprep.mubr.bf16.mxu1 %v1583_v53 }
  0x6a   :  { %675 = vmatmul.mubr.bf16.gmra.mxu0 %v1585_v54  ;;  %868 = vmatmul.mubr.bf16.gmra.mxu1 %v1586_v55 }
  0x6b   :  { %682 = vmatprep.mubr.bf16.mxu0 %v1587_v56  ;;  %875 = vmatprep.mubr.bf16.mxu1 %v1589_v57 }
  0x72   :  { %683 = vmatmul.mubr.bf16.gmra.mxu0 %v1591_v58  ;;  %876 = vmatmul.mubr.bf16.gmra.mxu1 %v1592_v59 }
  0x73   :  { %690 = vmatprep.mubr.bf16.mxu0 %v1593_v60  ;;  %883 = vmatprep.mubr.bf16.mxu1 %v1595_v61 }
  0x7a   :  { %691 = vmatmul.mubr.bf16.gmra.mxu0 %v1597_v62  ;;  %884 = vmatmul.mubr.bf16.gmra.mxu1 %v1598_v63 }
  0x7b   :  { %698 = vmatprep.mubr.bf16.mxu0 %v1599_v0  ;;  %891 = vmatprep.mubr.bf16.mxu1 %v1601_v1 }
  0x82   :  { %699 = vmatmul.mubr.bf16.gmra.mxu0 %v1603_v2  ;;  %892 = vmatmul.mubr.bf16.gmra.mxu1 %v1604_v3 }
  0x83   :  { %706 = vmatprep.mubr.bf16.mxu0 %v1605_v4  ;;  %899 = vmatprep.mubr.bf16.mxu1 %v1607_v5 }
  0x8a   :  { %707 = vmatmul.mubr.bf16.gmra.mxu0 %v1609_v6  ;;  %900 = vmatmul.mubr.bf16.gmra.mxu1 %v1610_v7 }
  0x8b   :  { %714 = vmatprep.mubr.bf16.mxu0 %v1611_v8  ;;  %907 = vmatprep.mubr.bf16.mxu1 %v1613_v9 }
  0x92   :  { %715 = vmatmul.mubr.bf16.gmra.mxu0 %v1615_v10  ;;  %908 = vmatmul.mubr.bf16.gmra.mxu1 %v1616_v11 }
  0x93   :  { %722 = vmatprep.mubr.bf16.mxu0 %v1617_v12  ;;  %915 = vmatprep.mubr.bf16.mxu1 %v1619_v13 }
  0x9a   :  { %723 = vmatmul.mubr.bf16.gmra.mxu0 %v1621_v14  ;;  %916 = vmatmul.mubr.bf16.gmra.mxu1 %v1622_v15 }
  0xe2   :  { %v1271_v16 = vpop.f32.mrf.mxu0  ;;  %v1335_v17 = vpop.f32.mrf.mxu1 }
  0xe4   :  { %v1272_v18 = vpop.f32.mrf.mxu0  ;;  %v1336_v19 = vpop.f32.mrf.mxu1 }
  0xe5   :  { %v1982_v20 = vadd.f32 %v1272_v18, %v1271_v16  ;;  %v1984_v21 = vadd.f32 %v1336_v19, %v1335_v17 }
  0xe6   :  { %v1274_v22 = vpop.f32.mrf.mxu0  ;;  %v1338_v23 = vpop.f32.mrf.mxu1 }
  0xe7   :  { %v924_v24 = vmax.f32 %v1982_v20, %v1984_v21 }
  0xe8   :  { %v1275_v25 = vpop.f32.mrf.mxu0  ;;  %v1339_v26 = vpop.f32.mrf.mxu1 }
  0xe9   :  { %v1988_v27 = vadd.f32 %v1275_v25, %v1274_v22  ;;  %v1990_v28 = vadd.f32 %v1339_v26, %v1338_v23 }
  0xea   :  { %v1277_v29 = vpop.f32.mrf.mxu0  ;;  %v1341_v30 = vpop.f32.mrf.mxu1 }
  0xeb   :  { %v925_v31 = vmax.f32 %v1988_v27, %v1990_v28 }
  0xec   :  { %v1278_v32 = vpop.f32.mrf.mxu0  ;;  %v1342_v33 = vpop.f32.mrf.mxu1 }
  0xed   :  { %v1994_v34 = vadd.f32 %v1278_v32, %v1277_v29  ;;  %v1996_v35 = vadd.f32 %v1342_v33, %v1341_v30 }
  0xee   :  { %v1280_v36 = vpop.f32.mrf.mxu0  ;;  %v1344_v37 = vpop.f32.mrf.mxu1 }
  0xef   :  { %v926_v38 = vmax.f32 %v1994_v34, %v1996_v35 }
  0xf0   :  { %v1281_v39 = vpop.f32.mrf.mxu0  ;;  %v1345_v40 = vpop.f32.mrf.mxu1 }
  0xf1   :  { %v2000_v41 = vadd.f32 %v1281_v39, %v1280_v36  ;;  %v2002_v42 = vadd.f32 %v1345_v40, %v1344_v37 }
  0xf2   :  { %v1283_v43 = vpop.f32.mrf.mxu0  ;;  %v1347_v44 = vpop.f32.mrf.mxu1 }
  0xf3   :  { %v927_v45 = vmax.f32 %v2000_v41, %v2002_v42 }
  0xf4   :  { %v1284_v46 = vpop.f32.mrf.mxu0  ;;  %v1348_v47 = vpop.f32.mrf.mxu1 }
  0xf5   :  { %v2006_v48 = vadd.f32 %v1284_v46, %v1283_v43  ;;  %v2008_v49 = vadd.f32 %v1348_v47, %v1347_v44 }
  0xf6   :  { %v1286_v50 = vpop.f32.mrf.mxu0  ;;  %v1350_v51 = vpop.f32.mrf.mxu1 }
  0xf7   :  { %v928_v52 = vmax.f32 %v2006_v48, %v2008_v49 }
  0xf8   :  { %v1287_v53 = vpop.f32.mrf.mxu0  ;;  %v1351_v54 = vpop.f32.mrf.mxu1 }
  0xf9   :  { %v2012_v55 = vadd.f32 %v1287_v53, %v1286_v50  ;;  %v2014_v56 = vadd.f32 %v1351_v54, %v1350_v51 }
  0xfa   :  { %v1289_v57 = vpop.f32.mrf.mxu0  ;;  %v1353_v58 = vpop.f32.mrf.mxu1 }
  0xfb   :  { %v929_v59 = vmax.f32 %v2012_v55, %v2014_v56 }
  0xfc   :  { %v1290_v60 = vpop.f32.mrf.mxu0  ;;  %v1354_v61 = vpop.f32.mrf.mxu1 }
  0xfd   :  { %v2018_v62 = vadd.f32 %v1290_v60, %v1289_v57  ;;  %v2020_v63 = vadd.f32 %v1354_v61, %v1353_v58 }
  0xfe   :  { %v1292_v0 = vpop.f32.mrf.mxu0  ;;  %v1356_v1 = vpop.f32.mrf.mxu1 }
  0xff   :  { %v930_v2 = vmax.f32 %v2018_v62, %v2020_v63 }
 0x100   :  { %v1293_v3 = vpop.f32.mrf.mxu0  ;;  %v1357_v4 = vpop.f32.mrf.mxu1 }
 0x101   :  { %v2024_v5 = vadd.f32 %v1293_v3, %v1292_v0  ;;  %v2026_v6 = vadd.f32 %v1357_v4, %v1356_v1 }
 0x102   :  { %v1295_v7 = vpop.f32.mrf.mxu0  ;;  %v1359_v8 = vpop.f32.mrf.mxu1 }
 0x103   :  { %v931_v9 = vmax.f32 %v2024_v5, %v2026_v6 }
 0x104   :  { %v1296_v10 = vpop.f32.mrf.mxu0  ;;  %v1360_v11 = vpop.f32.mrf.mxu1 }
 0x105   :  { %v2030_v12 = vadd.f32 %v1296_v10, %v1295_v7  ;;  %v2032_v13 = vadd.f32 %v1360_v11, %v1359_v8 }
 0x106   :  { %v1298_v14 = vpop.f32.mrf.mxu0  ;;  %v1362_v15 = vpop.f32.mrf.mxu1 }
 0x107   :  { %v932_v16 = vmax.f32 %v2030_v12, %v2032_v13 }
 0x108   :  { %v1299_v17 = vpop.f32.mrf.mxu0  ;;  %v1363_v18 = vpop.f32.mrf.mxu1 }
 0x109   :  { %v2036_v19 = vadd.f32 %v1299_v17, %v1298_v14  ;;  %v2038_v22 = vadd.f32 %v1363_v18, %v1362_v15 }
 0x10a   :  { %v1301_v23 = vpop.f32.mrf.mxu0  ;;  %v1365_v25 = vpop.f32.mrf.mxu1 }
 0x10b   :  { %v933_v26 = vmax.f32 %v2036_v19, %v2038_v22 }
 0x10c   :  { %v1302_v29 = vpop.f32.mrf.mxu0  ;;  %v1366_v30 = vpop.f32.mrf.mxu1 }
 0x10d   :  { %v2042_v32 = vadd.f32 %v1302_v29, %v1301_v23  ;;  %v2044_v33 = vadd.f32 %v1366_v30, %v1365_v25 }
 0x10e   :  { %v1304_v36 = vpop.f32.mrf.mxu0  ;;  %v1368_v37 = vpop.f32.mrf.mxu1 }
 0x10f   :  { %v934_v39 = vmax.f32 %v2042_v32, %v2044_v33 }
 0x110   :  { %v1305_v40 = vpop.f32.mrf.mxu0  ;;  %v1369_v43 = vpop.f32.mrf.mxu1 }
 0x111   :  { %v2048_v44 = vadd.f32 %v1305_v40, %v1304_v36  ;;  %v2050_v46 = vadd.f32 %v1369_v43, %v1368_v37 }
 0x112   :  { %v1307_v47 = vpop.f32.mrf.mxu0  ;;  %v1371_v50 = vpop.f32.mrf.mxu1 }
 0x113   :  { %v935_v51 = vmax.f32 %v2048_v44, %v2050_v46 }
 0x114   :  { %v1308_v53 = vpop.f32.mrf.mxu0  ;;  %v1372_v54 = vpop.f32.mrf.mxu1 }
 0x115   :  { %v2054_v57 = vadd.f32 %v1308_v53, %v1307_v47  ;;  %v2056_v58 = vadd.f32 %v1372_v54, %v1371_v50 }
 0x116   :  { %v1310_v60 = vpop.f32.mrf.mxu0  ;;  %v1374_v61 = vpop.f32.mrf.mxu1 }
 0x117   :  { %v936_v0 = vmax.f32 %v2054_v57, %v2056_v58 }
 0x118   :  { %v1311_v1 = vpop.f32.mrf.mxu0  ;;  %v1375_v3 = vpop.f32.mrf.mxu1 }
 0x119   :  { %v2060_v4 = vadd.f32 %v1311_v1, %v1310_v60  ;;  %v2062_v7 = vadd.f32 %v1375_v3, %v1374_v61 }
 0x11a   :  { %v1313_v8 = vpop.f32.mrf.mxu0  ;;  %v1377_v10 = vpop.f32.mrf.mxu1 }
 0x11c   :  { %v1314_v14 = vpop.f32.mrf.mxu0  ;;  %v1378_v15 = vpop.f32.mrf.mxu1 }
 0x11d   :  { %v2066_v17 = vadd.f32 %v1314_v14, %v1313_v8  ;;  %v2068_v18 = vadd.f32 %v1378_v15, %v1377_v10 }
 0x11e   :  { %v1316_v23 = vpop.f32.mrf.mxu0  ;;  %v1380_v25 = vpop.f32.mrf.mxu1 }
 0x120   :  { %v1317_v30 = vpop.f32.mrf.mxu0  ;;  %v1381_v36 = vpop.f32.mrf.mxu1 }
 0x121   :  { %v2072_v37 = vadd.f32 %v1317_v30, %v1316_v23  ;;  %v2074_v40 = vadd.f32 %v1381_v36, %v1380_v25  ;;  %v2084_v23 = vld [vmem:[%s2176_s5] ss:$0 sm:$0xff] }
 0x122   :  { %v1399_v43 = vpop.f32.mrf.mxu0  ;;  %v1463_v47 = vpop.f32.mrf.mxu1 }
 0x124   :  { %v1400_v53 = vpop.f32.mrf.mxu0  ;;  %v1464_v54 = vpop.f32.mrf.mxu1 }
 0x125   :  { %v1401_v60 = vadd.f32 %v1400_v53, %v1399_v43  ;;  %v1465_v61 = vadd.f32 %v1464_v54, %v1463_v47 }
 0x126   :  { %v1402_v1 = vpop.f32.mrf.mxu0  ;;  %v1466_v3 = vpop.f32.mrf.mxu1 }
 0x127   :  { %v940_v8 = vmax.f32 %v1401_v60, %v1465_v61 }
 0x128   :  { %v1403_v10 = vpop.f32.mrf.mxu0  ;;  %v1467_v14 = vpop.f32.mrf.mxu1 }
 0x129   :  { %v956_v15 = vmax.f32 %v924_v24, %v940_v8  ;;  %v1404_v25 = vadd.f32 %v1403_v10, %v1402_v1  ;;  %v1468_v30 = vadd.f32 %v1467_v14, %v1466_v3 }
 0x12a   :  { %v1405_v36 = vpop.f32.mrf.mxu0  ;;  %v1469_v50 = vpop.f32.mrf.mxu1 }
 0x12b   :  { %v941_v43 = vmax.f32 %v1404_v25, %v1468_v30  ;;  %v979_v47 = vadd.f32 %v2084_v23, %v956_v15 }
 0x12c   :  { %v1406_v53 = vpop.f32.mrf.mxu0  ;;  %v1470_v54 = vpop.f32.mrf.mxu1 }
 0x12d   :  { %v957_v60 = vmax.f32 %v925_v31, %v941_v43  ;;  %v1407_v20 = vadd.f32 %v1406_v53, %v1405_v36  ;;  %v1471_v21 = vadd.f32 %v1470_v54, %v1469_v50  ;;  %v995_v1 = vmax.f32 %v979_v47, 0.0 }
 0x12e   :  { %v1408_v24 = vpop.f32.mrf.mxu0  ;;  %v1472_v61 = vpop.f32.mrf.mxu1 }
 0x12f   :  { %v980_v8 = vadd.f32 %v2084_v23, %v957_v60  ;;  %v942_v29 = vmax.f32 %v1407_v20, %v1471_v21 }
 0x130   :  { %v1409_v3 = vpop.f32.mrf.mxu0  ;;  %v1473_v10 = vpop.f32.mrf.mxu1 }
 0x131   :  { %v996_v14 = vmax.f32 %v980_v8, 0.0  ;;  %v958_v15 = vmax.f32 %v926_v38, %v942_v29  ;;  %v1410_v25 = vadd.f32 %v1409_v3, %v1408_v24  ;;  %v1474_v30 = vadd.f32 %v1473_v10, %v1472_v61 }
 0x132   :  { %v1411_v11 = vpop.f32.mrf.mxu0  ;;  %v1475_v27 = vpop.f32.mrf.mxu1 }
 0x133   :  { %v1211_v28 = vpack.c.bf16 %v996_v14, %v995_v1  ;;  %v943_v31 = vmax.f32 %v1410_v25, %v1474_v30  ;;  %v981_v50 = vadd.f32 %v2084_v23, %v958_v15 }
 0x134   :  { %v1412_v36 = vpop.f32.mrf.mxu0  ;;  %v1476_v43 = vpop.f32.mrf.mxu1 }
 0x135   :  { %1212 = vst [vmem:[%s2177_s6] sm:$0xff] %v1211_v28   ;;  %v959_v47 = vmax.f32 %v927_v45, %v943_v31  ;;  %v1413_v34 = vadd.f32 %v1412_v36, %v1411_v11  ;;  %v1477_v35 = vadd.f32 %v1476_v43, %v1475_v27  ;;  %v997_v60 = vmax.f32 %v981_v50, 0.0 }
 0x136   :  { %v1414_v38 = vpop.f32.mrf.mxu0  ;;  %v1478_v29 = vpop.f32.mrf.mxu1 }
 0x137   :  { %v982_v53 = vadd.f32 %v2084_v23, %v959_v47  ;;  %v944_v54 = vmax.f32 %v1413_v34, %v1477_v35 }
 0x138   :  { %v1415_v20 = vpop.f32.mrf.mxu0  ;;  %v1479_v21 = vpop.f32.mrf.mxu1 }
 0x139   :  { %v998_v24 = vmax.f32 %v982_v53, 0.0  ;;  %v960_v61 = vmax.f32 %v928_v52, %v944_v54  ;;  %v1416_v8 = vadd.f32 %v1415_v20, %v1414_v38  ;;  %v1480_v1 = vadd.f32 %v1479_v21, %v1478_v29 }
 0x13a   :  { %v1417_v3 = vpop.f32.mrf.mxu0  ;;  %v1481_v41 = vpop.f32.mrf.mxu1 }
 0x13b   :  { %v1216_v42 = vpack.c.bf16 %v998_v24, %v997_v60  ;;  %v945_v45 = vmax.f32 %v1416_v8, %v1480_v1  ;;  %v983_v11 = vadd.f32 %v2084_v23, %v960_v61 }
 0x13c   :  { %v1418_v10 = vpop.f32.mrf.mxu0  ;;  %v1482_v14 = vpop.f32.mrf.mxu1 }
 0x13d   :  { %1248 = vst [vmem:[%s2177_s6 + $0x8] sm:$0xff] %v1216_v42   ;;  %v961_v15 = vmax.f32 %v929_v59, %v945_v45  ;;  %v1419_v48 = vadd.f32 %v1418_v10, %v1417_v3  ;;  %v1483_v49 = vadd.f32 %v1482_v14, %v1481_v41  ;;  %v999_v28 = vmax.f32 %v983_v11, 0.0 }
 0x13e   :  { %v1420_v52 = vpop.f32.mrf.mxu0  ;;  %v1484_v25 = vpop.f32.mrf.mxu1 }
 0x13f   :  { %v984_v30 = vadd.f32 %v2084_v23, %v961_v15  ;;  %v946_v27 = vmax.f32 %v1419_v48, %v1483_v49 }
 0x140   :  { %v1421_v31 = vpop.f32.mrf.mxu0  ;;  %v1485_v50 = vpop.f32.mrf.mxu1 }
 0x141   :  { %v1000_v36 = vmax.f32 %v984_v30, 0.0  ;;  %v962_v43 = vmax.f32 %v930_v2, %v946_v27  ;;  %v1422_v47 = vadd.f32 %v1421_v31, %v1420_v52  ;;  %v1486_v34 = vadd.f32 %v1485_v50, %v1484_v25 }
 0x142   :  { %v1423_v35 = vpop.f32.mrf.mxu0  ;;  %v1487_v55 = vpop.f32.mrf.mxu1 }
 0x143   :  { %v1221_v56 = vpack.c.bf16 %v1000_v36, %v999_v28  ;;  %v947_v59 = vmax.f32 %v1422_v47, %v1486_v34  ;;  %v985_v38 = vadd.f32 %v2084_v23, %v962_v43 }
 0x144   :  { %v1424_v29 = vpop.f32.mrf.mxu0  ;;  %v1488_v53 = vpop.f32.mrf.mxu1 }
 0x145   :  { %1249 = vst [vmem:[%s2177_s6 + $0x10] sm:$0xff] %v1221_v56   ;;  %v963_v54 = vmax.f32 %v931_v9, %v947_v59  ;;  %v1425_v62 = vadd.f32 %v1424_v29, %v1423_v35  ;;  %v1489_v63 = vadd.f32 %v1488_v53, %v1487_v55  ;;  %v1001_v24 = vmax.f32 %v985_v38, 0.0 }
 0x146   :  { %v1426_v2 = vpop.f32.mrf.mxu0  ;;  %v1490_v60 = vpop.f32.mrf.mxu1 }
 0x147   :  { %v986_v20 = vadd.f32 %v2084_v23, %v963_v54  ;;  %v948_v21 = vmax.f32 %v1425_v62, %v1489_v63 }
 0x148   :  { %v1427_v61 = vpop.f32.mrf.mxu0  ;;  %v1491_v8 = vpop.f32.mrf.mxu1 }
 0x149   :  { %v1002_v1 = vmax.f32 %v986_v20, 0.0  ;;  %v964_v3 = vmax.f32 %v932_v16, %v948_v21  ;;  %v1428_v41 = vadd.f32 %v1427_v61, %v1426_v2  ;;  %v1492_v42 = vadd.f32 %v1491_v8, %v1490_v60 }
 0x14a   :  { %v1429_v45 = vpop.f32.mrf.mxu0  ;;  %v1493_v5 = vpop.f32.mrf.mxu1  ;;  %v2178_v8 = vmax.f32 %v2060_v4, %v2062_v7 }
 0x14b   :  { %v1226_v6 = vpack.c.bf16 %v1002_v1, %v1001_v24  ;;  %v949_v9 = vmax.f32 %v1428_v41, %v1492_v42  ;;  %v987_v11 = vadd.f32 %v2084_v23, %v964_v3 }
 0x14c   :  { %v1430_v10 = vpop.f32.mrf.mxu0  ;;  %v1494_v14 = vpop.f32.mrf.mxu1 }
 0x14d   :  { %1250 = vst [vmem:[%s2177_s6 + $0x18] sm:$0xff] %v1226_v6   ;;  %v965_v15 = vmax.f32 %v933_v26, %v949_v9  ;;  %v1431_v12 = vadd.f32 %v1430_v10, %v1429_v45  ;;  %v1495_v13 = vadd.f32 %v1494_v14, %v1493_v5  ;;  %v1003_v25 = vmax.f32 %v987_v11, 0.0 }
 0x14e   :  { %v1432_v16 = vpop.f32.mrf.mxu0  ;;  %v1496_v48 = vpop.f32.mrf.mxu1  ;;  %v2179_v11 = vmax.f32 %v2066_v17, %v2068_v18 }
 0x14f   :  { %v988_v49 = vadd.f32 %v2084_v23, %v965_v15  ;;  %v950_v52 = vmax.f32 %v1431_v12, %v1495_v13  ;;  %v2180_v13 = vmax.f32 %v2072_v37, %v2074_v40 }
 0x150   :  { %v1433_v30 = vpop.f32.mrf.mxu0  ;;  %v1497_v27 = vpop.f32.mrf.mxu1 }
 0x151   :  { %v1004_v28 = vmax.f32 %v988_v49, 0.0  ;;  %v966_v31 = vmax.f32 %v934_v39, %v950_v52  ;;  %v1434_v50 = vadd.f32 %v1433_v30, %v1432_v16  ;;  %v1498_v36 = vadd.f32 %v1497_v27, %v1496_v48 }
 0x152   :  { %v1435_v43 = vpop.f32.mrf.mxu0  ;;  %v1499_v19 = vpop.f32.mrf.mxu1 }
 0x153   :  { %v1231_v22 = vpack.c.bf16 %v1004_v28, %v1003_v25  ;;  %v951_v26 = vmax.f32 %v1434_v50, %v1498_v36  ;;  %v989_v47 = vadd.f32 %v2084_v23, %v966_v31 }
 0x154   :  { %v1436_v34 = vpop.f32.mrf.mxu0  ;;  %v1500_v35 = vpop.f32.mrf.mxu1 }
 0x155   :  { %1251 = vst [vmem:[%s2177_s6 + $0x20] sm:$0xff] %v1231_v22   ;;  %v967_v55 = vmax.f32 %v935_v51, %v951_v26  ;;  %v1437_v32 = vadd.f32 %v1436_v34, %v1435_v43  ;;  %v1501_v33 = vadd.f32 %v1500_v35, %v1499_v19  ;;  %v1005_v29 = vmax.f32 %v989_v47, 0.0 }
 0x156   :  { %v1438_v39 = vpop.f32.mrf.mxu0  ;;  %v1502_v56 = vpop.f32.mrf.mxu1 }
 0x157   :  { %v990_v59 = vadd.f32 %v2084_v23, %v967_v55  ;;  %v952_v38 = vmax.f32 %v1437_v32, %v1501_v33 }
 0x158   :  { %v1439_v53 = vpop.f32.mrf.mxu0  ;;  %v1503_v54 = vpop.f32.mrf.mxu1 }
 0x159   :  { %v1006_v62 = vmax.f32 %v990_v59, 0.0  ;;  %v968_v63 = vmax.f32 %v936_v0, %v952_v38  ;;  %v1440_v2 = vadd.f32 %v1439_v53, %v1438_v39  ;;  %v1504_v60 = vadd.f32 %v1503_v54, %v1502_v56 }
 0x15a   :  { %v1441_v20 = vpop.f32.mrf.mxu0  ;;  %v1505_v44 = vpop.f32.mrf.mxu1 }
 0x15b   :  { %v1236_v46 = vpack.c.bf16 %v1006_v62, %v1005_v29  ;;  %v953_v51 = vmax.f32 %v1440_v2, %v1504_v60  ;;  %v991_v21 = vadd.f32 %v2084_v23, %v968_v63 }
 0x15c   :  { %v1442_v24 = vpop.f32.mrf.mxu0  ;;  %v1506_v61 = vpop.f32.mrf.mxu1 }
 0x15d   :  { %1252 = vst [vmem:[%s2177_s6 + $0x28] sm:$0xff] %v1236_v46   ;;  %v969_v1 = vmax.f32 %v2178_v8, %v953_v51  ;;  %v1443_v57 = vadd.f32 %v1442_v24, %v1441_v20  ;;  %v1507_v58 = vadd.f32 %v1506_v61, %v1505_v44  ;;  %v1007_v45 = vmax.f32 %v991_v21, 0.0 }
 0x15e   :  { %v1444_v0 = vpop.f32.mrf.mxu0  ;;  %v1508_v3 = vpop.f32.mrf.mxu1 }
 0x15f   :  { %v992_v41 = vadd.f32 %v2084_v23, %v969_v1  ;;  %v954_v42 = vmax.f32 %v1443_v57, %v1507_v58 }
 0x160   :  { %v1445_v5 = vpop.f32.mrf.mxu0  ;;  %v1509_v6 = vpop.f32.mrf.mxu1 }
 0x161   :  { %v1008_v9 = vmax.f32 %v992_v41, 0.0  ;;  %v970_v10 = vmax.f32 %v2179_v11, %v954_v42  ;;  %v1446_v14 = vadd.f32 %v1445_v5, %v1444_v0  ;;  %v1510_v15 = vadd.f32 %v1509_v6, %v1508_v3 }
 0x163   :  { %v1241_v12 = vpack.c.bf16 %v1008_v9, %v1007_v45  ;;  %v955_v4 = vmax.f32 %v1446_v14, %v1510_v15  ;;  %v993_v7 = vadd.f32 %v2084_v23, %v970_v10 }
 0x165   :  { %1253 = vst [vmem:[%s2177_s6 + $0x30] sm:$0xff] %v1241_v12   ;;  %v971_v16 = vmax.f32 %v2180_v13, %v955_v4  ;;  %v1009_v49 = vmax.f32 %v993_v7, 0.0 }
 0x167   :  { %v994_v48 = vadd.f32 %v2084_v23, %v971_v16 }
 0x169   :  { %v1010_v52 = vmax.f32 %v994_v48, 0.0 }
 0x16b   :  { %v1246_v17 = vpack.c.bf16 %v1010_v52, %v1009_v49 }
 0x16d   :  { %1254 = vst [vmem:[%s2177_s6 + $0x38] sm:$0xff] %v1246_v17  }

// kernel: pg_net_forward.5
= control target key start
LH: loop header
LB: loop body
LE: loop exit
PB: predicated region body
PF: predicated region fallthrough
CT: control target
= control target key end

     0   :  { %s1402_s4 = inlined_call_operand.vmem [shape: bf16[512,128], index: 4, kind: input, shape index: {}]   ;;  %s1403_s0 = inlined_call_operand.vmem [shape: bf16[16,512], index: 0, kind: input, shape index: {}]   ;;  %s1404_s1 = inlined_call_operand.vmem [shape: bf16[16,512], index: 1, kind: input, shape index: {}]   ;;  %s1405_s2 = inlined_call_operand.vmem [shape: bf16[16,512], index: 2, kind: input, shape index: {}]   ;;  %s1406_s3 = inlined_call_operand.vmem [shape: bf16[16,512], index: 3, kind: input, shape index: {}]   ;;  %s1407_s5 = inlined_call_operand.vmem [shape: f32[1,128], index: 5, kind: input, shape index: {}]   ;;  %s1408_s6 = inlined_call_operand.vmem [shape: bf16[16,128], index: 6, kind: output, shape index: {}]  }
   0x1   :  { %v1063_v0 = vld [vmem:[%s1402_s4 + $0x78] sm:$0xff]   ;;  %v1086_v4 = vld [vmem:[%s1402_s4 + $0x70] sm:$0xff]   ;;  %v1110_v8 = vld [vmem:[%s1402_s4 + $0x68] sm:$0xff]  }
   0x2   :  { %v1068_v1 = vld [vmem:[%s1402_s4 + $0xf8] sm:$0xff]   ;;  %793 = vmatprep.subr.bf16.mxu0 %v1063_v0  ;;  %v1092_v5 = vld [vmem:[%s1402_s4 + $0xf0] sm:$0xff]   ;;  %v1116_v9 = vld [vmem:[%s1402_s4 + $0xe8] sm:$0xff]  }
   0x3   :  { %v1074_v2 = vld [vmem:[%s1402_s4 + $0x38] sm:$0xff]   ;;  %815 = vmatprep.subr.bf16.mxu1 %v1068_v1  ;;  %v1098_v6 = vld [vmem:[%s1402_s4 + $0x30] sm:$0xff]   ;;  %v1122_v10 = vld [vmem:[%s1402_s4 + $0x28] sm:$0xff]  }
   0x4   :  { %v1080_v3 = vld [vmem:[%s1402_s4 + $0xb8] sm:$0xff]   ;;  %794 = vmatpush3.bf16.msra.mxu0 %v1074_v2  ;;  %v1104_v7 = vld [vmem:[%s1402_s4 + $0xb0] sm:$0xff]   ;;  %v1128_v11 = vld [vmem:[%s1402_s4 + $0xa8] sm:$0xff]  }
   0x5   :  { %816 = vmatpush3.bf16.msra.mxu1 %v1080_v3  ;;  %795 = vmatprep.subr.bf16.mxu0 %v1086_v4  ;;  %v1134_v12 = vld [vmem:[%s1402_s4 + $0x60] sm:$0xff]   ;;  %v1158_v16 = vld [vmem:[%s1402_s4 + $0x58] sm:$0xff]   ;;  %v1182_v20 = vld [vmem:[%s1402_s4 + $0x50] sm:$0xff]  }
   0x6   :  { %817 = vmatprep.subr.bf16.mxu1 %v1092_v5  ;;  %v1140_v13 = vld [vmem:[%s1402_s4 + $0xe0] sm:$0xff]   ;;  %v1164_v17 = vld [vmem:[%s1402_s4 + $0xd8] sm:$0xff]   ;;  %v1188_v21 = vld [vmem:[%s1402_s4 + $0xd0] sm:$0xff]  }
   0x7   :  { %v1146_v14 = vld [vmem:[%s1402_s4 + $0x20] sm:$0xff]   ;;  %v1170_v18 = vld [vmem:[%s1402_s4 + $0x18] sm:$0xff]   ;;  %v1194_v22 = vld [vmem:[%s1402_s4 + $0x10] sm:$0xff]  }
   0x8   :  { %796 = vmatpush3.bf16.msra.mxu0 %v1098_v6  ;;  %v1152_v15 = vld [vmem:[%s1402_s4 + $0xa0] sm:$0xff]   ;;  %v1176_v19 = vld [vmem:[%s1402_s4 + $0x98] sm:$0xff]   ;;  %v1200_v23 = vld [vmem:[%s1402_s4 + $0x90] sm:$0xff]  }
   0x9   :  { %818 = vmatpush3.bf16.msra.mxu1 %v1104_v7  ;;  %797 = vmatprep.subr.bf16.mxu0 %v1110_v8  ;;  %v1206_v24 = vld [vmem:[%s1402_s4 + $0x48] sm:$0xff]   ;;  %v1230_v28 = vld [vmem:[%s1402_s4 + $0x40] sm:$0xff]  }
   0xa   :  { %819 = vmatprep.subr.bf16.mxu1 %v1116_v9  ;;  %v1212_v25 = vld [vmem:[%s1402_s4 + $0xc8] sm:$0xff]   ;;  %v1236_v29 = vld [vmem:[%s1402_s4 + $0xc0] sm:$0xff]  }
   0xb   :  { %v1218_v26 = vld [vmem:[%s1402_s4 + $0x8] sm:$0xff]   ;;  %v1242_v30 = vld [vmem:[%s1402_s4] sm:$0xff]  }
   0xc   :  { %798 = vmatpush3.bf16.msra.mxu0 %v1122_v10  ;;  %v1224_v27 = vld [vmem:[%s1402_s4 + $0x88] sm:$0xff]   ;;  %v1248_v31 = vld [vmem:[%s1402_s4 + $0x80] sm:$0xff]  }
   0xd   :  { %820 = vmatpush3.bf16.msra.mxu1 %v1128_v11  ;;  %799 = vmatprep.subr.bf16.mxu0 %v1134_v12  ;;  %v1001_v32 = vld [vmem:[%s1403_s0] ss:$16 sps:$4 sm:$0xff]   ;;  %v1003_v33 = vld [vmem:[%s1403_s0 + $0x4] ss:$16 sps:$4 sm:$0xff]   ;;  %v1004_v34 = vld [vmem:[%s1403_s0 + $0x8] ss:$16 sps:$4 sm:$0xff]  }
   0xe   :  { %821 = vmatprep.subr.bf16.mxu1 %v1140_v13  ;;  %v1006_v35 = vld [vmem:[%s1403_s0 + $0xc] ss:$16 sps:$4 sm:$0xff]   ;;  %336 = vmatprep.mubr.bf16.mxu0 %v1003_v33  ;;  %v1009_v36 = vld [vmem:[%s1404_s1 + $0x4] ss:$16 sps:$4 sm:$0xff]   ;;  %v1007_v38 = vld [vmem:[%s1404_s1] ss:$16 sps:$4 sm:$0xff]  }
   0xf   :  { %377 = vmatprep.mubr.bf16.mxu1 %v1006_v35  ;;  %v1012_v37 = vld [vmem:[%s1404_s1 + $0xc] ss:$16 sps:$4 sm:$0xff]   ;;  %v1010_v39 = vld [vmem:[%s1404_s1 + $0x8] ss:$16 sps:$4 sm:$0xff]   ;;  %v1015_v40 = vld [vmem:[%s1405_s2 + $0x4] ss:$16 sps:$4 sm:$0xff]  }
  0x10   :  { %800 = vmatpush3.bf16.msra.mxu0 %v1146_v14  ;;  %v1018_v41 = vld [vmem:[%s1405_s2 + $0xc] ss:$16 sps:$4 sm:$0xff]   ;;  %v1013_v42 = vld [vmem:[%s1405_s2] ss:$16 sps:$4 sm:$0xff]   ;;  %v1016_v43 = vld [vmem:[%s1405_s2 + $0x8] ss:$16 sps:$4 sm:$0xff]  }
  0x11   :  { %822 = vmatpush3.bf16.msra.mxu1 %v1152_v15  ;;  %801 = vmatprep.subr.bf16.mxu0 %v1158_v16  ;;  %v1021_v44 = vld [vmem:[%s1406_s3 + $0x4] ss:$16 sps:$4 sm:$0xff]   ;;  %v1024_v45 = vld [vmem:[%s1406_s3 + $0xc] ss:$16 sps:$4 sm:$0xff]   ;;  %v1019_v46 = vld [vmem:[%s1406_s3] ss:$16 sps:$4 sm:$0xff]  }
  0x12   :  { %823 = vmatprep.subr.bf16.mxu1 %v1164_v17  ;;  %v1022_v47 = vld [vmem:[%s1406_s3 + $0x8] ss:$16 sps:$4 sm:$0xff]  }
  0x14   :  { %802 = vmatpush3.bf16.msra.mxu0 %v1170_v18 }
  0x15   :  { %824 = vmatpush3.bf16.msra.mxu1 %v1176_v19  ;;  %803 = vmatprep.subr.bf16.mxu0 %v1182_v20 }
  0x16   :  { %825 = vmatprep.subr.bf16.mxu1 %v1188_v21 }
  0x18   :  { %804 = vmatpush3.bf16.msra.mxu0 %v1194_v22 }
  0x19   :  { %826 = vmatpush3.bf16.msra.mxu1 %v1200_v23  ;;  %805 = vmatprep.subr.bf16.mxu0 %v1206_v24 }
  0x1a   :  { %827 = vmatprep.subr.bf16.mxu1 %v1212_v25 }
  0x1c   :  { %806 = vmatpush3.bf16.msra.mxu0 %v1218_v26 }
  0x1d   :  { %828 = vmatpush3.bf16.msra.mxu1 %v1224_v27  ;;  %807 = vmatprep.subr.bf16.mxu0 %v1230_v28 }
  0x1e   :  { %829 = vmatprep.subr.bf16.mxu1 %v1236_v29 }
  0x20   :  { %808 = vmatpush3.bf16.msra.mxu0 %v1242_v30 }
  0x21   :  { %830 = vmatpush3.bf16.msra.mxu1 %v1248_v31  ;;  %837 = vmatprep.subr.bf16.mxu0 %v1063_v0 }
  0x22   :  { %859 = vmatprep.subr.bf16.mxu1 %v1068_v1 }
  0x23   :  { %337 = vmatmul.mubr.bf16.vlgmr.msra.gmra.mxu0 %v1001_v32 }
  0x24   :  { %378 = vmatmul.mubr.bf16.vlgmr.msra.gmra.mxu1 %v1004_v34  ;;  %838 = vmatpush3.bf16.msra.mxu0 %v1074_v2 }
  0x25   :  { %860 = vmatpush3.bf16.msra.mxu1 %v1080_v3  ;;  %839 = vmatprep.subr.bf16.mxu0 %v1086_v4 }
  0x26   :  { %861 = vmatprep.subr.bf16.mxu1 %v1092_v5  ;;  %442 = vmatprep.mubr.bf16.mxu0 %v1009_v36 }
  0x27   :  { %483 = vmatprep.mubr.bf16.mxu1 %v1012_v37 }
  0x28   :  { %840 = vmatpush3.bf16.msra.mxu0 %v1098_v6 }
  0x29   :  { %862 = vmatpush3.bf16.msra.mxu1 %v1104_v7  ;;  %841 = vmatprep.subr.bf16.mxu0 %v1110_v8 }
  0x2a   :  { %863 = vmatprep.subr.bf16.mxu1 %v1116_v9 }
  0x2c   :  { %842 = vmatpush3.bf16.msra.mxu0 %v1122_v10 }
  0x2d   :  { %864 = vmatpush3.bf16.msra.mxu1 %v1128_v11  ;;  %843 = vmatprep.subr.bf16.mxu0 %v1134_v12 }
  0x2e   :  { %865 = vmatprep.subr.bf16.mxu1 %v1140_v13 }
  0x30   :  { %844 = vmatpush3.bf16.msra.mxu0 %v1146_v14 }
  0x31   :  { %866 = vmatpush3.bf16.msra.mxu1 %v1152_v15  ;;  %845 = vmatprep.subr.bf16.mxu0 %v1158_v16 }
  0x32   :  { %867 = vmatprep.subr.bf16.mxu1 %v1164_v17 }
  0x34   :  { %846 = vmatpush3.bf16.msra.mxu0 %v1170_v18 }
  0x35   :  { %868 = vmatpush3.bf16.msra.mxu1 %v1176_v19  ;;  %847 = vmatprep.subr.bf16.mxu0 %v1182_v20 }
  0x36   :  { %869 = vmatprep.subr.bf16.mxu1 %v1188_v21 }
  0x38   :  { %848 = vmatpush3.bf16.msra.mxu0 %v1194_v22 }
  0x39   :  { %870 = vmatpush3.bf16.msra.mxu1 %v1200_v23  ;;  %849 = vmatprep.subr.bf16.mxu0 %v1206_v24 }
  0x3a   :  { %871 = vmatprep.subr.bf16.mxu1 %v1212_v25 }
  0x3c   :  { %850 = vmatpush3.bf16.msra.mxu0 %v1218_v26 }
  0x3d   :  { %872 = vmatpush3.bf16.msra.mxu1 %v1224_v27  ;;  %851 = vmatprep.subr.bf16.mxu0 %v1230_v28 }
  0x3e   :  { %873 = vmatprep.subr.bf16.mxu1 %v1236_v29 }
  0x40   :  { %852 = vmatpush3.bf16.msra.mxu0 %v1242_v30 }
  0x41   :  { %874 = vmatpush3.bf16.msra.mxu1 %v1248_v31  ;;  %881 = vmatprep.subr.bf16.mxu0 %v1063_v0 }
  0x42   :  { %903 = vmatprep.subr.bf16.mxu1 %v1068_v1 }
  0x43   :  { %443 = vmatmul.mubr.bf16.vlgmr.msra.gmra.mxu0 %v1007_v38 }
  0x44   :  { %484 = vmatmul.mubr.bf16.vlgmr.msra.gmra.mxu1 %v1010_v39  ;;  %882 = vmatpush3.bf16.msra.mxu0 %v1074_v2 }
  0x45   :  { %904 = vmatpush3.bf16.msra.mxu1 %v1080_v3  ;;  %883 = vmatprep.subr.bf16.mxu0 %v1086_v4 }
  0x46   :  { %905 = vmatprep.subr.bf16.mxu1 %v1092_v5  ;;  %548 = vmatprep.mubr.bf16.mxu0 %v1015_v40 }
  0x47   :  { %589 = vmatprep.mubr.bf16.mxu1 %v1018_v41 }
  0x48   :  { %884 = vmatpush3.bf16.msra.mxu0 %v1098_v6 }
  0x49   :  { %906 = vmatpush3.bf16.msra.mxu1 %v1104_v7  ;;  %885 = vmatprep.subr.bf16.mxu0 %v1110_v8 }
  0x4a   :  { %907 = vmatprep.subr.bf16.mxu1 %v1116_v9 }
  0x4c   :  { %886 = vmatpush3.bf16.msra.mxu0 %v1122_v10 }
  0x4d   :  { %908 = vmatpush3.bf16.msra.mxu1 %v1128_v11  ;;  %887 = vmatprep.subr.bf16.mxu0 %v1134_v12 }
  0x4e   :  { %909 = vmatprep.subr.bf16.mxu1 %v1140_v13 }
  0x50   :  { %888 = vmatpush3.bf16.msra.mxu0 %v1146_v14 }
  0x51   :  { %910 = vmatpush3.bf16.msra.mxu1 %v1152_v15  ;;  %889 = vmatprep.subr.bf16.mxu0 %v1158_v16 }
  0x52   :  { %911 = vmatprep.subr.bf16.mxu1 %v1164_v17 }
  0x54   :  { %890 = vmatpush3.bf16.msra.mxu0 %v1170_v18 }
  0x55   :  { %912 = vmatpush3.bf16.msra.mxu1 %v1176_v19  ;;  %891 = vmatprep.subr.bf16.mxu0 %v1182_v20 }
  0x56   :  { %913 = vmatprep.subr.bf16.mxu1 %v1188_v21 }
  0x58   :  { %892 = vmatpush3.bf16.msra.mxu0 %v1194_v22 }
  0x59   :  { %914 = vmatpush3.bf16.msra.mxu1 %v1200_v23  ;;  %893 = vmatprep.subr.bf16.mxu0 %v1206_v24 }
  0x5a   :  { %915 = vmatprep.subr.bf16.mxu1 %v1212_v25 }
  0x5c   :  { %894 = vmatpush3.bf16.msra.mxu0 %v1218_v26 }
  0x5d   :  { %916 = vmatpush3.bf16.msra.mxu1 %v1224_v27  ;;  %895 = vmatprep.subr.bf16.mxu0 %v1230_v28 }
  0x5e   :  { %917 = vmatprep.subr.bf16.mxu1 %v1236_v29 }
  0x60   :  { %896 = vmatpush3.bf16.msra.mxu0 %v1242_v30 }
  0x61   :  { %918 = vmatpush3.bf16.msra.mxu1 %v1248_v31  ;;  %925 = vmatprep.subr.bf16.mxu0 %v1063_v0 }
  0x62   :  { %947 = vmatprep.subr.bf16.mxu1 %v1068_v1 }
  0x63   :  { %549 = vmatmul.mubr.bf16.vlgmr.msra.gmra.mxu0 %v1013_v42 }
  0x64   :  { %590 = vmatmul.mubr.bf16.vlgmr.msra.gmra.mxu1 %v1016_v43  ;;  %926 = vmatpush3.bf16.msra.mxu0 %v1074_v2  ;;  %v783_v43 = vld [vmem:[%s1407_s5] ss:$0 sm:$0xff] }
  0x65   :  { %948 = vmatpush3.bf16.msra.mxu1 %v1080_v3  ;;  %927 = vmatprep.subr.bf16.mxu0 %v1086_v4 }
  0x66   :  { %949 = vmatprep.subr.bf16.mxu1 %v1092_v5  ;;  %654 = vmatprep.mubr.bf16.mxu0 %v1021_v44 }
  0x67   :  { %695 = vmatprep.mubr.bf16.mxu1 %v1024_v45 }
  0x68   :  { %928 = vmatpush3.bf16.msra.mxu0 %v1098_v6 }
  0x69   :  { %950 = vmatpush3.bf16.msra.mxu1 %v1104_v7  ;;  %929 = vmatprep.subr.bf16.mxu0 %v1110_v8 }
  0x6a   :  { %951 = vmatprep.subr.bf16.mxu1 %v1116_v9 }
  0x6c   :  { %930 = vmatpush3.bf16.msra.mxu0 %v1122_v10 }
  0x6d   :  { %952 = vmatpush3.bf16.msra.mxu1 %v1128_v11  ;;  %931 = vmatprep.subr.bf16.mxu0 %v1134_v12 }
  0x6e   :  { %953 = vmatprep.subr.bf16.mxu1 %v1140_v13 }
  0x70   :  { %932 = vmatpush3.bf16.msra.mxu0 %v1146_v14 }
  0x71   :  { %954 = vmatpush3.bf16.msra.mxu1 %v1152_v15  ;;  %933 = vmatprep.subr.bf16.mxu0 %v1158_v16 }
  0x72   :  { %955 = vmatprep.subr.bf16.mxu1 %v1164_v17 }
  0x74   :  { %934 = vmatpush3.bf16.msra.mxu0 %v1170_v18 }
  0x75   :  { %956 = vmatpush3.bf16.msra.mxu1 %v1176_v19  ;;  %935 = vmatprep.subr.bf16.mxu0 %v1182_v20 }
  0x76   :  { %957 = vmatprep.subr.bf16.mxu1 %v1188_v21 }
  0x78   :  { %936 = vmatpush3.bf16.msra.mxu0 %v1194_v22 }
  0x79   :  { %958 = vmatpush3.bf16.msra.mxu1 %v1200_v23  ;;  %937 = vmatprep.subr.bf16.mxu0 %v1206_v24 }
  0x7a   :  { %959 = vmatprep.subr.bf16.mxu1 %v1212_v25 }
  0x7c   :  { %938 = vmatpush3.bf16.msra.mxu0 %v1218_v26 }
  0x7d   :  { %960 = vmatpush3.bf16.msra.mxu1 %v1224_v27  ;;  %939 = vmatprep.subr.bf16.mxu0 %v1230_v28 }
  0x7e   :  { %961 = vmatprep.subr.bf16.mxu1 %v1236_v29 }
  0x80   :  { %940 = vmatpush3.bf16.msra.mxu0 %v1242_v30 }
  0x81   :  { %962 = vmatpush3.bf16.msra.mxu1 %v1248_v31 }
  0x83   :  { %655 = vmatmul.mubr.bf16.vlgmr.msra.gmra.mxu0 %v1019_v46 }
  0x84   :  { %696 = vmatmul.mubr.bf16.vlgmr.msra.gmra.mxu1 %v1022_v47 }
  0xe3   :  { %v809_v48 = vpop.f32.mrf.mxu0 }
  0xe4   :  { %v831_v49 = vpop.f32.mrf.mxu1 }
  0xe5   :  { %v810_v50 = vpop.f32.mrf.mxu0 }
  0xe6   :  { %v832_v51 = vpop.f32.mrf.mxu1  ;;  %v811_v11 = vadd.f32 %v810_v50, %v809_v48 }
  0xe7   :  { %v812_v52 = vpop.f32.mrf.mxu0  ;;  %v833_v12 = vadd.f32 %v832_v51, %v831_v49 }
  0xe8   :  { %v834_v53 = vpop.f32.mrf.mxu1 }
  0xe9   :  { %v813_v54 = vpop.f32.mrf.mxu0  ;;  %v380_v24 = vadd.f32 %v833_v12, %v811_v11 }
  0xea   :  { %v835_v55 = vpop.f32.mrf.mxu1  ;;  %v814_v25 = vadd.f32 %v813_v54, %v812_v52 }
  0xeb   :  { %v836_v26 = vadd.f32 %v835_v55, %v834_v53 }
  0xed   :  { %v383_v39 = vadd.f32 %v836_v26, %v814_v25 }
 0x103   :  { %v853_v56 = vpop.f32.mrf.mxu0 }
 0x104   :  { %v875_v57 = vpop.f32.mrf.mxu1 }
 0x105   :  { %v854_v58 = vpop.f32.mrf.mxu0 }
 0x106   :  { %v876_v59 = vpop.f32.mrf.mxu1  ;;  %v855_v8 = vadd.f32 %v854_v58, %v853_v56 }
 0x107   :  { %v856_v60 = vpop.f32.mrf.mxu0  ;;  %v877_v9 = vadd.f32 %v876_v59, %v875_v57 }
 0x108   :  { %v878_v61 = vpop.f32.mrf.mxu1 }
 0x109   :  { %v857_v62 = vpop.f32.mrf.mxu0  ;;  %v486_v19 = vadd.f32 %v877_v9, %v855_v8 }
 0x10a   :  { %v879_v63 = vpop.f32.mrf.mxu1  ;;  %v858_v20 = vadd.f32 %v857_v62, %v856_v60 }
 0x10b   :  { %v880_v21 = vadd.f32 %v879_v63, %v878_v61  ;;  %v704_v35 = vmax.f32 %v380_v24, %v486_v19 }
 0x10d   :  { %v489_v36 = vadd.f32 %v880_v21, %v858_v20 }
 0x10f   :  { %v705_v44 = vmax.f32 %v383_v39, %v489_v36 }
 0x123   :  { %v897_v0 = vpop.f32.mrf.mxu0 }
 0x124   :  { %v919_v1 = vpop.f32.mrf.mxu1 }
 0x125   :  { %v898_v2 = vpop.f32.mrf.mxu0 }
 0x126   :  { %v920_v3 = vpop.f32.mrf.mxu1  ;;  %v899_v14 = vadd.f32 %v898_v2, %v897_v0 }
 0x127   :  { %v900_v4 = vpop.f32.mrf.mxu0  ;;  %v921_v15 = vadd.f32 %v920_v3, %v919_v1 }
 0x128   :  { %v922_v5 = vpop.f32.mrf.mxu1 }
 0x129   :  { %v901_v6 = vpop.f32.mrf.mxu0  ;;  %v592_v28 = vadd.f32 %v921_v15, %v899_v14 }
 0x12a   :  { %v923_v7 = vpop.f32.mrf.mxu1  ;;  %v902_v29 = vadd.f32 %v901_v6, %v900_v4 }
 0x12b   :  { %v924_v30 = vadd.f32 %v923_v7, %v922_v5 }
 0x12d   :  { %v595_v40 = vadd.f32 %v924_v30, %v902_v29 }
 0x143   :  { %v941_v10 = vpop.f32.mrf.mxu0 }
 0x144   :  { %v963_v13 = vpop.f32.mrf.mxu1 }
 0x145   :  { %v942_v16 = vpop.f32.mrf.mxu0 }
 0x146   :  { %v943_v17 = vadd.f32 %v942_v16, %v941_v10  ;;  %v964_v18 = vpop.f32.mrf.mxu1 }
 0x147   :  { %v965_v22 = vadd.f32 %v964_v18, %v963_v13  ;;  %v944_v23 = vpop.f32.mrf.mxu0 }
 0x148   :  { %v966_v27 = vpop.f32.mrf.mxu1 }
 0x149   :  { %v698_v31 = vadd.f32 %v965_v22, %v943_v17  ;;  %v945_v32 = vpop.f32.mrf.mxu0 }
 0x14a   :  { %v946_v33 = vadd.f32 %v945_v32, %v944_v23  ;;  %v967_v34 = vpop.f32.mrf.mxu1 }
 0x14b   :  { %v706_v37 = vmax.f32 %v592_v28, %v698_v31  ;;  %v968_v38 = vadd.f32 %v967_v34, %v966_v27 }
 0x14d   :  { %v708_v41 = vmax.f32 %v704_v35, %v706_v37  ;;  %v701_v42 = vadd.f32 %v968_v38, %v946_v33 }
 0x14f   :  { %v707_v45 = vmax.f32 %v595_v40, %v701_v42  ;;  %v717_v46 = vadd.f32 %v783_v43, %v708_v41 }
 0x151   :  { %v709_v47 = vmax.f32 %v705_v44, %v707_v45  ;;  %v719_v49 = vmax.f32 %v717_v46, 0.0 }
 0x153   :  { %v718_v48 = vadd.f32 %v783_v43, %v709_v47 }
 0x155   :  { %v720_v50 = vmax.f32 %v718_v48, 0.0 }
 0x157   :  { %v791_v51 = vpack.c.bf16 %v720_v50, %v719_v49 }
 0x159   :  { %792 = vst [vmem:[%s1408_s6] sm:$0xff] %v791_v51  }

// kernel: pg_net_forward.6
= control target key start
LH: loop header
LB: loop body
LE: loop exit
PB: predicated region body
PF: predicated region fallthrough
CT: control target
= control target key end

     0   :  { %v690_v33 = vmov 0.0   ;;  %vm691_vm0 = vmmov 0   ;;  %s853_s1 = inlined_call_operand.vmem [shape: bf16[640,128], index: 1, kind: input, shape index: {}]   ;;  %s854_s0 = inlined_call_operand.vmem [shape: bf16[16,640], index: 0, kind: input, shape index: {}]   ;;  %s855_s2 = inlined_call_operand.vmem [shape: f32[1,128], index: 2, kind: input, shape index: {}]   ;;  %s856_s3 = inlined_call_operand.vmem [shape: bf16[16,128], index: 3, kind: output, shape index: {}]  }
   0x1   :  { %v643_v0 = vld [vmem:[%s853_s1 + $0x78] sm:$0xff]   ;;  %v647_v4 = vld [vmem:[%s853_s1 + $0x70] sm:$0xff]   ;;  %v651_v8 = vld [vmem:[%s853_s1 + $0x68] sm:$0xff]  }
   0x2   :  { %v644_v1 = vld [vmem:[%s853_s1 + $0x38] sm:$0xff]   ;;  %568 = vmatprep.subr.bf16.mxu0 %v643_v0  ;;  %v648_v5 = vld [vmem:[%s853_s1 + $0x30] sm:$0xff]   ;;  %v652_v9 = vld [vmem:[%s853_s1 + $0x28] sm:$0xff]  }
   0x3   :  { %v645_v2 = vld [vmem:[%s853_s1 + $0xf8] sm:$0xff]   ;;  %569 = vmatpush3.bf16.msra.mxu0 %v644_v1  ;;  %v649_v6 = vld [vmem:[%s853_s1 + $0xf0] sm:$0xff]   ;;  %v653_v10 = vld [vmem:[%s853_s1 + $0xe8] sm:$0xff]  }
   0x4   :  { %v646_v3 = vld [vmem:[%s853_s1 + $0xb8] sm:$0xff]   ;;  %590 = vmatprep.subr.bf16.mxu1 %v645_v2  ;;  %570 = vmatprep.subr.bf16.mxu0 %v647_v4  ;;  %v650_v7 = vld [vmem:[%s853_s1 + $0xb0] sm:$0xff]   ;;  %v654_v11 = vld [vmem:[%s853_s1 + $0xa8] sm:$0xff]  }
   0x5   :  { %591 = vmatpush3.bf16.msra.mxu1 %v646_v3  ;;  %v655_v12 = vld [vmem:[%s853_s1 + $0x60] sm:$0xff]   ;;  %v659_v16 = vld [vmem:[%s853_s1 + $0x58] sm:$0xff]   ;;  %v663_v20 = vld [vmem:[%s853_s1 + $0x50] sm:$0xff]  }
   0x6   :  { %592 = vmatprep.subr.bf16.mxu1 %v649_v6  ;;  %v656_v13 = vld [vmem:[%s853_s1 + $0x20] sm:$0xff]   ;;  %v660_v17 = vld [vmem:[%s853_s1 + $0x18] sm:$0xff]   ;;  %v664_v21 = vld [vmem:[%s853_s1 + $0x10] sm:$0xff]  }
   0x7   :  { %571 = vmatpush3.bf16.msra.mxu0 %v648_v5  ;;  %v657_v14 = vld [vmem:[%s853_s1 + $0xe0] sm:$0xff]   ;;  %v661_v18 = vld [vmem:[%s853_s1 + $0xd8] sm:$0xff]   ;;  %v665_v22 = vld [vmem:[%s853_s1 + $0xd0] sm:$0xff]  }
   0x8   :  { %572 = vmatprep.subr.bf16.mxu0 %v651_v8  ;;  %v658_v15 = vld [vmem:[%s853_s1 + $0xa0] sm:$0xff]   ;;  %v662_v19 = vld [vmem:[%s853_s1 + $0x98] sm:$0xff]   ;;  %v666_v23 = vld [vmem:[%s853_s1 + $0x90] sm:$0xff]  }
   0x9   :  { %593 = vmatpush3.bf16.msra.mxu1 %v650_v7  ;;  %v667_v24 = vld [vmem:[%s853_s1 + $0x48] sm:$0xff]   ;;  %v671_v28 = vld [vmem:[%s853_s1 + $0x40] sm:$0xff]   ;;  %v681_v37 = vld [vmem:[%s853_s1 + $0x138] sm:$0xff]  }
   0xa   :  { %594 = vmatprep.subr.bf16.mxu1 %v653_v10  ;;  %v668_v25 = vld [vmem:[%s853_s1 + $0x8] sm:$0xff]   ;;  %v672_v29 = vld [vmem:[%s853_s1] sm:$0xff]   ;;  %v682_v38 = vld [vmem:[%s853_s1 + $0x130] sm:$0xff]  }
   0xb   :  { %573 = vmatpush3.bf16.msra.mxu0 %v652_v9  ;;  %v669_v26 = vld [vmem:[%s853_s1 + $0xc8] sm:$0xff]   ;;  %v673_v30 = vld [vmem:[%s853_s1 + $0xc0] sm:$0xff]   ;;  %v685_v41 = vld [vmem:[%s853_s1 + $0x118] sm:$0xff]  }
   0xc   :  { %574 = vmatprep.subr.bf16.mxu0 %v655_v12  ;;  %v670_v27 = vld [vmem:[%s853_s1 + $0x88] sm:$0xff]   ;;  %v674_v31 = vld [vmem:[%s854_s0] ss:$20 sps:$4 sm:$0xff]   ;;  %v676_v32 = vld [vmem:[%s854_s0 + $0x4] ss:$20 sps:$4 sm:$0xff]  }
   0xd   :  { %595 = vmatpush3.bf16.msra.mxu1 %v654_v11  ;;  %v677_v34 = vld [vmem:[%s853_s1 + $0x80] sm:$0xff]   ;;  %406 = vmatprep.mubr.bf16.mxu0 %v676_v32  ;;  %v678_v35 = vld [vmem:[%s854_s0 + $0x8] ss:$20 sps:$4 sm:$0xff]   ;;  %v686_v42 = vld [vmem:[%s853_s1 + $0x110] sm:$0xff]  }
   0xe   :  { %596 = vmatprep.subr.bf16.mxu1 %v657_v14  ;;  %v680_v36 = vld [vmem:[%s854_s0 + $0xc] ss:$20 sps:$4 sm:$0xff]   ;;  %v689_v45 = vld [vmem:[%s854_s0 + $0x10] ss:$20 sps:$4 sm:$0xff]  }
   0xf   :  { %575 = vmatpush3.bf16.msra.mxu0 %v656_v13  ;;  %447 = vmatprep.mubr.bf16.mxu1 %v680_v36  ;;  %v683_v39 = vld [vmem:[%s853_s1 + $0x128] sm:$0xff]   ;;  %v684_v40 = vld [vmem:[%s853_s1 + $0x120] sm:$0xff]  }
  0x10   :  { %576 = vmatprep.subr.bf16.mxu0 %v659_v16  ;;  %v687_v43 = vld [vmem:[%s853_s1 + $0x108] sm:$0xff]   ;;  %v688_v44 = vld [vmem:[%s853_s1 + $0x100] sm:$0xff]  }
  0x11   :  { %597 = vmatpush3.bf16.msra.mxu1 %v658_v15  ;;  %v513_v54 = vld [vmem:[%s855_s2] ss:$0 sm:$0xff] }
  0x12   :  { %598 = vmatprep.subr.bf16.mxu1 %v661_v18 }
  0x13   :  { %577 = vmatpush3.bf16.msra.mxu0 %v660_v17 }
  0x14   :  { %578 = vmatprep.subr.bf16.mxu0 %v663_v20 }
  0x15   :  { %599 = vmatpush3.bf16.msra.mxu1 %v662_v19 }
  0x16   :  { %600 = vmatprep.subr.bf16.mxu1 %v665_v22 }
  0x17   :  { %579 = vmatpush3.bf16.msra.mxu0 %v664_v21 }
  0x18   :  { %580 = vmatprep.subr.bf16.mxu0 %v667_v24 }
  0x19   :  { %601 = vmatpush3.bf16.msra.mxu1 %v666_v23 }
  0x1a   :  { %602 = vmatprep.subr.bf16.mxu1 %v669_v26 }
  0x1b   :  { %581 = vmatpush3.bf16.msra.mxu0 %v668_v25 }
  0x1c   :  { %582 = vmatprep.subr.bf16.mxu0 %v671_v28 }
  0x1d   :  { %603 = vmatpush3.bf16.msra.mxu1 %v670_v27 }
  0x1e   :  { %604 = vmatprep.subr.bf16.mxu1 %v673_v30 }
  0x1f   :  { %583 = vmatpush3.bf16.msra.mxu0 %v672_v29 }
  0x20   :  { %621 = vmatprep.subr.bf16.mxu0 %v690_v33 }
  0x21   :  { %605 = vmatpush3.bf16.msra.mxu1 %v677_v34 }
  0x22   :  { %407 = vmatmul.mubr.bf16.vlgmr.msra.gmra.mxu0 %v674_v31 }
  0x23   :  { %637 = vmatprep.mubr.msk.bf16.mxu0 %vm691_vm0, %v690_v33  ;;  %622 = vmatpush3.bf16.msra.mxu0 %v681_v37 }
  0x24   :  { %448 = vmatmul.mubr.bf16.vlgmr.msra.gmra.mxu1 %v678_v35  ;;  %623 = vmatprep.subr.bf16.mxu0 %v690_v33 }
  0x27   :  { %624 = vmatpush3.bf16.msra.mxu0 %v682_v38 }
  0x28   :  { %625 = vmatprep.subr.bf16.mxu0 %v690_v33 }
  0x2b   :  { %626 = vmatpush3.bf16.msra.mxu0 %v683_v39 }
  0x2c   :  { %627 = vmatprep.subr.bf16.mxu0 %v690_v33 }
  0x2f   :  { %628 = vmatpush3.bf16.msra.mxu0 %v684_v40 }
  0x30   :  { %629 = vmatprep.subr.bf16.mxu0 %v690_v33 }
  0x33   :  { %630 = vmatpush3.bf16.msra.mxu0 %v685_v41 }
  0x34   :  { %631 = vmatprep.subr.bf16.mxu0 %v690_v33 }
  0x37   :  { %632 = vmatpush3.bf16.msra.mxu0 %v686_v42 }
  0x38   :  { %633 = vmatprep.subr.bf16.mxu0 %v690_v33 }
  0x3b   :  { %634 = vmatpush3.bf16.msra.mxu0 %v687_v43 }
  0x3c   :  { %635 = vmatprep.subr.bf16.mxu0 %v690_v33 }
  0x3f   :  { %636 = vmatpush3.bf16.msra.mxu0 %v688_v44 }
  0x42   :  { %638 = vmatmul.mubr.bf16.vlgmr.msra.gmra.mxu0 %v689_v45 }
  0xe2   :  { %v584_v46 = vpop.f32.mrf.mxu0 }
  0xe4   :  { %v585_v47 = vpop.f32.mrf.mxu0  ;;  %v606_v48 = vpop.f32.mrf.mxu1 }
  0xe5   :  { %v586_v53 = vadd.f32 %v585_v47, %v584_v46 }
  0xe6   :  { %v587_v49 = vpop.f32.mrf.mxu0  ;;  %v607_v50 = vpop.f32.mrf.mxu1 }
  0xe7   :  { %v409_v57 = vadd.f32 %v586_v53, %v513_v54  ;;  %v608_v58 = vadd.f32 %v607_v50, %v606_v48 }
  0xe8   :  { %v588_v51 = vpop.f32.mrf.mxu0  ;;  %v609_v52 = vpop.f32.mrf.mxu1 }
  0xe9   :  { %v589_v55 = vadd.f32 %v588_v51, %v587_v49  ;;  %v450_v62 = vadd.f32 %v608_v58, %v409_v57 }
  0xea   :  { %v610_v56 = vpop.f32.mrf.mxu1 }
  0xeb   :  { %v412_v59 = vadd.f32 %v589_v55, %v513_v54  ;;  %v611_v60 = vadd.f32 %v610_v56, %v609_v52 }
  0xed   :  { %v453_v1 = vadd.f32 %v611_v60, %v412_v59 }
 0x102   :  { %v490_v61 = vpop.f32.mrf.mxu0 }
 0x103   :  { %v491_v0 = vadd.f32 %v490_v61, %v450_v62 }
 0x104   :  { %v639_v63 = vpop.f32.mrf.mxu0 }
 0x105   :  { %v497_v5 = vmax.f32 %v491_v0, 0.0 }
 0x106   :  { %v493_v2 = vpop.f32.mrf.mxu0 }
 0x107   :  { %v494_v3 = vadd.f32 %v493_v2, %v453_v1 }
 0x108   :  { %v640_v4 = vpop.f32.mrf.mxu0 }
 0x109   :  { %v498_v6 = vmax.f32 %v494_v3, 0.0 }
 0x10b   :  { %v566_v7 = vpack.c.bf16 %v498_v6, %v497_v5 }
 0x10d   :  { %567 = vst [vmem:[%s856_s3] sm:$0xff] %v566_v7  }

// kernel: pg_net_forward.7
= control target key start
LH: loop header
LB: loop body
LE: loop exit
PB: predicated region body
PF: predicated region fallthrough
CT: control target
= control target key end

     0   :  { %s3610_s1 = inlined_call_operand.vmem [shape: bf16[256,1024], index: 1, kind: input, shape index: {}]   ;;  %s3611_s0 = inlined_call_operand.vmem [shape: bf16[16,256], index: 0, kind: input, shape index: {}]   ;;  %s3612_s3 = inlined_call_operand.vmem [shape: bf16[1024,256], index: 3, kind: input, shape index: {}]   ;;  %s3613_s2 = inlined_call_operand.vmem [shape: f32[1,1024], index: 2, kind: input, shape index: {}]   ;;  %s3614_s5 = inlined_call_operand.vmem [shape: bf16[256,128], index: 5, kind: input, shape index: {}]   ;;  %s3615_s4 = inlined_call_operand.vmem [shape: f32[1,256], index: 4, kind: input, shape index: {}]   ;;  %s3616_s6 = inlined_call_operand.vmem [shape: f32[1,128], index: 6, kind: input, shape index: {}]   ;;  %s3617_s7 = inlined_call_operand.vmem [shape: f32[16,128], index: 7, kind: output, shape index: {}]  }
   0x1   :  { %v85_v0 = vld [vmem:[%s3610_s1 + $0x1c0] sm:$0xff]  ;;  %v86_v2 = vld [vmem:[%s3610_s1 + $0x1c8] sm:$0xff] }
   0x2   :  { %v89_v1 = vld [vmem:[%s3610_s1 + $0x1e0] sm:$0xff]  ;;  %v90_v4 = vld [vmem:[%s3610_s1 + $0x1e8] sm:$0xff] }
   0x3   :  { %v2244_v3 = vcombine.high %v85_v0, %v89_v1  ;;  %v2243_v5 = vcombine.low %v85_v0, %v89_v1  ;;  %v77_v6 = vld [vmem:[%s3610_s1 + $0x180] sm:$0xff]  ;;  %v2246_v8 = vcombine.high %v86_v2, %v90_v4  ;;  %v2245_v9 = vcombine.low %v86_v2, %v90_v4  ;;  %v78_v11 = vld [vmem:[%s3610_s1 + $0x188] sm:$0xff] }
   0x4   :  { %v81_v7 = vld [vmem:[%s3610_s1 + $0x1a0] sm:$0xff]  ;;  %v82_v12 = vld [vmem:[%s3610_s1 + $0x1a8] sm:$0xff] }
   0x5   :  { %v2236_v10 = vcombine.high %v77_v6, %v81_v7  ;;  %v69_v13 = vld [vmem:[%s3610_s1 + $0x140] sm:$0xff]  ;;  %849 = vmatprep.subr.bf16.mxu0 %v2244_v3  ;;  %v2238_v14 = vcombine.high %v78_v11, %v82_v12  ;;  %v70_v16 = vld [vmem:[%s3610_s1 + $0x148] sm:$0xff]  ;;  %892 = vmatprep.subr.bf16.mxu1 %v2246_v8  ;;  %v2235_v18 = vcombine.low %v77_v6, %v81_v7 }
   0x6   :  { %v73_v15 = vld [vmem:[%s3610_s1 + $0x160] sm:$0xff]  ;;  %v74_v17 = vld [vmem:[%s3610_s1 + $0x168] sm:$0xff]  ;;  %850 = vmatpush1.bf16.msra.mxu0 %v2243_v5  ;;  %893 = vmatpush1.bf16.msra.mxu1 %v2245_v9  ;;  %v2237_v19 = vcombine.low %v78_v11, %v82_v12 }
   0x7   :  { %851 = vmatprep.subr.bf16.mxu0 %v2236_v10  ;;  %v2228_v20 = vcombine.high %v69_v13, %v73_v15  ;;  %894 = vmatprep.subr.bf16.mxu1 %v2238_v14  ;;  %v2230_v21 = vcombine.high %v70_v16, %v74_v17  ;;  %v61_v22 = vld [vmem:[%s3610_s1 + $0x100] sm:$0xff]  ;;  %v62_v24 = vld [vmem:[%s3610_s1 + $0x108] sm:$0xff]  ;;  %v2227_v26 = vcombine.low %v69_v13, %v73_v15 }
   0x8   :  { %v65_v23 = vld [vmem:[%s3610_s1 + $0x120] sm:$0xff]  ;;  %v66_v25 = vld [vmem:[%s3610_s1 + $0x128] sm:$0xff]  ;;  %v2229_v27 = vcombine.low %v70_v16, %v74_v17 }
   0x9   :  { %v2220_v28 = vcombine.high %v61_v22, %v65_v23  ;;  %v2222_v29 = vcombine.high %v62_v24, %v66_v25  ;;  %v53_v30 = vld [vmem:[%s3610_s1 + $0xc0] sm:$0xff]  ;;  %v54_v32 = vld [vmem:[%s3610_s1 + $0xc8] sm:$0xff]  ;;  %v2219_v34 = vcombine.low %v61_v22, %v65_v23  ;;  %v2221_v35 = vcombine.low %v62_v24, %v66_v25 }
   0xa   :  { %852 = vmatpush1.bf16.msra.mxu0 %v2235_v18  ;;  %895 = vmatpush1.bf16.msra.mxu1 %v2237_v19  ;;  %v57_v31 = vld [vmem:[%s3610_s1 + $0xe0] sm:$0xff]  ;;  %v58_v33 = vld [vmem:[%s3610_s1 + $0xe8] sm:$0xff] }
   0xb   :  { %853 = vmatprep.subr.bf16.mxu0 %v2228_v20  ;;  %896 = vmatprep.subr.bf16.mxu1 %v2230_v21  ;;  %v2212_v36 = vcombine.high %v53_v30, %v57_v31  ;;  %v2214_v37 = vcombine.high %v54_v32, %v58_v33  ;;  %v45_v38 = vld [vmem:[%s3610_s1 + $0x80] sm:$0xff]  ;;  %v46_v40 = vld [vmem:[%s3610_s1 + $0x88] sm:$0xff]  ;;  %v2211_v42 = vcombine.low %v53_v30, %v57_v31 }
   0xc   :  { %v49_v39 = vld [vmem:[%s3610_s1 + $0xa0] sm:$0xff]  ;;  %v50_v41 = vld [vmem:[%s3610_s1 + $0xa8] sm:$0xff]  ;;  %v2213_v43 = vcombine.low %v54_v32, %v58_v33 }
   0xd   :  { %v2204_v44 = vcombine.high %v45_v38, %v49_v39  ;;  %v2206_v45 = vcombine.high %v46_v40, %v50_v41  ;;  %v37_v46 = vld [vmem:[%s3610_s1 + $0x40] sm:$0xff]  ;;  %v38_v48 = vld [vmem:[%s3610_s1 + $0x48] sm:$0xff]  ;;  %v2203_v50 = vcombine.low %v45_v38, %v49_v39  ;;  %v2205_v51 = vcombine.low %v46_v40, %v50_v41 }
   0xe   :  { %854 = vmatpush1.bf16.msra.mxu0 %v2227_v26  ;;  %897 = vmatpush1.bf16.msra.mxu1 %v2229_v27  ;;  %v41_v47 = vld [vmem:[%s3610_s1 + $0x60] sm:$0xff]  ;;  %v42_v49 = vld [vmem:[%s3610_s1 + $0x68] sm:$0xff] }
   0xf   :  { %855 = vmatprep.subr.bf16.mxu0 %v2220_v28  ;;  %898 = vmatprep.subr.bf16.mxu1 %v2222_v29  ;;  %v2196_v52 = vcombine.high %v37_v46, %v41_v47  ;;  %v2198_v53 = vcombine.high %v38_v48, %v42_v49  ;;  %v29_v54 = vld [vmem:[%s3610_s1] sm:$0xff]  ;;  %v30_v57 = vld [vmem:[%s3610_s1 + $0x8] sm:$0xff]  ;;  %v2195_v59 = vcombine.low %v37_v46, %v41_v47 }
  0x10   :  { %v33_v55 = vld [vmem:[%s3610_s1 + $0x20] sm:$0xff]  ;;  %v34_v58 = vld [vmem:[%s3610_s1 + $0x28] sm:$0xff]  ;;  %v2197_v60 = vcombine.low %v38_v48, %v42_v49 }
  0x11   :  { %v2826_v56 = vld [vmem:[%s3611_s0 + $0x4] ss:$8 sps:$4 sm:$0xff]   ;;  %v2188_v61 = vcombine.high %v29_v54, %v33_v55  ;;  %v2190_v62 = vcombine.high %v30_v57, %v34_v58  ;;  %v2187_v3 = vcombine.low %v29_v54, %v33_v55  ;;  %v2189_v4 = vcombine.low %v30_v57, %v34_v58 }
  0x12   :  { %856 = vmatpush1.bf16.msra.mxu0 %v2219_v34  ;;  %899 = vmatpush1.bf16.msra.mxu1 %v2221_v35  ;;  %v149_v63 = vld [vmem:[%s3610_s1 + $0x3c0] sm:$0xff]  ;;  %v150_v1 = vld [vmem:[%s3610_s1 + $0x3c8] sm:$0xff] }
  0x13   :  { %857 = vmatprep.subr.bf16.mxu0 %v2212_v36  ;;  %900 = vmatprep.subr.bf16.mxu1 %v2214_v37  ;;  %v153_v0 = vld [vmem:[%s3610_s1 + $0x3e0] sm:$0xff]  ;;  %v154_v2 = vld [vmem:[%s3610_s1 + $0x3e8] sm:$0xff] }
  0x14   :  { %881 = vmatprep.mubr.bf16.mxu0 %v2826_v56  ;;  %924 = vmatprep.mubr.bf16.mxu1 %v2826_v56  ;;  %v2308_v5 = vcombine.high %v149_v63, %v153_v0  ;;  %v2310_v6 = vcombine.high %v150_v1, %v154_v2  ;;  %v141_v7 = vld [vmem:[%s3610_s1 + $0x380] sm:$0xff]  ;;  %v142_v9 = vld [vmem:[%s3610_s1 + $0x388] sm:$0xff]  ;;  %v2307_v11 = vcombine.low %v149_v63, %v153_v0  ;;  %v87_v0 = vld [vmem:[%s3610_s1 + $0x1d0] sm:$0xff] }
  0x15   :  { %v145_v8 = vld [vmem:[%s3610_s1 + $0x3a0] sm:$0xff]  ;;  %v146_v10 = vld [vmem:[%s3610_s1 + $0x3a8] sm:$0xff]  ;;  %v2309_v12 = vcombine.low %v150_v1, %v154_v2  ;;  %v91_v1 = vld [vmem:[%s3610_s1 + $0x1f0] sm:$0xff] }
  0x16   :  { %858 = vmatpush1.bf16.msra.mxu0 %v2211_v42  ;;  %901 = vmatpush1.bf16.msra.mxu1 %v2213_v43  ;;  %v2300_v13 = vcombine.high %v141_v7, %v145_v8  ;;  %v2302_v14 = vcombine.high %v142_v9, %v146_v10  ;;  %v133_v15 = vld [vmem:[%s3610_s1 + $0x340] sm:$0xff]  ;;  %v134_v17 = vld [vmem:[%s3610_s1 + $0x348] sm:$0xff]  ;;  %v2299_v19 = vcombine.low %v141_v7, %v145_v8  ;;  %v88_v2 = vld [vmem:[%s3610_s1 + $0x1d8] sm:$0xff] }
  0x17   :  { %859 = vmatprep.subr.bf16.mxu0 %v2204_v44  ;;  %902 = vmatprep.subr.bf16.mxu1 %v2206_v45  ;;  %v137_v16 = vld [vmem:[%s3610_s1 + $0x360] sm:$0xff]  ;;  %v138_v18 = vld [vmem:[%s3610_s1 + $0x368] sm:$0xff]  ;;  %v2301_v20 = vcombine.low %v142_v9, %v146_v10  ;;  %v2248_v7 = vcombine.high %v87_v0, %v91_v1  ;;  %v79_v9 = vld [vmem:[%s3610_s1 + $0x190] sm:$0xff] }
  0x18   :  { %v2292_v21 = vcombine.high %v133_v15, %v137_v16  ;;  %v2294_v22 = vcombine.high %v134_v17, %v138_v18  ;;  %v125_v23 = vld [vmem:[%s3610_s1 + $0x300] sm:$0xff]  ;;  %v126_v25 = vld [vmem:[%s3610_s1 + $0x308] sm:$0xff]  ;;  %v2291_v27 = vcombine.low %v133_v15, %v137_v16  ;;  %v2293_v28 = vcombine.low %v134_v17, %v138_v18  ;;  %v83_v10 = vld [vmem:[%s3610_s1 + $0x1b0] sm:$0xff] }
  0x19   :  { %v129_v24 = vld [vmem:[%s3610_s1 + $0x320] sm:$0xff]  ;;  %v130_v26 = vld [vmem:[%s3610_s1 + $0x328] sm:$0xff]  ;;  %v2240_v15 = vcombine.high %v79_v9, %v83_v10  ;;  %v71_v17 = vld [vmem:[%s3610_s1 + $0x150] sm:$0xff] }
  0x1a   :  { %860 = vmatpush1.bf16.msra.mxu0 %v2203_v50  ;;  %903 = vmatpush1.bf16.msra.mxu1 %v2205_v51  ;;  %v2284_v29 = vcombine.high %v125_v23, %v129_v24  ;;  %v2286_v30 = vcombine.high %v126_v25, %v130_v26  ;;  %v117_v31 = vld [vmem:[%s3610_s1 + $0x2c0] sm:$0xff]  ;;  %v118_v33 = vld [vmem:[%s3610_s1 + $0x2c8] sm:$0xff]  ;;  %v2283_v35 = vcombine.low %v125_v23, %v129_v24  ;;  %v75_v18 = vld [vmem:[%s3610_s1 + $0x170] sm:$0xff] }
  0x1b   :  { %861 = vmatprep.subr.bf16.mxu0 %v2196_v52  ;;  %904 = vmatprep.subr.bf16.mxu1 %v2198_v53  ;;  %v121_v32 = vld [vmem:[%s3610_s1 + $0x2e0] sm:$0xff]  ;;  %v122_v34 = vld [vmem:[%s3610_s1 + $0x2e8] sm:$0xff]  ;;  %v2285_v36 = vcombine.low %v126_v25, %v130_v26  ;;  %v2232_v23 = vcombine.high %v71_v17, %v75_v18  ;;  %v63_v25 = vld [vmem:[%s3610_s1 + $0x110] sm:$0xff] }
  0x1c   :  { %v2276_v37 = vcombine.high %v117_v31, %v121_v32  ;;  %v2278_v38 = vcombine.high %v118_v33, %v122_v34  ;;  %v109_v39 = vld [vmem:[%s3610_s1 + $0x280] sm:$0xff]  ;;  %v110_v41 = vld [vmem:[%s3610_s1 + $0x288] sm:$0xff]  ;;  %v2275_v43 = vcombine.low %v117_v31, %v121_v32  ;;  %v2277_v44 = vcombine.low %v118_v33, %v122_v34  ;;  %v67_v26 = vld [vmem:[%s3610_s1 + $0x130] sm:$0xff] }
  0x1d   :  { %v113_v40 = vld [vmem:[%s3610_s1 + $0x2a0] sm:$0xff]  ;;  %v114_v42 = vld [vmem:[%s3610_s1 + $0x2a8] sm:$0xff]  ;;  %v2224_v31 = vcombine.high %v63_v25, %v67_v26  ;;  %v55_v33 = vld [vmem:[%s3610_s1 + $0xd0] sm:$0xff] }
  0x1e   :  { %862 = vmatpush1.bf16.msra.mxu0 %v2195_v59  ;;  %905 = vmatpush1.bf16.msra.mxu1 %v2197_v60  ;;  %v2268_v45 = vcombine.high %v109_v39, %v113_v40  ;;  %v2270_v46 = vcombine.high %v110_v41, %v114_v42  ;;  %v101_v47 = vld [vmem:[%s3610_s1 + $0x240] sm:$0xff]  ;;  %v102_v49 = vld [vmem:[%s3610_s1 + $0x248] sm:$0xff]  ;;  %v2267_v51 = vcombine.low %v109_v39, %v113_v40  ;;  %v59_v34 = vld [vmem:[%s3610_s1 + $0xf0] sm:$0xff] }
  0x1f   :  { %863 = vmatprep.subr.bf16.mxu0 %v2188_v61  ;;  %906 = vmatprep.subr.bf16.mxu1 %v2190_v62  ;;  %v105_v48 = vld [vmem:[%s3610_s1 + $0x260] sm:$0xff]  ;;  %v106_v50 = vld [vmem:[%s3610_s1 + $0x268] sm:$0xff]  ;;  %v2269_v52 = vcombine.low %v110_v41, %v114_v42  ;;  %v47_v39 = vld [vmem:[%s3610_s1 + $0x90] sm:$0xff] }
  0x20   :  { %v2260_v53 = vcombine.high %v101_v47, %v105_v48  ;;  %v2262_v54 = vcombine.high %v102_v49, %v106_v50  ;;  %v93_v55 = vld [vmem:[%s3610_s1 + $0x200] sm:$0xff]  ;;  %v94_v58 = vld [vmem:[%s3610_s1 + $0x208] sm:$0xff]  ;;  %v2259_v60 = vcombine.low %v101_v47, %v105_v48  ;;  %v2261_v61 = vcombine.low %v102_v49, %v106_v50  ;;  %v51_v41 = vld [vmem:[%s3610_s1 + $0xb0] sm:$0xff] }
  0x21   :  { %v97_v57 = vld [vmem:[%s3610_s1 + $0x220] sm:$0xff]  ;;  %v98_v59 = vld [vmem:[%s3610_s1 + $0x228] sm:$0xff]  ;;  %v48_v42 = vld [vmem:[%s3610_s1 + $0x98] sm:$0xff]  ;;  %v2208_v48 = vcombine.high %v47_v39, %v51_v41 }
  0x22   :  { %864 = vmatpush1.bf16.msra.mxu0 %v2187_v3  ;;  %907 = vmatpush1.bf16.msra.mxu1 %v2189_v4  ;;  %v2252_v62 = vcombine.high %v93_v55, %v97_v57  ;;  %v2254_v63 = vcombine.high %v94_v58, %v98_v59  ;;  %v92_v3 = vld [vmem:[%s3610_s1 + $0x1f8] sm:$0xff]  ;;  %v2251_v4 = vcombine.low %v93_v55, %v97_v57 }
  0x23   :  { %865 = vmatprep.subr.bf16.mxu0 %v2308_v5  ;;  %908 = vmatprep.subr.bf16.mxu1 %v2310_v6  ;;  %v2253_v5 = vcombine.low %v94_v58, %v98_v59  ;;  %v2947_v6 = vld [vmem:[%s3611_s0] ss:$8 sps:$4 sm:$0xff]   ;;  %v2250_v8 = vcombine.high %v88_v2, %v92_v3  ;;  %v40_v49 = vld [vmem:[%s3610_s1 + $0x58] sm:$0xff] }
  0x24   :  { %v44_v50 = vld [vmem:[%s3610_s1 + $0x78] sm:$0xff] }
  0x25   :  { %v32_v58 = vld [vmem:[%s3610_s1 + $0x18] sm:$0xff] }
  0x26   :  { %866 = vmatpush2.bf16.msra.mxu0 %v2307_v11  ;;  %909 = vmatpush2.bf16.msra.mxu1 %v2309_v12  ;;  %v80_v11 = vld [vmem:[%s3610_s1 + $0x198] sm:$0xff] }
  0x27   :  { %867 = vmatprep.subr.bf16.mxu0 %v2300_v13  ;;  %910 = vmatprep.subr.bf16.mxu1 %v2302_v14  ;;  %v84_v12 = vld [vmem:[%s3610_s1 + $0x1b8] sm:$0xff]  ;;  %v2247_v13 = vcombine.low %v87_v0, %v91_v1  ;;  %v2249_v14 = vcombine.low %v88_v2, %v92_v3  ;;  %v2201_v0 = vcombine.low %v40_v49, %v44_v50 }
  0x28   :  { %v2242_v16 = vcombine.high %v80_v11, %v84_v12  ;;  %v36_v59 = vld [vmem:[%s3610_s1 + $0x38] sm:$0xff] }
  0x29   :  { %v152_v2 = vld [vmem:[%s3610_s1 + $0x3d8] sm:$0xff] }
  0x2a   :  { %868 = vmatpush2.bf16.msra.mxu0 %v2299_v19  ;;  %911 = vmatpush2.bf16.msra.mxu1 %v2301_v20  ;;  %v72_v19 = vld [vmem:[%s3610_s1 + $0x158] sm:$0xff] }
  0x2b   :  { %869 = vmatprep.subr.bf16.mxu0 %v2292_v21  ;;  %912 = vmatprep.subr.bf16.mxu1 %v2294_v22  ;;  %v76_v20 = vld [vmem:[%s3610_s1 + $0x178] sm:$0xff]  ;;  %v2239_v21 = vcombine.low %v79_v9, %v83_v10  ;;  %v2241_v22 = vcombine.low %v80_v11, %v84_v12  ;;  %v2193_v9 = vcombine.low %v32_v58, %v36_v59 }
  0x2c   :  { %v2234_v24 = vcombine.high %v72_v19, %v76_v20  ;;  %v156_v3 = vld [vmem:[%s3610_s1 + $0x3f8] sm:$0xff] }
  0x2d   :  { %v144_v11 = vld [vmem:[%s3610_s1 + $0x398] sm:$0xff] }
  0x2e   :  { %870 = vmatpush2.bf16.msra.mxu0 %v2291_v27  ;;  %913 = vmatpush2.bf16.msra.mxu1 %v2293_v28  ;;  %v64_v27 = vld [vmem:[%s3610_s1 + $0x118] sm:$0xff] }
  0x2f   :  { %871 = vmatprep.subr.bf16.mxu0 %v2284_v29  ;;  %914 = vmatprep.subr.bf16.mxu1 %v2286_v30  ;;  %v68_v28 = vld [vmem:[%s3610_s1 + $0x138] sm:$0xff]  ;;  %v2231_v29 = vcombine.low %v71_v17, %v75_v18  ;;  %v2233_v30 = vcombine.low %v72_v19, %v76_v20  ;;  %v2313_v17 = vcombine.low %v152_v2, %v156_v3 }
  0x30   :  { %v2226_v32 = vcombine.high %v64_v27, %v68_v28  ;;  %v148_v12 = vld [vmem:[%s3610_s1 + $0x3b8] sm:$0xff] }
  0x31   :  { %v136_v19 = vld [vmem:[%s3610_s1 + $0x358] sm:$0xff] }
  0x32   :  { %872 = vmatpush2.bf16.msra.mxu0 %v2283_v35  ;;  %915 = vmatpush2.bf16.msra.mxu1 %v2285_v36  ;;  %v60_v35 = vld [vmem:[%s3610_s1 + $0xf8] sm:$0xff]  ;;  %v2223_v36 = vcombine.low %v63_v25, %v67_v26  ;;  %v2305_v25 = vcombine.low %v144_v11, %v148_v12 }
  0x33   :  { %873 = vmatprep.subr.bf16.mxu0 %v2276_v37  ;;  %916 = vmatprep.subr.bf16.mxu1 %v2278_v38  ;;  %v2225_v37 = vcombine.low %v64_v27, %v68_v28  ;;  %v2216_v38 = vcombine.high %v55_v33, %v59_v34  ;;  %v140_v20 = vld [vmem:[%s3610_s1 + $0x378] sm:$0xff] }
  0x34   :  { %v128_v27 = vld [vmem:[%s3610_s1 + $0x318] sm:$0xff] }
  0x35   :  { %v132_v28 = vld [vmem:[%s3610_s1 + $0x338] sm:$0xff] }
  0x36   :  { %874 = vmatpush2.bf16.msra.mxu0 %v2275_v43  ;;  %917 = vmatpush2.bf16.msra.mxu1 %v2277_v44  ;;  %v52_v43 = vld [vmem:[%s3610_s1 + $0xb8] sm:$0xff]  ;;  %v2215_v44 = vcombine.low %v55_v33, %v59_v34  ;;  %v2290_v33 = vcombine.high %v128_v27, %v132_v28  ;;  %v119_v34 = vld [vmem:[%s3610_s1 + $0x2d0] sm:$0xff] }
  0x37   :  { %875 = vmatprep.subr.bf16.mxu0 %v2268_v45  ;;  %918 = vmatprep.subr.bf16.mxu1 %v2270_v46  ;;  %v39_v45 = vld [vmem:[%s3610_s1 + $0x50] sm:$0xff]  ;;  %v2209_v55 = vcombine.low %v48_v42, %v52_v43 }
  0x38   :  { %v43_v46 = vld [vmem:[%s3610_s1 + $0x70] sm:$0xff] }
  0x39   :  { %v2200_v57 = vcombine.high %v39_v45, %v43_v46 }
  0x3a   :  { %876 = vmatpush2.bf16.msra.mxu0 %v2267_v51  ;;  %919 = vmatpush2.bf16.msra.mxu1 %v2269_v52  ;;  %v2210_v51 = vcombine.high %v48_v42, %v52_v43  ;;  %v2207_v52 = vcombine.low %v47_v39, %v51_v41  ;;  %v111_v41 = vld [vmem:[%s3610_s1 + $0x290] sm:$0xff]  ;;  %v112_v43 = vld [vmem:[%s3610_s1 + $0x298] sm:$0xff] }
  0x3b   :  { %877 = vmatprep.subr.bf16.mxu0 %v2260_v53  ;;  %920 = vmatprep.subr.bf16.mxu1 %v2262_v54  ;;  %v31_v53 = vld [vmem:[%s3610_s1 + $0x10] sm:$0xff] }
  0x3c   :  { %v35_v54 = vld [vmem:[%s3610_s1 + $0x30] sm:$0xff] }
  0x3d   :  { %v2192_v1 = vcombine.high %v31_v53, %v35_v54  ;;  %v115_v42 = vld [vmem:[%s3610_s1 + $0x2b0] sm:$0xff] }
  0x3e   :  { %878 = vmatpush2.bf16.msra.mxu0 %v2259_v60  ;;  %921 = vmatpush2.bf16.msra.mxu1 %v2261_v61  ;;  %v2202_v60 = vcombine.high %v40_v49, %v44_v50  ;;  %v2199_v61 = vcombine.low %v39_v45, %v43_v46  ;;  %v103_v49 = vld [vmem:[%s3610_s1 + $0x250] sm:$0xff] }
  0x3f   :  { %879 = vmatprep.subr.bf16.mxu0 %v2252_v62  ;;  %922 = vmatprep.subr.bf16.mxu1 %v2254_v63  ;;  %v151_v62 = vld [vmem:[%s3610_s1 + $0x3d0] sm:$0xff] }
  0x40   :  { %v155_v63 = vld [vmem:[%s3610_s1 + $0x3f0] sm:$0xff] }
  0x41   :  { %v2312_v10 = vcombine.high %v151_v62, %v155_v63  ;;  %v107_v50 = vld [vmem:[%s3610_s1 + $0x270] sm:$0xff] }
  0x42   :  { %880 = vmatpush2.bf16.msra.mxu0 %v2251_v4  ;;  %923 = vmatpush2.bf16.msra.mxu1 %v2253_v5  ;;  %v2194_v4 = vcombine.high %v32_v58, %v36_v59  ;;  %v2191_v5 = vcombine.low %v31_v53, %v35_v54  ;;  %v2271_v53 = vcombine.low %v111_v41, %v115_v42  ;;  %v95_v58 = vld [vmem:[%s3610_s1 + $0x210] sm:$0xff] }
  0x43   :  { %935 = vmatprep.subr.bf16.mxu0 %v2248_v7  ;;  %978 = vmatprep.subr.bf16.mxu1 %v2250_v8  ;;  %v143_v7 = vld [vmem:[%s3610_s1 + $0x390] sm:$0xff] }
  0x44   :  { %v147_v8 = vld [vmem:[%s3610_s1 + $0x3b0] sm:$0xff] }
  0x45   :  { %882 = vmatmul.mubr.bf16.vlgmr.msra.gmra.mxu0 %v2947_v6  ;;  %925 = vmatmul.mubr.bf16.vlgmr.msra.gmra.mxu1 %v2947_v6  ;;  %v2304_v18 = vcombine.high %v143_v7, %v147_v8  ;;  %v99_v59 = vld [vmem:[%s3610_s1 + $0x230] sm:$0xff] }
  0x46   :  { %936 = vmatpush1.bf16.msra.mxu0 %v2247_v13  ;;  %979 = vmatpush1.bf16.msra.mxu1 %v2249_v14  ;;  %v2314_v13 = vcombine.high %v152_v2, %v156_v3  ;;  %v2311_v14 = vcombine.low %v151_v62, %v155_v63  ;;  %v2263_v62 = vcombine.low %v103_v49, %v107_v50 }
  0x47   :  { %937 = vmatprep.subr.bf16.mxu0 %v2240_v15  ;;  %980 = vmatprep.subr.bf16.mxu1 %v2242_v16  ;;  %v135_v15 = vld [vmem:[%s3610_s1 + $0x350] sm:$0xff]  ;;  %v2255_v2 = vcombine.low %v95_v58, %v99_v59 }
  0x48   :  { %967 = vmatprep.mubr.bf16.mxu0 %v2826_v56  ;;  %1010 = vmatprep.mubr.bf16.mxu1 %v2826_v56  ;;  %v56_v56 = vld [vmem:[%s3610_s1 + $0xd8] sm:$0xff]  ;;  %v139_v16 = vld [vmem:[%s3610_s1 + $0x370] sm:$0xff] }
  0x49   :  { %v2218_v40 = vcombine.high %v56_v56, %v60_v35  ;;  %v2217_v47 = vcombine.low %v56_v56, %v60_v35  ;;  %v2296_v26 = vcombine.high %v135_v15, %v139_v16  ;;  %v123_v56 = vld [vmem:[%s3610_s1 + $0x2f0] sm:$0xff]  ;;  %v120_v35 = vld [vmem:[%s3610_s1 + $0x2d8] sm:$0xff] }
  0x4a   :  { %938 = vmatpush1.bf16.msra.mxu0 %v2239_v21  ;;  %981 = vmatpush1.bf16.msra.mxu1 %v2241_v22  ;;  %v2306_v21 = vcombine.high %v144_v11, %v148_v12  ;;  %v2303_v22 = vcombine.low %v143_v7, %v147_v8  ;;  %v2280_v39 = vcombine.high %v119_v34, %v123_v56  ;;  %v2485_v7 = vld [vmem:[%s3612_s3 + $0x70] ss:$8 sps:$4 sm:$0xff]   ;;  %v2491_v11 = vld [vmem:[%s3612_s3 + $0x60] ss:$8 sps:$4 sm:$0xff]  }
  0x4b   :  { %939 = vmatprep.subr.bf16.mxu0 %v2232_v23  ;;  %982 = vmatprep.subr.bf16.mxu1 %v2234_v24  ;;  %v127_v23 = vld [vmem:[%s3610_s1 + $0x310] sm:$0xff]  ;;  %v2279_v45 = vcombine.low %v119_v34, %v123_v56  ;;  %v2494_v12 = vld [vmem:[%s3612_s3 + $0x160] ss:$8 sps:$4 sm:$0xff]  }
  0x4c   :  { %v131_v24 = vld [vmem:[%s3610_s1 + $0x330] sm:$0xff]  ;;  %v2527_v34 = vld [vmem:[%s3612_s3] ss:$8 sps:$4 sm:$0xff]  }
  0x4d   :  { %v2488_v8 = vld [vmem:[%s3612_s3 + $0x170] ss:$8 sps:$4 sm:$0xff]   ;;  %v2530_v56 = vld [vmem:[%s3612_s3 + $0x100] ss:$8 sps:$4 sm:$0xff]  }
  0x4e   :  { %940 = vmatpush1.bf16.msra.mxu0 %v2231_v29  ;;  %983 = vmatpush1.bf16.msra.mxu1 %v2233_v30  ;;  %v2298_v29 = vcombine.high %v136_v19, %v140_v20  ;;  %v2295_v30 = vcombine.low %v135_v15, %v139_v16  ;;  %v2500_v15 = vld [vmem:[%s3612_s3 + $0x150] ss:$8 sps:$4 sm:$0xff]   ;;  %v2505_v16 = vld [vmem:[%s3612_s3 + $0x44] ss:$8 sps:$4 sm:$0xff]  }
  0x4f   :  { %941 = vmatprep.subr.bf16.mxu0 %v2224_v31  ;;  %984 = vmatprep.subr.bf16.mxu1 %v2226_v32  ;;  %v2297_v31 = vcombine.low %v136_v19, %v140_v20  ;;  %v2288_v32 = vcombine.high %v127_v23, %v131_v24  ;;  %v2506_v19 = vld [vmem:[%s3612_s3 + $0x140] ss:$8 sps:$4 sm:$0xff]   ;;  %v2511_v20 = vld [vmem:[%s3612_s3 + $0x34] ss:$8 sps:$4 sm:$0xff]  }
  0x52   :  { %942 = vmatpush1.bf16.msra.mxu0 %v2223_v36  ;;  %985 = vmatpush1.bf16.msra.mxu1 %v2225_v37  ;;  %v124_v36 = vld [vmem:[%s3610_s1 + $0x2f8] sm:$0xff]  ;;  %v2287_v37 = vcombine.low %v127_v23, %v131_v24  ;;  %v2517_v24 = vld [vmem:[%s3612_s3 + $0x24] ss:$8 sps:$4 sm:$0xff]  }
  0x53   :  { %943 = vmatprep.subr.bf16.mxu0 %v2216_v38  ;;  %986 = vmatprep.subr.bf16.mxu1 %v2218_v40  ;;  %v2289_v38 = vcombine.low %v128_v27, %v132_v28  ;;  %v2282_v40 = vcombine.high %v120_v35, %v124_v36  ;;  %v2281_v46 = vcombine.low %v120_v35, %v124_v36  ;;  %v2512_v23 = vld [vmem:[%s3612_s3 + $0x130] ss:$8 sps:$4 sm:$0xff]   ;;  %v2518_v27 = vld [vmem:[%s3612_s3 + $0x120] ss:$8 sps:$4 sm:$0xff]   ;;  %v2523_v28 = vld [vmem:[%s3612_s3 + $0x14] ss:$8 sps:$4 sm:$0xff]  }
  0x54   :  { %v2535_v35 = vld [vmem:[%s3612_s3 + $0xf4] ss:$8 sps:$4 sm:$0xff]  }
  0x55   :  { %v2538_v36 = vld [vmem:[%s3612_s3 + $0x1f4] ss:$8 sps:$4 sm:$0xff]  }
  0x56   :  { %944 = vmatpush1.bf16.msra.mxu0 %v2215_v44  ;;  %987 = vmatpush1.bf16.msra.mxu1 %v2217_v47  ;;  %v116_v44 = vld [vmem:[%s3610_s1 + $0x2b8] sm:$0xff]  ;;  %v2272_v47 = vcombine.high %v111_v41, %v115_v42  ;;  %v2539_v41 = vld [vmem:[%s3612_s3 + $0xe0] ss:$8 sps:$4 sm:$0xff]  }
  0x57   :  { %945 = vmatprep.subr.bf16.mxu0 %v2208_v48  ;;  %988 = vmatprep.subr.bf16.mxu1 %v2210_v51  ;;  %v2274_v48 = vcombine.high %v112_v43, %v116_v44  ;;  %v104_v51 = vld [vmem:[%s3610_s1 + $0x258] sm:$0xff]  ;;  %v2273_v54 = vcombine.low %v112_v43, %v116_v44  ;;  %v2542_v42 = vld [vmem:[%s3612_s3 + $0x1e0] ss:$8 sps:$4 sm:$0xff]  }
  0x58   :  { %v2547_v43 = vld [vmem:[%s3612_s3 + $0xd4] ss:$8 sps:$4 sm:$0xff]  }
  0x59   :  { %v2550_v44 = vld [vmem:[%s3612_s3 + $0x1d4] ss:$8 sps:$4 sm:$0xff]  }
  0x5a   :  { %946 = vmatpush1.bf16.msra.mxu0 %v2207_v52  ;;  %989 = vmatpush1.bf16.msra.mxu1 %v2209_v55  ;;  %v108_v52 = vld [vmem:[%s3610_s1 + $0x278] sm:$0xff]  ;;  %v2264_v55 = vcombine.high %v103_v49, %v107_v50  ;;  %v2551_v49 = vld [vmem:[%s3612_s3 + $0xc0] ss:$8 sps:$4 sm:$0xff]  }
  0x5b   :  { %947 = vmatprep.subr.bf16.mxu0 %v2200_v57  ;;  %990 = vmatprep.subr.bf16.mxu1 %v2202_v60  ;;  %v2266_v57 = vcombine.high %v104_v51, %v108_v52  ;;  %v96_v60 = vld [vmem:[%s3610_s1 + $0x218] sm:$0xff]  ;;  %v2265_v63 = vcombine.low %v104_v51, %v108_v52  ;;  %v2554_v50 = vld [vmem:[%s3612_s3 + $0x1c0] ss:$8 sps:$4 sm:$0xff]  }
  0x5c   :  { %v2559_v51 = vld [vmem:[%s3612_s3 + $0xb4] ss:$8 sps:$4 sm:$0xff]  }
  0x5d   :  { %v2562_v52 = vld [vmem:[%s3612_s3 + $0x1b4] ss:$8 sps:$4 sm:$0xff]  }
  0x5e   :  { %948 = vmatpush1.bf16.msra.mxu0 %v2199_v61  ;;  %991 = vmatpush1.bf16.msra.mxu1 %v2201_v0  ;;  %v100_v61 = vld [vmem:[%s3610_s1 + $0x238] sm:$0xff]  ;;  %v2256_v0 = vcombine.high %v95_v58, %v99_v59  ;;  %v2563_v58 = vld [vmem:[%s3612_s3 + $0xa0] ss:$8 sps:$4 sm:$0xff]  }
  0x5f   :  { %949 = vmatprep.subr.bf16.mxu0 %v2192_v1  ;;  %992 = vmatprep.subr.bf16.mxu1 %v2194_v4  ;;  %v2258_v1 = vcombine.high %v96_v60, %v100_v61  ;;  %v2257_v3 = vcombine.low %v96_v60, %v100_v61  ;;  %v2487_v4 = vld [vmem:[%s3612_s3 + $0x74] ss:$8 sps:$4 sm:$0xff]   ;;  %v2566_v59 = vld [vmem:[%s3612_s3 + $0x1a0] ss:$8 sps:$4 sm:$0xff]  }
  0x60   :  { %v2571_v60 = vld [vmem:[%s3612_s3 + $0x94] ss:$8 sps:$4 sm:$0xff]  }
  0x61   :  { %v2574_v61 = vld [vmem:[%s3612_s3 + $0x194] ss:$8 sps:$4 sm:$0xff]  }
  0x62   :  { %950 = vmatpush1.bf16.msra.mxu0 %v2191_v5  ;;  %993 = vmatpush1.bf16.msra.mxu1 %v2193_v9  ;;  %v2490_v5 = vld [vmem:[%s3612_s3 + $0x174] ss:$8 sps:$4 sm:$0xff]   ;;  %v2493_v9 = vld [vmem:[%s3612_s3 + $0x64] ss:$8 sps:$4 sm:$0xff]  }
  0x63   :  { %951 = vmatprep.subr.bf16.mxu0 %v2312_v10  ;;  %994 = vmatprep.subr.bf16.mxu1 %v2314_v13  ;;  %v2496_v10 = vld [vmem:[%s3612_s3 + $0x164] ss:$8 sps:$4 sm:$0xff]   ;;  %v2499_v13 = vld [vmem:[%s3612_s3 + $0x54] ss:$8 sps:$4 sm:$0xff]  }
  0x66   :  { %952 = vmatpush2.bf16.msra.mxu0 %v2311_v14  ;;  %995 = vmatpush2.bf16.msra.mxu1 %v2313_v17  ;;  %v2497_v14 = vld [vmem:[%s3612_s3 + $0x50] ss:$8 sps:$4 sm:$0xff]   ;;  %v2508_v17 = vld [vmem:[%s3612_s3 + $0x144] ss:$8 sps:$4 sm:$0xff]  }
  0x67   :  { %953 = vmatprep.subr.bf16.mxu0 %v2304_v18  ;;  %996 = vmatprep.subr.bf16.mxu1 %v2306_v21  ;;  %v2503_v18 = vld [vmem:[%s3612_s3 + $0x40] ss:$8 sps:$4 sm:$0xff]   ;;  %v2514_v21 = vld [vmem:[%s3612_s3 + $0x134] ss:$8 sps:$4 sm:$0xff]  }
  0x6a   :  { %954 = vmatpush2.bf16.msra.mxu0 %v2303_v22  ;;  %997 = vmatpush2.bf16.msra.mxu1 %v2305_v25  ;;  %v2509_v22 = vld [vmem:[%s3612_s3 + $0x30] ss:$8 sps:$4 sm:$0xff]   ;;  %v2520_v25 = vld [vmem:[%s3612_s3 + $0x124] ss:$8 sps:$4 sm:$0xff]  }
  0x6b   :  { %955 = vmatprep.subr.bf16.mxu0 %v2296_v26  ;;  %998 = vmatprep.subr.bf16.mxu1 %v2298_v29  ;;  %v2515_v26 = vld [vmem:[%s3612_s3 + $0x20] ss:$8 sps:$4 sm:$0xff]   ;;  %v2526_v29 = vld [vmem:[%s3612_s3 + $0x114] ss:$8 sps:$4 sm:$0xff]  }
  0x6e   :  { %956 = vmatpush2.bf16.msra.mxu0 %v2295_v30  ;;  %999 = vmatpush2.bf16.msra.mxu1 %v2297_v31  ;;  %v2521_v30 = vld [vmem:[%s3612_s3 + $0x10] ss:$8 sps:$4 sm:$0xff]  }
  0x6f   :  { %957 = vmatprep.subr.bf16.mxu0 %v2288_v32  ;;  %1000 = vmatprep.subr.bf16.mxu1 %v2290_v33  ;;  %v2524_v31 = vld [vmem:[%s3612_s3 + $0x110] ss:$8 sps:$4 sm:$0xff]   ;;  %v2529_v32 = vld [vmem:[%s3612_s3 + $0x4] ss:$8 sps:$4 sm:$0xff]  }
  0x70   :  { %v2532_v33 = vld [vmem:[%s3612_s3 + $0x104] ss:$8 sps:$4 sm:$0xff]  }
  0x72   :  { %958 = vmatpush2.bf16.msra.mxu0 %v2287_v37  ;;  %1001 = vmatpush2.bf16.msra.mxu1 %v2289_v38  ;;  %v2533_v37 = vld [vmem:[%s3612_s3 + $0xf0] ss:$8 sps:$4 sm:$0xff]  }
  0x73   :  { %959 = vmatprep.subr.bf16.mxu0 %v2280_v39  ;;  %1002 = vmatprep.subr.bf16.mxu1 %v2282_v40  ;;  %v2536_v38 = vld [vmem:[%s3612_s3 + $0x1f0] ss:$8 sps:$4 sm:$0xff]   ;;  %v2541_v39 = vld [vmem:[%s3612_s3 + $0xe4] ss:$8 sps:$4 sm:$0xff]  }
  0x74   :  { %v2544_v40 = vld [vmem:[%s3612_s3 + $0x1e4] ss:$8 sps:$4 sm:$0xff]  }
  0x76   :  { %960 = vmatpush2.bf16.msra.mxu0 %v2279_v45  ;;  %1003 = vmatpush2.bf16.msra.mxu1 %v2281_v46  ;;  %v2545_v45 = vld [vmem:[%s3612_s3 + $0xd0] ss:$8 sps:$4 sm:$0xff]  }
  0x77   :  { %961 = vmatprep.subr.bf16.mxu0 %v2272_v47  ;;  %1004 = vmatprep.subr.bf16.mxu1 %v2274_v48  ;;  %v2548_v46 = vld [vmem:[%s3612_s3 + $0x1d0] ss:$8 sps:$4 sm:$0xff]   ;;  %v2553_v47 = vld [vmem:[%s3612_s3 + $0xc4] ss:$8 sps:$4 sm:$0xff]  }
  0x78   :  { %v2556_v48 = vld [vmem:[%s3612_s3 + $0x1c4] ss:$8 sps:$4 sm:$0xff]  }
  0x7a   :  { %962 = vmatpush2.bf16.msra.mxu0 %v2271_v53  ;;  %1005 = vmatpush2.bf16.msra.mxu1 %v2273_v54  ;;  %v2557_v53 = vld [vmem:[%s3612_s3 + $0xb0] ss:$8 sps:$4 sm:$0xff]  }
  0x7b   :  { %963 = vmatprep.subr.bf16.mxu0 %v2264_v55  ;;  %1006 = vmatprep.subr.bf16.mxu1 %v2266_v57  ;;  %v2560_v54 = vld [vmem:[%s3612_s3 + $0x1b0] ss:$8 sps:$4 sm:$0xff]   ;;  %v2565_v55 = vld [vmem:[%s3612_s3 + $0xa4] ss:$8 sps:$4 sm:$0xff]  }
  0x7c   :  { %v2568_v57 = vld [vmem:[%s3612_s3 + $0x1a4] ss:$8 sps:$4 sm:$0xff]  }
  0x7e   :  { %964 = vmatpush2.bf16.msra.mxu0 %v2263_v62  ;;  %1007 = vmatpush2.bf16.msra.mxu1 %v2265_v63  ;;  %v2569_v62 = vld [vmem:[%s3612_s3 + $0x90] ss:$8 sps:$4 sm:$0xff]  }
  0x7f   :  { %965 = vmatprep.subr.bf16.mxu0 %v2256_v0  ;;  %1008 = vmatprep.subr.bf16.mxu1 %v2258_v1  ;;  %v2572_v63 = vld [vmem:[%s3612_s3 + $0x190] ss:$8 sps:$4 sm:$0xff]   ;;  %v2577_v0 = vld [vmem:[%s3612_s3 + $0x84] ss:$8 sps:$4 sm:$0xff]  }
  0x80   :  { %v2580_v1 = vld [vmem:[%s3612_s3 + $0x184] ss:$8 sps:$4 sm:$0xff]  }
  0x82   :  { %966 = vmatpush2.bf16.msra.mxu0 %v2255_v2  ;;  %1009 = vmatpush2.bf16.msra.mxu1 %v2257_v3  ;;  %v2575_v2 = vld [vmem:[%s3612_s3 + $0x80] ss:$8 sps:$4 sm:$0xff]  }
  0x83   :  { %1825 = vmatprep.subr.bf16.mxu0 %v2487_v4  ;;  %1868 = vmatprep.subr.bf16.mxu1 %v2490_v5  ;;  %v2578_v3 = vld [vmem:[%s3612_s3 + $0x180] ss:$8 sps:$4 sm:$0xff]   ;;  %v2583_v4 = vld [vmem:[%s3612_s3 + $0x274] ss:$8 sps:$4 sm:$0xff]  }
  0x84   :  { %v2586_v5 = vld [vmem:[%s3612_s3 + $0x374] ss:$8 sps:$4 sm:$0xff]  }
  0x85   :  { %968 = vmatmul.mubr.bf16.vlgmr.msra.gmra.mxu0 %v2947_v6  ;;  %1011 = vmatmul.mubr.bf16.vlgmr.msra.gmra.mxu1 %v2947_v6  ;;  %v2502_v6 = vld [vmem:[%s3612_s3 + $0x154] ss:$8 sps:$4 sm:$0xff]  }
  0x86   :  { %1826 = vmatpush1.bf16.msra.mxu0 %v2485_v7  ;;  %1869 = vmatpush1.bf16.msra.mxu1 %v2488_v8  ;;  %v159_v7 = vlaneseq }
  0x87   :  { %1827 = vmatprep.subr.bf16.mxu0 %v2493_v9  ;;  %1870 = vmatprep.subr.bf16.mxu1 %v2496_v10 }
  0x88   :  { %v3333_v8 = vshrl.u32 %v159_v7, 7  ;;  %v2620_v7 = vld [vmem:[%s3612_s3 + $0x310] ss:$8 sps:$4 sm:$0xff]  }
  0x8a   :  { %1828 = vmatpush1.bf16.msra.mxu0 %v2491_v11  ;;  %1871 = vmatpush1.bf16.msra.mxu1 %v2494_v12  ;;  %v169_v9 = vsub.s32 2, %v3333_v8  ;;  %v165_v10 = vsub.s32 1, %v3333_v8  ;;  %v3340_v11 = vld [vmem:[%s3613_s2] sm:$0xff]  ;;  %v161_v12 = vsub.s32 0, %v3333_v8 }
  0x8b   :  { %1829 = vmatprep.subr.bf16.mxu0 %v2499_v13  ;;  %1872 = vmatprep.subr.bf16.mxu1 %v2502_v6  ;;  %v173_v13 = vsub.s32 3, %v3333_v8 }
  0x8e   :  { %1830 = vmatpush1.bf16.msra.mxu0 %v2497_v14  ;;  %1873 = vmatpush1.bf16.msra.mxu1 %v2500_v15  ;;  %v170_v14 = vrot.slane %v3340_v11, %v169_v9  ;;  %v2625_v9 = vld [vmem:[%s3612_s3 + $0x204] ss:$8 sps:$4 sm:$0xff]  }
  0x8f   :  { %1831 = vmatprep.subr.bf16.mxu0 %v2505_v16  ;;  %1874 = vmatprep.subr.bf16.mxu1 %v2508_v17  ;;  %v166_v16 = vrot.slane %v3340_v11, %v165_v10  ;;  %v162_v17 = vrot.slane %v3340_v11, %v161_v12 }
  0x92   :  { %1832 = vmatpush1.bf16.msra.mxu0 %v2503_v18  ;;  %1875 = vmatpush1.bf16.msra.mxu1 %v2506_v19  ;;  %v174_v19 = vrot.slane %v3340_v11, %v173_v13  ;;  %v2628_v13 = vld [vmem:[%s3612_s3 + $0x304] ss:$8 sps:$4 sm:$0xff]  }
  0x93   :  { %1833 = vmatprep.subr.bf16.mxu0 %v2511_v20  ;;  %1876 = vmatprep.subr.bf16.mxu1 %v2514_v21 }
  0x96   :  { %1834 = vmatpush1.bf16.msra.mxu0 %v2509_v22  ;;  %1877 = vmatpush1.bf16.msra.mxu1 %v2512_v23 }
  0x97   :  { %1835 = vmatprep.subr.bf16.mxu0 %v2517_v24  ;;  %1878 = vmatprep.subr.bf16.mxu1 %v2520_v25 }
  0x9a   :  { %1836 = vmatpush1.bf16.msra.mxu0 %v2515_v26  ;;  %1879 = vmatpush1.bf16.msra.mxu1 %v2518_v27 }
  0x9b   :  { %1837 = vmatprep.subr.bf16.mxu0 %v2523_v28  ;;  %1880 = vmatprep.subr.bf16.mxu1 %v2526_v29 }
  0x9e   :  { %1838 = vmatpush1.bf16.msra.mxu0 %v2521_v30  ;;  %1881 = vmatpush1.bf16.msra.mxu1 %v2524_v31 }
  0x9f   :  { %1839 = vmatprep.subr.bf16.mxu0 %v2529_v32  ;;  %1882 = vmatprep.subr.bf16.mxu1 %v2532_v33 }
  0xa2   :  { %1840 = vmatpush1.bf16.msra.mxu0 %v2527_v34  ;;  %1883 = vmatpush1.bf16.msra.mxu1 %v2530_v56 }
  0xa3   :  { %1841 = vmatprep.subr.bf16.mxu0 %v2535_v35  ;;  %1884 = vmatprep.subr.bf16.mxu1 %v2538_v36 }
  0xa6   :  { %1842 = vmatpush2.bf16.msra.mxu0 %v2533_v37  ;;  %1885 = vmatpush2.bf16.msra.mxu1 %v2536_v38 }
  0xa7   :  { %1843 = vmatprep.subr.bf16.mxu0 %v2541_v39  ;;  %1886 = vmatprep.subr.bf16.mxu1 %v2544_v40 }
  0xaa   :  { %1844 = vmatpush2.bf16.msra.mxu0 %v2539_v41  ;;  %1887 = vmatpush2.bf16.msra.mxu1 %v2542_v42  ;;  %v2581_v41 = vld [vmem:[%s3612_s3 + $0x270] ss:$8 sps:$4 sm:$0xff]  }
  0xab   :  { %1845 = vmatprep.subr.bf16.mxu0 %v2547_v43  ;;  %1888 = vmatprep.subr.bf16.mxu1 %v2550_v44  ;;  %v2584_v44 = vld [vmem:[%s3612_s3 + $0x370] ss:$8 sps:$4 sm:$0xff]  }
  0xae   :  { %1846 = vmatpush2.bf16.msra.mxu0 %v2545_v45  ;;  %1889 = vmatpush2.bf16.msra.mxu1 %v2548_v46  ;;  %v2589_v45 = vld [vmem:[%s3612_s3 + $0x264] ss:$8 sps:$4 sm:$0xff]  }
  0xaf   :  { %1847 = vmatprep.subr.bf16.mxu0 %v2553_v47  ;;  %1890 = vmatprep.subr.bf16.mxu1 %v2556_v48  ;;  %v2592_v47 = vld [vmem:[%s3612_s3 + $0x364] ss:$8 sps:$4 sm:$0xff]   ;;  %v2587_v48 = vld [vmem:[%s3612_s3 + $0x260] ss:$8 sps:$4 sm:$0xff]  }
  0xb2   :  { %1848 = vmatpush2.bf16.msra.mxu0 %v2551_v49  ;;  %1891 = vmatpush2.bf16.msra.mxu1 %v2554_v50  ;;  %v2590_v49 = vld [vmem:[%s3612_s3 + $0x360] ss:$8 sps:$4 sm:$0xff]   ;;  %v2595_v50 = vld [vmem:[%s3612_s3 + $0x254] ss:$8 sps:$4 sm:$0xff]  }
  0xb3   :  { %1849 = vmatprep.subr.bf16.mxu0 %v2559_v51  ;;  %1892 = vmatprep.subr.bf16.mxu1 %v2562_v52  ;;  %v2598_v51 = vld [vmem:[%s3612_s3 + $0x354] ss:$8 sps:$4 sm:$0xff]   ;;  %v2593_v52 = vld [vmem:[%s3612_s3 + $0x250] ss:$8 sps:$4 sm:$0xff]  }
  0xb6   :  { %1850 = vmatpush2.bf16.msra.mxu0 %v2557_v53  ;;  %1893 = vmatpush2.bf16.msra.mxu1 %v2560_v54  ;;  %v2596_v53 = vld [vmem:[%s3612_s3 + $0x350] ss:$8 sps:$4 sm:$0xff]   ;;  %v2601_v54 = vld [vmem:[%s3612_s3 + $0x244] ss:$8 sps:$4 sm:$0xff]  }
  0xb7   :  { %1851 = vmatprep.subr.bf16.mxu0 %v2565_v55  ;;  %1894 = vmatprep.subr.bf16.mxu1 %v2568_v57  ;;  %v2604_v55 = vld [vmem:[%s3612_s3 + $0x344] ss:$8 sps:$4 sm:$0xff]   ;;  %v2599_v57 = vld [vmem:[%s3612_s3 + $0x240] ss:$8 sps:$4 sm:$0xff]  }
  0xba   :  { %1852 = vmatpush2.bf16.msra.mxu0 %v2563_v58  ;;  %1895 = vmatpush2.bf16.msra.mxu1 %v2566_v59  ;;  %v2602_v58 = vld [vmem:[%s3612_s3 + $0x340] ss:$8 sps:$4 sm:$0xff]   ;;  %v2607_v59 = vld [vmem:[%s3612_s3 + $0x234] ss:$8 sps:$4 sm:$0xff]  }
  0xbb   :  { %1853 = vmatprep.subr.bf16.mxu0 %v2571_v60  ;;  %1896 = vmatprep.subr.bf16.mxu1 %v2574_v61  ;;  %v2610_v60 = vld [vmem:[%s3612_s3 + $0x334] ss:$8 sps:$4 sm:$0xff]   ;;  %v2605_v61 = vld [vmem:[%s3612_s3 + $0x230] ss:$8 sps:$4 sm:$0xff]  }
  0xbe   :  { %1854 = vmatpush2.bf16.msra.mxu0 %v2569_v62  ;;  %1897 = vmatpush2.bf16.msra.mxu1 %v2572_v63  ;;  %v2608_v62 = vld [vmem:[%s3612_s3 + $0x330] ss:$8 sps:$4 sm:$0xff]   ;;  %v2613_v63 = vld [vmem:[%s3612_s3 + $0x224] ss:$8 sps:$4 sm:$0xff]  }
  0xbf   :  { %1855 = vmatprep.subr.bf16.mxu0 %v2577_v0  ;;  %1898 = vmatprep.subr.bf16.mxu1 %v2580_v1  ;;  %v2616_v0 = vld [vmem:[%s3612_s3 + $0x324] ss:$8 sps:$4 sm:$0xff]   ;;  %v2611_v1 = vld [vmem:[%s3612_s3 + $0x220] ss:$8 sps:$4 sm:$0xff]  }
  0xc2   :  { %1856 = vmatpush2.bf16.msra.mxu0 %v2575_v2  ;;  %1899 = vmatpush2.bf16.msra.mxu1 %v2578_v3  ;;  %v2614_v2 = vld [vmem:[%s3612_s3 + $0x320] ss:$8 sps:$4 sm:$0xff]   ;;  %v2619_v3 = vld [vmem:[%s3612_s3 + $0x214] ss:$8 sps:$4 sm:$0xff]  }
  0xc3   :  { %1911 = vmatprep.subr.bf16.mxu0 %v2583_v4  ;;  %1954 = vmatprep.subr.bf16.mxu1 %v2586_v5  ;;  %v2622_v4 = vld [vmem:[%s3612_s3 + $0x314] ss:$8 sps:$4 sm:$0xff]   ;;  %v2617_v5 = vld [vmem:[%s3612_s3 + $0x210] ss:$8 sps:$4 sm:$0xff]  }
 0x105   :  { %v883_v6 = vpop.f32.mrf.mxu0  ;;  %v926_v15 = vpop.f32.mrf.mxu1 }
 0x106   :  { %v927_v22 = vadd.f32 %v926_v15, %v170_v14  ;;  %v884_v26 = vadd.f32 %v883_v6, %v162_v17  ;;  %v2623_v6 = vld [vmem:[%s3612_s3 + $0x200] ss:$8 sps:$4 sm:$0xff]   ;;  %v2631_v15 = vld [vmem:[%s3612_s3 + $0x2f4] ss:$8 sps:$4 sm:$0xff]  }
 0x107   :  { %v885_v18 = vpop.f32.mrf.mxu0  ;;  %v928_v20 = vpop.f32.mrf.mxu1 }
 0x108   :  { %v886_v23 = vadd.f32 %v885_v18, %v166_v16  ;;  %v929_v27 = vadd.f32 %v928_v20, %v174_v19  ;;  %v1023_v34 = vmax.f32 %v927_v22, 0.0  ;;  %v1021_v37 = vmax.f32 %v884_v26, 0.0  ;;  %v2632_v18 = vld [vmem:[%s3612_s3 + $0x3f0] ss:$8 sps:$4 sm:$0xff]   ;;  %v2640_v20 = vld [vmem:[%s3612_s3 + $0x3e4] ss:$8 sps:$4 sm:$0xff]  }
 0x109   :  { %v887_v21 = vpop.f32.mrf.mxu0  ;;  %v930_v25 = vpop.f32.mrf.mxu1  ;;  %v2638_v22 = vld [vmem:[%s3612_s3 + $0x3e0] ss:$8 sps:$4 sm:$0xff]   ;;  %v2644_v26 = vld [vmem:[%s3612_s3 + $0x3d0] ss:$8 sps:$4 sm:$0xff]  }
 0x10a   :  { %v888_v24 = vadd.f32 %v887_v21, %v162_v17  ;;  %v931_v28 = vadd.f32 %v930_v25, %v170_v14  ;;  %v1022_v56 = vmax.f32 %v886_v23, 0.0  ;;  %v1024_v38 = vmax.f32 %v929_v27, 0.0  ;;  %v2626_v14 = vld [vmem:[%s3612_s3 + $0x300] ss:$8 sps:$4 sm:$0xff]   ;;  %v2629_v17 = vld [vmem:[%s3612_s3 + $0x2f0] ss:$8 sps:$4 sm:$0xff]  }
 0x10b   :  { %v889_v29 = vpop.f32.mrf.mxu0  ;;  %v932_v31 = vpop.f32.mrf.mxu1  ;;  %v2635_v21 = vld [vmem:[%s3612_s3 + $0x2e0] ss:$8 sps:$4 sm:$0xff]   ;;  %v2643_v23 = vld [vmem:[%s3612_s3 + $0x2d4] ss:$8 sps:$4 sm:$0xff]   ;;  %v2641_v25 = vld [vmem:[%s3612_s3 + $0x2d0] ss:$8 sps:$4 sm:$0xff]  }
 0x10c   :  { %v890_v30 = vadd.f32 %v889_v29, %v166_v16  ;;  %v1029_v32 = vmax.f32 %v888_v24, 0.0  ;;  %v933_v33 = vadd.f32 %v932_v31, %v174_v19  ;;  %v1031_v35 = vmax.f32 %v931_v28, 0.0  ;;  %v2634_v16 = vld [vmem:[%s3612_s3 + $0x3f4] ss:$8 sps:$4 sm:$0xff]   ;;  %v2637_v19 = vld [vmem:[%s3612_s3 + $0x2e4] ss:$8 sps:$4 sm:$0xff]  }
 0x10d   :  { %v2646_v24 = vld [vmem:[%s3612_s3 + $0x3d4] ss:$8 sps:$4 sm:$0xff]   ;;  %v2649_v27 = vld [vmem:[%s3612_s3 + $0x2c4] ss:$8 sps:$4 sm:$0xff]   ;;  %v2647_v29 = vld [vmem:[%s3612_s3 + $0x2c0] ss:$8 sps:$4 sm:$0xff]  }
 0x10e   :  { %v1030_v36 = vmax.f32 %v890_v30, 0.0  ;;  %v1032_v39 = vmax.f32 %v933_v33, 0.0  ;;  %v1037_v42 = vpack.c.bf16 %v1029_v32, %v1021_v37  ;;  %v1039_v46 = vpack.c.bf16 %v1031_v35, %v1023_v34  ;;  %v2652_v28 = vld [vmem:[%s3612_s3 + $0x3c4] ss:$8 sps:$4 sm:$0xff]   ;;  %v2650_v30 = vld [vmem:[%s3612_s3 + $0x3c0] ss:$8 sps:$4 sm:$0xff]  }
 0x10f   :  { %v2655_v31 = vld [vmem:[%s3612_s3 + $0x2b4] ss:$8 sps:$4 sm:$0xff]   ;;  %v2653_v33 = vld [vmem:[%s3612_s3 + $0x2b0] ss:$8 sps:$4 sm:$0xff]   ;;  %v181_v35 = vsub.s32 5, %v3333_v8  ;;  %v177_v37 = vsub.s32 4, %v3333_v8 }
 0x110   :  { %v1038_v40 = vpack.c.bf16 %v1030_v36, %v1022_v56  ;;  %v1040_v43 = vpack.c.bf16 %v1032_v39, %v1024_v38  ;;  %v2658_v32 = vld [vmem:[%s3612_s3 + $0x3b4] ss:$8 sps:$4 sm:$0xff]   ;;  %v2656_v34 = vld [vmem:[%s3612_s3 + $0x3b0] ss:$8 sps:$4 sm:$0xff]   ;;  %v2661_v56 = vld [vmem:[%s3612_s3 + $0x2a4] ss:$8 sps:$4 sm:$0xff]  }
 0x111   :  { %v2664_v36 = vld [vmem:[%s3612_s3 + $0x3a4] ss:$8 sps:$4 sm:$0xff]   ;;  %v189_v38 = vsub.s32 7, %v3333_v8  ;;  %v185_v39 = vsub.s32 6, %v3333_v8 }
 0x112   :  { %1857 = vmatprep.mubr.bf16.mxu0 %v1038_v40  ;;  %1900 = vmatprep.mubr.bf16.mxu1 %v1040_v43  ;;  %v2659_v40 = vld [vmem:[%s3612_s3 + $0x2a0] ss:$8 sps:$4 sm:$0xff]   ;;  %v2667_v43 = vld [vmem:[%s3612_s3 + $0x294] ss:$8 sps:$4 sm:$0xff]  }
 0x113   :  { %1858 = vmatmul.mubr.bf16.vlgmr.msra.gmra.mxu0 %v1037_v42  ;;  %1901 = vmatmul.mubr.bf16.vlgmr.msra.gmra.mxu1 %v1039_v46  ;;  %v2662_v42 = vld [vmem:[%s3612_s3 + $0x3a0] ss:$8 sps:$4 sm:$0xff]   ;;  %v2670_v46 = vld [vmem:[%s3612_s3 + $0x394] ss:$8 sps:$4 sm:$0xff]  }
 0x114   :  { %1912 = vmatpush1.bf16.msra.mxu0 %v2581_v41  ;;  %1955 = vmatpush1.bf16.msra.mxu1 %v2584_v44 }
 0x115   :  { %1913 = vmatprep.subr.bf16.mxu0 %v2589_v45  ;;  %1956 = vmatprep.subr.bf16.mxu1 %v2592_v47  ;;  %v182_v45 = vrot.slane %v3340_v11, %v181_v35  ;;  %v178_v47 = vrot.slane %v3340_v11, %v177_v37  ;;  %v2691_v35 = vld [vmem:[%s3614_s5 + $0x40] sm:$0xff]  }
 0x118   :  { %1914 = vmatpush1.bf16.msra.mxu0 %v2587_v48  ;;  %1957 = vmatpush1.bf16.msra.mxu1 %v2590_v49  ;;  %v190_v49 = vrot.slane %v3340_v11, %v189_v38 }
 0x119   :  { %1915 = vmatprep.subr.bf16.mxu0 %v2595_v50  ;;  %1958 = vmatprep.subr.bf16.mxu1 %v2598_v51  ;;  %v186_v50 = vrot.slane %v3340_v11, %v185_v39 }
 0x11c   :  { %1916 = vmatpush1.bf16.msra.mxu0 %v2593_v52  ;;  %1959 = vmatpush1.bf16.msra.mxu1 %v2596_v53  ;;  %v2665_v52 = vld [vmem:[%s3612_s3 + $0x290] ss:$8 sps:$4 sm:$0xff]  }
 0x11d   :  { %1917 = vmatprep.subr.bf16.mxu0 %v2601_v54  ;;  %1960 = vmatprep.subr.bf16.mxu1 %v2604_v55  ;;  %v2668_v54 = vld [vmem:[%s3612_s3 + $0x390] ss:$8 sps:$4 sm:$0xff]   ;;  %v2673_v55 = vld [vmem:[%s3612_s3 + $0x284] ss:$8 sps:$4 sm:$0xff]  }
 0x120   :  { %1918 = vmatpush1.bf16.msra.mxu0 %v2599_v57  ;;  %1961 = vmatpush1.bf16.msra.mxu1 %v2602_v58 }
 0x121   :  { %1919 = vmatprep.subr.bf16.mxu0 %v2607_v59  ;;  %1962 = vmatprep.subr.bf16.mxu1 %v2610_v60  ;;  %v2676_v59 = vld [vmem:[%s3612_s3 + $0x384] ss:$8 sps:$4 sm:$0xff]  }
 0x124   :  { %1920 = vmatpush1.bf16.msra.mxu0 %v2605_v61  ;;  %1963 = vmatpush1.bf16.msra.mxu1 %v2608_v62 }
 0x125   :  { %1921 = vmatprep.subr.bf16.mxu0 %v2613_v63  ;;  %1964 = vmatprep.subr.bf16.mxu1 %v2616_v0 }
 0x128   :  { %1922 = vmatpush1.bf16.msra.mxu0 %v2611_v1  ;;  %1965 = vmatpush1.bf16.msra.mxu1 %v2614_v2 }
 0x129   :  { %1923 = vmatprep.subr.bf16.mxu0 %v2619_v3  ;;  %1966 = vmatprep.subr.bf16.mxu1 %v2622_v4  ;;  %v2671_v3 = vld [vmem:[%s3612_s3 + $0x280] ss:$8 sps:$4 sm:$0xff]  }
 0x12c   :  { %1924 = vmatpush1.bf16.msra.mxu0 %v2617_v5  ;;  %1967 = vmatpush1.bf16.msra.mxu1 %v2620_v7  ;;  %v2674_v7 = vld [vmem:[%s3612_s3 + $0x380] ss:$8 sps:$4 sm:$0xff]  }
 0x12d   :  { %1925 = vmatprep.subr.bf16.mxu0 %v2625_v9  ;;  %1968 = vmatprep.subr.bf16.mxu1 %v2628_v13 }
 0x130   :  { %1926 = vmatpush1.bf16.msra.mxu0 %v2623_v6  ;;  %1969 = vmatpush1.bf16.msra.mxu1 %v2626_v14 }
 0x131   :  { %1927 = vmatprep.subr.bf16.mxu0 %v2631_v15  ;;  %1970 = vmatprep.subr.bf16.mxu1 %v2634_v16 }
 0x134   :  { %1928 = vmatpush2.bf16.msra.mxu0 %v2629_v17  ;;  %1971 = vmatpush2.bf16.msra.mxu1 %v2632_v18 }
 0x135   :  { %1929 = vmatprep.subr.bf16.mxu0 %v2637_v19  ;;  %1972 = vmatprep.subr.bf16.mxu1 %v2640_v20 }
 0x138   :  { %1930 = vmatpush2.bf16.msra.mxu0 %v2635_v21  ;;  %1973 = vmatpush2.bf16.msra.mxu1 %v2638_v22  ;;  %v2677_v22 = vld [vmem:[%s3614_s5 + $0x78] sm:$0xff]  }
 0x139   :  { %1931 = vmatprep.subr.bf16.mxu0 %v2643_v23  ;;  %1974 = vmatprep.subr.bf16.mxu1 %v2646_v24  ;;  %v2678_v23 = vld [vmem:[%s3614_s5 + $0x38] sm:$0xff]   ;;  %v2679_v24 = vld [vmem:[%s3614_s5 + $0x70] sm:$0xff]  }
 0x13c   :  { %1932 = vmatpush2.bf16.msra.mxu0 %v2641_v25  ;;  %1975 = vmatpush2.bf16.msra.mxu1 %v2644_v26  ;;  %v2680_v25 = vld [vmem:[%s3614_s5 + $0x30] sm:$0xff]   ;;  %v2681_v26 = vld [vmem:[%s3614_s5 + $0x68] sm:$0xff]  }
 0x13d   :  { %1933 = vmatprep.subr.bf16.mxu0 %v2649_v27  ;;  %1976 = vmatprep.subr.bf16.mxu1 %v2652_v28  ;;  %v2682_v27 = vld [vmem:[%s3614_s5 + $0x28] sm:$0xff]   ;;  %v2683_v28 = vld [vmem:[%s3614_s5 + $0x60] sm:$0xff]  }
 0x140   :  { %1934 = vmatpush2.bf16.msra.mxu0 %v2647_v29  ;;  %1977 = vmatpush2.bf16.msra.mxu1 %v2650_v30  ;;  %v2684_v29 = vld [vmem:[%s3614_s5 + $0x20] sm:$0xff]   ;;  %v2685_v30 = vld [vmem:[%s3614_s5 + $0x58] sm:$0xff]  }
 0x141   :  { %1935 = vmatprep.subr.bf16.mxu0 %v2655_v31  ;;  %1978 = vmatprep.subr.bf16.mxu1 %v2658_v32  ;;  %v2686_v31 = vld [vmem:[%s3614_s5 + $0x18] sm:$0xff]   ;;  %v2687_v32 = vld [vmem:[%s3614_s5 + $0x50] sm:$0xff]  }
 0x144   :  { %1936 = vmatpush2.bf16.msra.mxu0 %v2653_v33  ;;  %1979 = vmatpush2.bf16.msra.mxu1 %v2656_v34  ;;  %v2688_v33 = vld [vmem:[%s3614_s5 + $0x10] sm:$0xff]   ;;  %v2689_v34 = vld [vmem:[%s3614_s5 + $0x48] sm:$0xff]  }
 0x145   :  { %v969_v41 = vpop.f32.mrf.mxu0  ;;  %1937 = vmatprep.subr.bf16.mxu0 %v2661_v56  ;;  %v1012_v44 = vpop.f32.mrf.mxu1  ;;  %1980 = vmatprep.subr.bf16.mxu1 %v2664_v36  ;;  %v2690_v56 = vld [vmem:[%s3614_s5 + $0x8] sm:$0xff]   ;;  %v2692_v36 = vld [vmem:[%s3614_s5] sm:$0xff]  }
 0x146   :  { %v970_v60 = vadd.f32 %v969_v41, %v178_v47  ;;  %v1013_v0 = vadd.f32 %v1012_v44, %v186_v50 }
 0x147   :  { %v971_v48 = vpop.f32.mrf.mxu0  ;;  %v1014_v51 = vpop.f32.mrf.mxu1 }
 0x148   :  { %1938 = vmatpush2.bf16.msra.mxu0 %v2659_v40  ;;  %1981 = vmatpush2.bf16.msra.mxu1 %v2662_v42  ;;  %v972_v57 = vadd.f32 %v971_v48, %v182_v45  ;;  %v1015_v61 = vadd.f32 %v1014_v51, %v190_v49  ;;  %v1025_v14 = vmax.f32 %v970_v60, 0.0  ;;  %v1027_v17 = vmax.f32 %v1013_v0, 0.0  ;;  %v1173_v40 = vld [vmem:[%s3615_s4] sm:$0x3] }
 0x149   :  { %v973_v53 = vpop.f32.mrf.mxu0  ;;  %1939 = vmatprep.subr.bf16.mxu0 %v2667_v43  ;;  %v1016_v11 = vpop.f32.mrf.mxu1  ;;  %1982 = vmatprep.subr.bf16.mxu1 %v2670_v46  ;;  %v1182_v42 = vrot.slane %v1173_v40, %v165_v10  ;;  %v1178_v43 = vrot.slane %v1173_v40, %v161_v12 }
 0x14a   :  { %v974_v58 = vadd.f32 %v973_v53, %v178_v47  ;;  %v1017_v62 = vadd.f32 %v1016_v11, %v186_v50  ;;  %v1026_v9 = vmax.f32 %v972_v57, 0.0  ;;  %v1028_v15 = vmax.f32 %v1015_v61, 0.0 }
 0x14b   :  { %v975_v63 = vpop.f32.mrf.mxu0  ;;  %v1018_v2 = vpop.f32.mrf.mxu1 }
 0x14c   :  { %v976_v1 = vadd.f32 %v975_v63, %v182_v45  ;;  %1940 = vmatpush2.bf16.msra.mxu0 %v2665_v52  ;;  %v1033_v4 = vmax.f32 %v974_v58, 0.0  ;;  %v1019_v5 = vadd.f32 %v1018_v2, %v190_v49  ;;  %1983 = vmatpush2.bf16.msra.mxu1 %v2668_v54  ;;  %v1035_v13 = vmax.f32 %v1017_v62, 0.0 }
 0x14d   :  { %1941 = vmatprep.subr.bf16.mxu0 %v2673_v55  ;;  %1984 = vmatprep.subr.bf16.mxu1 %v2676_v59 }
 0x14e   :  { %v1034_v6 = vmax.f32 %v976_v1, 0.0  ;;  %v1036_v16 = vmax.f32 %v1019_v5, 0.0  ;;  %v1041_v19 = vpack.c.bf16 %v1033_v4, %v1025_v14  ;;  %v1043_v21 = vpack.c.bf16 %v1035_v13, %v1027_v17 }
 0x150   :  { %v1042_v18 = vpack.c.bf16 %v1034_v6, %v1026_v9  ;;  %1942 = vmatpush2.bf16.msra.mxu0 %v2671_v3  ;;  %v1044_v20 = vpack.c.bf16 %v1036_v16, %v1028_v15  ;;  %1985 = vmatpush2.bf16.msra.mxu1 %v2674_v7  ;;  %v2443_v16 = vld [vmem:[%s3616_s6] ss:$0 sm:$0xff] }
 0x151   :  { %2460 = vmatprep.subr.bf16.mxu0 %v2677_v22 }
 0x152   :  { %1943 = vmatprep.mubr.bf16.mxu0 %v1042_v18  ;;  %1986 = vmatprep.mubr.bf16.mxu1 %v1044_v20 }
 0x153   :  { %1944 = vmatmul.mubr.bf16.vlgmr.msra.gmra.mxu0 %v1041_v19  ;;  %1987 = vmatmul.mubr.bf16.vlgmr.msra.gmra.mxu1 %v1043_v21 }
 0x154   :  { %2461 = vmatpush3.bf16.msra.mxu0 %v2678_v23 }
 0x155   :  { %2462 = vmatprep.subr.bf16.mxu0 %v2679_v24 }
 0x158   :  { %2463 = vmatpush3.bf16.msra.mxu0 %v2680_v25 }
 0x159   :  { %2464 = vmatprep.subr.bf16.mxu0 %v2681_v26 }
 0x15c   :  { %2465 = vmatpush3.bf16.msra.mxu0 %v2682_v27 }
 0x15d   :  { %2466 = vmatprep.subr.bf16.mxu0 %v2683_v28 }
 0x160   :  { %2467 = vmatpush3.bf16.msra.mxu0 %v2684_v29 }
 0x161   :  { %2468 = vmatprep.subr.bf16.mxu0 %v2685_v30 }
 0x164   :  { %2469 = vmatpush3.bf16.msra.mxu0 %v2686_v31 }
 0x165   :  { %2470 = vmatprep.subr.bf16.mxu0 %v2687_v32 }
 0x168   :  { %2471 = vmatpush3.bf16.msra.mxu0 %v2688_v33 }
 0x169   :  { %2472 = vmatprep.subr.bf16.mxu0 %v2689_v34 }
 0x16c   :  { %2473 = vmatpush3.bf16.msra.mxu0 %v2690_v56 }
 0x16d   :  { %2474 = vmatprep.subr.bf16.mxu0 %v2691_v35 }
 0x170   :  { %2475 = vmatpush3.bf16.msra.mxu0 %v2692_v36 }
 0x1d3   :  { %v1859_v37 = vpop.f32.mrf.mxu0  ;;  %v1902_v38 = vpop.f32.mrf.mxu1 }
 0x1d4   :  { %v1860_v47 = vadd.f32 %v1859_v37, %v1178_v43 }
 0x1d5   :  { %v1861_v39 = vpop.f32.mrf.mxu0  ;;  %v1904_v41 = vpop.f32.mrf.mxu1 }
 0x1d6   :  { %v1862_v46 = vadd.f32 %v1861_v39, %v1182_v42  ;;  %v1903_v55 = vadd.f32 %v1902_v38, %v1860_v47 }
 0x1d7   :  { %v1863_v44 = vpop.f32.mrf.mxu0  ;;  %v1906_v45 = vpop.f32.mrf.mxu1 }
 0x1d8   :  { %v1864_v49 = vadd.f32 %v1863_v44, %v1178_v43  ;;  %v1905_v52 = vadd.f32 %v1904_v41, %v1862_v46 }
 0x1d9   :  { %v1865_v48 = vpop.f32.mrf.mxu0  ;;  %v1908_v50 = vpop.f32.mrf.mxu1 }
 0x1da   :  { %v1866_v53 = vadd.f32 %v1865_v48, %v1182_v42  ;;  %v1907_v58 = vadd.f32 %v1906_v45, %v1864_v49 }
 0x1dc   :  { %v1909_v8 = vadd.f32 %v1908_v50, %v1866_v53 }
 0x213   :  { %v1945_v51 = vpop.f32.mrf.mxu0  ;;  %v1988_v54 = vpop.f32.mrf.mxu1 }
 0x214   :  { %v1946_v10 = vadd.f32 %v1945_v51, %v1903_v55 }
 0x215   :  { %v1947_v57 = vpop.f32.mrf.mxu0  ;;  %v1990_v59 = vpop.f32.mrf.mxu1 }
 0x216   :  { %v1948_v11 = vadd.f32 %v1947_v57, %v1905_v52  ;;  %v1989_v2 = vadd.f32 %v1988_v54, %v1946_v10 }
 0x217   :  { %v1949_v60 = vpop.f32.mrf.mxu0  ;;  %v1992_v61 = vpop.f32.mrf.mxu1 }
 0x218   :  { %v1950_v12 = vadd.f32 %v1949_v60, %v1907_v58  ;;  %v1991_v63 = vadd.f32 %v1990_v59, %v1948_v11  ;;  %v1997_v13 = vmax.f32 %v1989_v2, 0.0 }
 0x219   :  { %v1951_v62 = vpop.f32.mrf.mxu0  ;;  %v1994_v3 = vpop.f32.mrf.mxu1 }
 0x21a   :  { %v1993_v0 = vadd.f32 %v1992_v61, %v1950_v12  ;;  %v1952_v1 = vadd.f32 %v1951_v62, %v1909_v8  ;;  %v1998_v7 = vmax.f32 %v1991_v63, 0.0 }
 0x21c   :  { %v1995_v4 = vadd.f32 %v1994_v3, %v1952_v1  ;;  %v1999_v5 = vmax.f32 %v1993_v0, 0.0 }
 0x21e   :  { %v2000_v9 = vmax.f32 %v1995_v4, 0.0  ;;  %v2001_v14 = vpack.c.bf16 %v1999_v5, %v1997_v13 }
 0x220   :  { %v2002_v6 = vpack.c.bf16 %v2000_v9, %v1998_v7 }
 0x222   :  { %2170 = vmatprep.mubr.bf16.mxu0 %v2002_v6 }
 0x223   :  { %2171 = vmatmul.mubr.bf16.vlgmr.msra.gmra.mxu0 %v2001_v14 }
 0x2e3   :  { %v2476_v15 = vpop.f32.mrf.mxu0 }
 0x2e5   :  { %v2477_v17 = vpop.f32.mrf.mxu0 }
 0x2e6   :  { %v2478_v18 = vadd.f32 %v2477_v17, %v2476_v15 }
 0x2e7   :  { %v2479_v19 = vpop.f32.mrf.mxu0 }
 0x2e8   :  { %v2173_v20 = vadd.f32 %v2478_v18, %v2443_v16 }
 0x2e9   :  { %v2480_v21 = vpop.f32.mrf.mxu0 }
 0x2ea   :  { %2179 = vst [vmem:[%s3617_s7] sm:$0xff] %v2173_v20  ;;  %v2481_v22 = vadd.f32 %v2480_v21, %v2479_v19 }
 0x2ec   :  { %v2176_v23 = vadd.f32 %v2481_v22, %v2443_v16 }
 0x2ee   :  { %2180 = vst [vmem:[%s3617_s7 + $0x8] sm:$0xff] %v2176_v23 }

</bundles_post_ra>
